<compile_context>
chip_gen: v6e
topology: v6e:2x2x1
jax: 0.10.0
libtpu: 0.0.40
codegen_flags: <defaults>
</compile_context>

<pallas_src>
import math
import functools

import jax
import jax.numpy as jnp
from jax.experimental import pallas as pl
from jax.experimental.pallas import tpu as pltpu


# ----------------------------- Pallas kernel ------------------------------- #

def fused_subsampling_kernel(
    # inputs
    x_ref,      # (T_pad, idim)    f32   full padded time window of batch b (resident)
    w1_ref,     # (9, odim)        bf16  conv1 weight, im2col (kt,kf) row order
    b1_ref,     # (1, odim)        f32
    w2_ref,     # (9*odim, odim)   bf16  conv2 weight, im2col (kt,kf,cin) row order
    b2_ref,     # (1, odim)        f32
    wl_ref,     # (F2*odim, odim)  bf16  linear weight, rows in (freq, chan) order
    bl_ref,     # (1, odim)        f32
    pe_ref,     # (tile_t, odim)   f32   positional-encoding tile
    # outputs
    o_ref,      # (tile_t, odim)   f32   (batch dim squeezed by BlockSpec)
    *, tile_t, idim, odim,
):
    t = pl.program_id(1)
    t0 = pl.multiple_of(t * tile_t, tile_t)

    tw = tile_t + 4           # input rows needed for this output tile (halo = 4)
    f1 = idim - 2             # freq after conv1
    f2 = idim - 4             # freq after conv2
    to1 = tile_t + 2          # time rows after conv1 for this tile

    # --- grab the (tile + halo) input window of this batch row ---------------
    xw = x_ref[pl.ds(t0, tw), :]                              # (tw, idim) f32

    # --- conv1 (1 -> odim, 3x3, valid) + ReLU: im2col -> one MXU matmul ------
    p1 = jnp.stack(
        [xw[kt:kt + to1, kf:kf + f1] for kt in range(3) for kf in range(3)],
        axis=-1,
    ).reshape(to1 * f1, 9).astype(jnp.bfloat16)               # (to1*f1, 9)
    h1 = jnp.dot(p1, w1_ref[...], preferred_element_type=jnp.float32)
    h1 = jnp.maximum(h1 + b1_ref[...], 0.0)
    h1 = h1.reshape(to1, f1, odim).astype(jnp.bfloat16)       # (to1, f1, odim)

    # --- conv2 (odim -> odim, 3x3, valid) + ReLU: single big-K matmul --------
    # feature order along K is (kt, kf, cin) -> matches w2 host-side reshape.
    p2 = jnp.concatenate(
        [h1[kt:kt + tile_t, kf:kf + f2, :] for kt in range(3) for kf in range(3)],
        axis=-1,
    ).reshape(tile_t * f2, 9 * odim)                          # (tile_t*f2, 9*odim) bf16
    h2 = jnp.dot(p2, w2_ref[...], preferred_element_type=jnp.float32)
    h2 = jnp.maximum(h2 + b2_ref[...], 0.0)                   # (tile_t*f2, odim) f32

    # --- Linear(odim*F2 -> odim) + positional encoding -----------------------
    # Natural flatten is (freq, chan); PyTorch's (chan, freq) order was absorbed
    # into a one-time permutation of wl's rows at parameter-conversion time.
    h2 = h2.reshape(tile_t, f2, odim)                         # leading split (cheap)
    z = jnp.concatenate([h2[:, f, :] for f in range(f2)], axis=-1)  # (tile_t, f2*odim)
    z = z.astype(jnp.bfloat16)
    y = jnp.dot(z, wl_ref[...], preferred_element_type=jnp.float32) + bl_ref[...]
    o_ref[...] = y * math.sqrt(float(odim)) + pe_ref[...]
    # TODO(synk): PositionalEncoding dropout omitted (identity at inference).


# ------------------------------ JAX glue ----------------------------------- #

def _positional_encoding(length, d_model):
    """Sinusoidal PE, identical to PyTorch PositionalEncoding.extend_pe."""
    pos = jnp.arange(length, dtype=jnp.float32)[:, None]
    div = jnp.exp(jnp.arange(0, d_model, 2, dtype=jnp.float32)
                  * -(math.log(10000.0) / d_model))
    pe = jnp.zeros((length, d_model), jnp.float32)
    pe = pe.at[:, 0::2].set(jnp.sin(pos * div))
    pe = pe.at[:, 1::2].set(jnp.cos(pos * div))
    return pe


def conv2d_subsampling1_forward(x, x_mask, params, *, tile_t=8):
    """x: (B, T, idim) f32, x_mask: (B, 1, T) or None -> ((B, T-4, odim), mask[:, :, :-4])."""
    B, T, idim = x.shape
    odim = params["b1"].shape[-1]
    f2 = idim - 4
    T2 = T - 4
    nt = pl.cdiv(T2, tile_t)
    T2p = nt * tile_t              # padded output time (multiple of tile_t)
    Tp = T2p + 4                   # padded input time
    if Tp > T:
        x = jnp.pad(x, ((0, 0), (0, Tp - T), (0, 0)))

    pe = _positional_encoding(T2p, odim)

    kernel = functools.partial(fused_subsampling_kernel,
                               tile_t=tile_t, idim=idim, odim=odim)

    y = pl.pallas_call(
        kernel,
        out_shape=jax.ShapeDtypeStruct((B, T2p, odim), jnp.float32),
        grid_spec=pltpu.PrefetchScalarGridSpec(
            num_scalar_prefetch=0,
            grid=(B, nt),
            in_specs=[
                pl.BlockSpec((None, Tp, idim), lambda b, t: (b, 0, 0)),   # x (per-batch, resident)
                pl.BlockSpec((9, odim), lambda b, t: (0, 0)),             # w1 (im2col)
                pl.BlockSpec((1, odim), lambda b, t: (0, 0)),             # b1
                pl.BlockSpec((9 * odim, odim), lambda b, t: (0, 0)),      # w2 (im2col)
                pl.BlockSpec((1, odim), lambda b, t: (0, 0)),             # b2
                pl.BlockSpec((f2 * odim, odim), lambda b, t: (0, 0)),     # w_lin (permuted)
                pl.BlockSpec((1, odim), lambda b, t: (0, 0)),             # b_lin
                pl.BlockSpec((tile_t, odim), lambda b, t: (t, 0)),        # pe tile
            ],
            out_specs=pl.BlockSpec((None, tile_t, odim), lambda b, t: (b, t, 0)),
        ),
        compiler_params=pltpu.CompilerParams(
            dimension_semantics=("parallel", "arbitrary"),
        ),
    )(x, params["w1"], params["b1"], params["w2"], params["b2"],
      params["w_lin"], params["b_lin"], pe)

    y = y[:, :T2, :]
    if x_mask is None:
        return y, None
    return y, x_mask[:, :, :-4]


# --------------------- parameter layout conversion ------------------------- #

def init_torch_layout_params(key, idim, odim):
    """Deterministic synthetic parameters in the PyTorch module's native layout."""
    k = jax.random.split(key, 6)
    din = odim * (idim - 4)
    return {
        "conv1_w": 0.10 * jax.random.normal(k[0], (odim, 1, 3, 3), jnp.float32),
        "conv1_b": 0.10 * jax.random.normal(k[1], (odim,), jnp.float32),
        "conv2_w": 0.05 * jax.random.normal(k[2], (odim, odim, 3, 3), jnp.float32),
        "conv2_b": 0.10 * jax.random.normal(k[3], (odim,), jnp.float32),
        "lin_w":   0.05 * jax.random.normal(k[4], (odim, din), jnp.float32),
        "lin_b":   0.10 * jax.random.normal(k[5], (odim,), jnp.float32),
    }


def convert_params(tp, idim, odim):
    """One-time host-side conversion: torch layout -> kernel (im2col / permuted) layout."""
    f2 = idim - 4
    # Conv2d(1, odim, 3): (odim,1,3,3) -> (kt,kf,cin,cout) -> (9, odim)
    w1 = jnp.transpose(tp["conv1_w"], (2, 3, 1, 0)).reshape(9, odim)
    # Conv2d(odim, odim, 3): (odim,odim,3,3) -> (kt,kf,cin,cout) -> (9*odim, odim)
    w2 = jnp.transpose(tp["conv2_w"], (2, 3, 1, 0)).reshape(9 * odim, odim)
    # Linear(odim*f2, odim): torch rows are (chan, freq)-flattened; permute to the
    # kernel's natural (freq, chan) flatten order so no runtime transpose is needed.
    wl = tp["lin_w"].T.reshape(odim, f2, odim).transpose(1, 0, 2).reshape(f2 * odim, odim)
    return {
        "w1": w1.astype(jnp.bfloat16),
        "b1": tp["conv1_b"].reshape(1, odim),
        "w2": w2.astype(jnp.bfloat16),
        "b2": tp["conv2_b"].reshape(1, odim),
        "w_lin": wl.astype(jnp.bfloat16),
        "b_lin": tp["lin_b"].reshape(1, odim),
    }


# ----------------------------- reference (plain JAX) ------------------------ #

def reference_forward(x, x_mask, tp, odim):
    """Pure-JAX f32 reference of the PyTorch module (for a sanity check)."""
    h = jax.lax.conv_general_dilated(
        x[:, None, :, :], tp["conv1_w"], (1, 1), "VALID",
        dimension_numbers=("NCHW", "OIHW", "NCHW"))
    h = jax.nn.relu(h + tp["conv1_b"][None, :, None, None])
    h = jax.lax.conv_general_dilated(
        h, tp["conv2_w"], (1, 1), "VALID",
        dimension_numbers=("NCHW", "OIHW", "NCHW"))
    h = jax.nn.relu(h + tp["conv2_b"][None, :, None, None])
    b, c, t, f = h.shape
    z = jnp.transpose(h, (0, 2, 1, 3)).reshape(b, t, c * f)
    y = z @ tp["lin_w"].T + tp["lin_b"]
    y = y * math.sqrt(float(odim)) + _positional_encoding(t, odim)[None]
    return y, (None if x_mask is None else x_mask[:, :, :-4])


if __name__ == "__main__":
    B, T, idim, odim = 2, 22, 16, 128   # odim=128 keeps output stores lane-dense

    key = jax.random.PRNGKey(0)
    kx, kp = jax.random.split(key)
    x = jax.random.normal(kx, (B, T, idim), jnp.float32)
    x_mask = jnp.ones((B, 1, T), dtype=jnp.bool_)

    torch_params = init_torch_layout_params(kp, idim, odim)
    params = convert_params(torch_params, idim, odim)

    y, y_mask = conv2d_subsampling1_forward(x, x_mask, params, tile_t=8)
    jax.block_until_ready(y)
    jax.block_until_ready(y_mask)

    assert y.shape == (B, T - 4, odim), y.shape
    assert y_mask.shape == (B, 1, T - 4), y_mask.shape

    # Sanity check vs. f32 plain-JAX reference (loose tolerance: bf16 MXU matmuls).
    y_ref, _ = reference_forward(x, x_mask, torch_params, odim)
    max_err = float(jnp.max(jnp.abs(y - y_ref)))
    assert max_err < 1.0, f"max abs error vs reference too large: {max_err}"

    print("KERNEL_OK")
</pallas_src>

<mosaic_0001>
module attributes {stable_mosaic.version = 11 : i64} {
  func.func @fused_subsampling_kernel(%arg0: i32, %arg1: i32, %arg2: memref<1x28x16xf32, #tpu.memory_space<vmem>>, %arg3: memref<9x128xbf16, #tpu.memory_space<vmem>>, %arg4: memref<1x128xf32, #tpu.memory_space<vmem>>, %arg5: memref<1152x128xbf16, #tpu.memory_space<vmem>>, %arg6: memref<1x128xf32, #tpu.memory_space<vmem>>, %arg7: memref<1536x128xbf16, #tpu.memory_space<vmem>>, %arg8: memref<1x128xf32, #tpu.memory_space<vmem>>, %arg9: memref<8x128xf32, #tpu.memory_space<vmem>>, %arg10: memref<1x8x128xf32, #tpu.memory_space<vmem>>) attributes {dimension_semantics = [#tpu.dimension_semantics<parallel>, #tpu.dimension_semantics<arbitrary>], iteration_bounds = array<i64: 2, 3>, scalar_prefetch = 0 : i64, scratch_operands = 0 : i64, tpu.core_type = #tpu.core_type<tc>, window_params = [{transform_indices = @transform_0, window_bounds = array<i64: 1, 28, 16>}, {pipeline_mode = #tpu.pipeline_mode<synchronous>, transform_indices = @transform_1, window_bounds = array<i64: 9, 128>}, {pipeline_mode = #tpu.pipeline_mode<synchronous>, transform_indices = @transform_2, window_bounds = array<i64: 1, 128>}, {pipeline_mode = #tpu.pipeline_mode<synchronous>, transform_indices = @transform_3, window_bounds = array<i64: 1152, 128>}, {pipeline_mode = #tpu.pipeline_mode<synchronous>, transform_indices = @transform_4, window_bounds = array<i64: 1, 128>}, {pipeline_mode = #tpu.pipeline_mode<synchronous>, transform_indices = @transform_5, window_bounds = array<i64: 1536, 128>}, {pipeline_mode = #tpu.pipeline_mode<synchronous>, transform_indices = @transform_6, window_bounds = array<i64: 1, 128>}, {transform_indices = @transform_7, window_bounds = array<i64: 8, 128>}, {transform_indices = @transform_8, window_bounds = array<i64: 1, 8, 128>}]} {
    %c8_i32 = arith.constant 8 : i32
    %0 = arith.muli %arg1, %c8_i32 : i32
    %1 = tpu.assume_multiple %0, 8 : i32
    %c0 = arith.constant 0 : index
    %2 = arith.index_cast %1 : i32 to index
    %c0_0 = arith.constant 0 : index
    %3 = vector.load %arg2[%c0, %2, %c0_0] : memref<1x28x16xf32, #tpu.memory_space<vmem>>, vector<1x12x16xf32>
    %4 = vector.shape_cast %3 : vector<1x12x16xf32> to vector<12x16xf32>
    %5 = vector.extract_strided_slice %4 {offsets = [0, 0], sizes = [10, 14], strides = [1, 1]} : vector<12x16xf32> to vector<10x14xf32>
    %6 = vector.extract_strided_slice %4 {offsets = [0, 1], sizes = [10, 14], strides = [1, 1]} : vector<12x16xf32> to vector<10x14xf32>
    %7 = vector.extract_strided_slice %4 {offsets = [0, 2], sizes = [10, 14], strides = [1, 1]} : vector<12x16xf32> to vector<10x14xf32>
    %8 = vector.extract_strided_slice %4 {offsets = [1, 0], sizes = [10, 14], strides = [1, 1]} : vector<12x16xf32> to vector<10x14xf32>
    %9 = vector.extract_strided_slice %4 {offsets = [1, 1], sizes = [10, 14], strides = [1, 1]} : vector<12x16xf32> to vector<10x14xf32>
    %10 = vector.extract_strided_slice %4 {offsets = [1, 2], sizes = [10, 14], strides = [1, 1]} : vector<12x16xf32> to vector<10x14xf32>
    %11 = vector.extract_strided_slice %4 {offsets = [2, 0], sizes = [10, 14], strides = [1, 1]} : vector<12x16xf32> to vector<10x14xf32>
    %12 = vector.extract_strided_slice %4 {offsets = [2, 1], sizes = [10, 14], strides = [1, 1]} : vector<12x16xf32> to vector<10x14xf32>
    %13 = vector.extract_strided_slice %4 {offsets = [2, 2], sizes = [10, 14], strides = [1, 1]} : vector<12x16xf32> to vector<10x14xf32>
    %14 = vector.shape_cast %5 : vector<10x14xf32> to vector<10x14x1xf32>
    %15 = vector.shape_cast %6 : vector<10x14xf32> to vector<10x14x1xf32>
    %16 = vector.shape_cast %7 : vector<10x14xf32> to vector<10x14x1xf32>
    %17 = vector.shape_cast %8 : vector<10x14xf32> to vector<10x14x1xf32>
    %18 = vector.shape_cast %9 : vector<10x14xf32> to vector<10x14x1xf32>
    %19 = vector.shape_cast %10 : vector<10x14xf32> to vector<10x14x1xf32>
    %20 = vector.shape_cast %11 : vector<10x14xf32> to vector<10x14x1xf32>
    %21 = vector.shape_cast %12 : vector<10x14xf32> to vector<10x14x1xf32>
    %22 = vector.shape_cast %13 : vector<10x14xf32> to vector<10x14x1xf32>
    %23 = tpu.concatenate %14, %15, %16, %17, %18, %19, %20, %21, %22 in 2 : vector<10x14x1xf32>, vector<10x14x1xf32>, vector<10x14x1xf32>, vector<10x14x1xf32>, vector<10x14x1xf32>, vector<10x14x1xf32>, vector<10x14x1xf32>, vector<10x14x1xf32>, vector<10x14x1xf32> -> vector<10x14x9xf32>
    %24 = vector.shape_cast %23 : vector<10x14x9xf32> to vector<140x9xf32>
    %25 = arith.truncf %24 : vector<140x9xf32> to vector<140x9xbf16>
    %c0_1 = arith.constant 0 : index
    %c0_2 = arith.constant 0 : index
    %26 = vector.load %arg3[%c0_1, %c0_2] : memref<9x128xbf16, #tpu.memory_space<vmem>>, vector<9x128xbf16>
    %cst = arith.constant dense<0.000000e+00> : vector<140x128xf32>
    %27 = tpu.matmul %25, %26, %cst {dimension_numbers = #tpu.dot_dimension_numbers<[1], [0], [0], [1], [0, 0, 1, 1], [], []>} : vector<140x9xbf16>, vector<9x128xbf16>, vector<140x128xf32> -> vector<140x128xf32>
    %c0_3 = arith.constant 0 : index
    %c0_4 = arith.constant 0 : index
    %28 = vector.load %arg4[%c0_3, %c0_4] : memref<1x128xf32, #tpu.memory_space<vmem>>, vector<1x128xf32>
    %29 = vector.broadcast %28 : vector<1x128xf32> to vector<140x128xf32>
    %30 = arith.addf %27, %29 : vector<140x128xf32>
    %cst_5 = arith.constant 0.000000e+00 : f32
    %31 = vector.broadcast %cst_5 : f32 to vector<140x128xf32>
    %32 = arith.maximumf %30, %31 : vector<140x128xf32>
    %33 = vector.shape_cast %32 : vector<140x128xf32> to vector<10x14x128xf32>
    %34 = arith.truncf %33 : vector<10x14x128xf32> to vector<10x14x128xbf16>
    %35 = vector.extract_strided_slice %34 {offsets = [0, 0, 0], sizes = [8, 12, 128], strides = [1, 1, 1]} : vector<10x14x128xbf16> to vector<8x12x128xbf16>
    %36 = vector.extract_strided_slice %34 {offsets = [0, 1, 0], sizes = [8, 12, 128], strides = [1, 1, 1]} : vector<10x14x128xbf16> to vector<8x12x128xbf16>
    %37 = vector.extract_strided_slice %34 {offsets = [0, 2, 0], sizes = [8, 12, 128], strides = [1, 1, 1]} : vector<10x14x128xbf16> to vector<8x12x128xbf16>
    %38 = vector.extract_strided_slice %34 {offsets = [1, 0, 0], sizes = [8, 12, 128], strides = [1, 1, 1]} : vector<10x14x128xbf16> to vector<8x12x128xbf16>
    %39 = vector.extract_strided_slice %34 {offsets = [1, 1, 0], sizes = [8, 12, 128], strides = [1, 1, 1]} : vector<10x14x128xbf16> to vector<8x12x128xbf16>
    %40 = vector.extract_strided_slice %34 {offsets = [1, 2, 0], sizes = [8, 12, 128], strides = [1, 1, 1]} : vector<10x14x128xbf16> to vector<8x12x128xbf16>
    %41 = vector.extract_strided_slice %34 {offsets = [2, 0, 0], sizes = [8, 12, 128], strides = [1, 1, 1]} : vector<10x14x128xbf16> to vector<8x12x128xbf16>
    %42 = vector.extract_strided_slice %34 {offsets = [2, 1, 0], sizes = [8, 12, 128], strides = [1, 1, 1]} : vector<10x14x128xbf16> to vector<8x12x128xbf16>
    %43 = vector.extract_strided_slice %34 {offsets = [2, 2, 0], sizes = [8, 12, 128], strides = [1, 1, 1]} : vector<10x14x128xbf16> to vector<8x12x128xbf16>
    %44 = tpu.concatenate %35, %36, %37, %38, %39, %40, %41, %42, %43 in 2 : vector<8x12x128xbf16>, vector<8x12x128xbf16>, vector<8x12x128xbf16>, vector<8x12x128xbf16>, vector<8x12x128xbf16>, vector<8x12x128xbf16>, vector<8x12x128xbf16>, vector<8x12x128xbf16>, vector<8x12x128xbf16> -> vector<8x12x1152xbf16>
    %45 = vector.shape_cast %44 : vector<8x12x1152xbf16> to vector<96x1152xbf16>
    %c0_6 = arith.constant 0 : index
    %c0_7 = arith.constant 0 : index
    %46 = vector.load %arg5[%c0_6, %c0_7] : memref<1152x128xbf16, #tpu.memory_space<vmem>>, vector<1152x128xbf16>
    %cst_8 = arith.constant dense<0.000000e+00> : vector<96x128xf32>
    %47 = tpu.matmul %45, %46, %cst_8 {dimension_numbers = #tpu.dot_dimension_numbers<[1], [0], [0], [1], [0, 0, 1, 1], [], []>} : vector<96x1152xbf16>, vector<1152x128xbf16>, vector<96x128xf32> -> vector<96x128xf32>
    %c0_9 = arith.constant 0 : index
    %c0_10 = arith.constant 0 : index
    %48 = vector.load %arg6[%c0_9, %c0_10] : memref<1x128xf32, #tpu.memory_space<vmem>>, vector<1x128xf32>
    %49 = vector.broadcast %48 : vector<1x128xf32> to vector<96x128xf32>
    %50 = arith.addf %47, %49 : vector<96x128xf32>
    %cst_11 = arith.constant 0.000000e+00 : f32
    %51 = vector.broadcast %cst_11 : f32 to vector<96x128xf32>
    %52 = arith.maximumf %50, %51 : vector<96x128xf32>
    %53 = vector.shape_cast %52 : vector<96x128xf32> to vector<8x12x128xf32>
    %54 = vector.extract_strided_slice %53 {offsets = [0, 0, 0], sizes = [8, 1, 128], strides = [1, 1, 1]} : vector<8x12x128xf32> to vector<8x1x128xf32>
    %55 = vector.shape_cast %54 : vector<8x1x128xf32> to vector<8x128xf32>
    %56 = vector.extract_strided_slice %53 {offsets = [0, 1, 0], sizes = [8, 1, 128], strides = [1, 1, 1]} : vector<8x12x128xf32> to vector<8x1x128xf32>
    %57 = vector.shape_cast %56 : vector<8x1x128xf32> to vector<8x128xf32>
    %58 = vector.extract_strided_slice %53 {offsets = [0, 2, 0], sizes = [8, 1, 128], strides = [1, 1, 1]} : vector<8x12x128xf32> to vector<8x1x128xf32>
    %59 = vector.shape_cast %58 : vector<8x1x128xf32> to vector<8x128xf32>
    %60 = vector.extract_strided_slice %53 {offsets = [0, 3, 0], sizes = [8, 1, 128], strides = [1, 1, 1]} : vector<8x12x128xf32> to vector<8x1x128xf32>
    %61 = vector.shape_cast %60 : vector<8x1x128xf32> to vector<8x128xf32>
    %62 = vector.extract_strided_slice %53 {offsets = [0, 4, 0], sizes = [8, 1, 128], strides = [1, 1, 1]} : vector<8x12x128xf32> to vector<8x1x128xf32>
    %63 = vector.shape_cast %62 : vector<8x1x128xf32> to vector<8x128xf32>
    %64 = vector.extract_strided_slice %53 {offsets = [0, 5, 0], sizes = [8, 1, 128], strides = [1, 1, 1]} : vector<8x12x128xf32> to vector<8x1x128xf32>
    %65 = vector.shape_cast %64 : vector<8x1x128xf32> to vector<8x128xf32>
    %66 = vector.extract_strided_slice %53 {offsets = [0, 6, 0], sizes = [8, 1, 128], strides = [1, 1, 1]} : vector<8x12x128xf32> to vector<8x1x128xf32>
    %67 = vector.shape_cast %66 : vector<8x1x128xf32> to vector<8x128xf32>
    %68 = vector.extract_strided_slice %53 {offsets = [0, 7, 0], sizes = [8, 1, 128], strides = [1, 1, 1]} : vector<8x12x128xf32> to vector<8x1x128xf32>
    %69 = vector.shape_cast %68 : vector<8x1x128xf32> to vector<8x128xf32>
    %70 = vector.extract_strided_slice %53 {offsets = [0, 8, 0], sizes = [8, 1, 128], strides = [1, 1, 1]} : vector<8x12x128xf32> to vector<8x1x128xf32>
    %71 = vector.shape_cast %70 : vector<8x1x128xf32> to vector<8x128xf32>
    %72 = vector.extract_strided_slice %53 {offsets = [0, 9, 0], sizes = [8, 1, 128], strides = [1, 1, 1]} : vector<8x12x128xf32> to vector<8x1x128xf32>
    %73 = vector.shape_cast %72 : vector<8x1x128xf32> to vector<8x128xf32>
    %74 = vector.extract_strided_slice %53 {offsets = [0, 10, 0], sizes = [8, 1, 128], strides = [1, 1, 1]} : vector<8x12x128xf32> to vector<8x1x128xf32>
    %75 = vector.shape_cast %74 : vector<8x1x128xf32> to vector<8x128xf32>
    %76 = vector.extract_strided_slice %53 {offsets = [0, 11, 0], sizes = [8, 1, 128], strides = [1, 1, 1]} : vector<8x12x128xf32> to vector<8x1x128xf32>
    %77 = vector.shape_cast %76 : vector<8x1x128xf32> to vector<8x128xf32>
    %78 = tpu.concatenate %55, %57, %59, %61, %63, %65, %67, %69, %71, %73, %75, %77 in 1 : vector<8x128xf32>, vector<8x128xf32>, vector<8x128xf32>, vector<8x128xf32>, vector<8x128xf32>, vector<8x128xf32>, vector<8x128xf32>, vector<8x128xf32>, vector<8x128xf32>, vector<8x128xf32>, vector<8x128xf32>, vector<8x128xf32> -> vector<8x1536xf32>
    %79 = arith.truncf %78 : vector<8x1536xf32> to vector<8x1536xbf16>
    %c0_12 = arith.constant 0 : index
    %c0_13 = arith.constant 0 : index
    %80 = vector.load %arg7[%c0_12, %c0_13] : memref<1536x128xbf16, #tpu.memory_space<vmem>>, vector<1536x128xbf16>
    %cst_14 = arith.constant dense<0.000000e+00> : vector<8x128xf32>
    %81 = tpu.matmul %79, %80, %cst_14 {dimension_numbers = #tpu.dot_dimension_numbers<[1], [0], [0], [1], [0, 0, 1, 1], [], []>} : vector<8x1536xbf16>, vector<1536x128xbf16>, vector<8x128xf32> -> vector<8x128xf32>
    %c0_15 = arith.constant 0 : index
    %c0_16 = arith.constant 0 : index
    %82 = vector.load %arg8[%c0_15, %c0_16] : memref<1x128xf32, #tpu.memory_space<vmem>>, vector<1x128xf32>
    %83 = vector.broadcast %82 : vector<1x128xf32> to vector<8x128xf32>
    %84 = arith.addf %81, %83 : vector<8x128xf32>
    %cst_17 = arith.constant 11.3137083 : f32
    %85 = vector.broadcast %cst_17 : f32 to vector<8x128xf32>
    %86 = arith.mulf %84, %85 : vector<8x128xf32>
    %c0_18 = arith.constant 0 : index
    %c0_19 = arith.constant 0 : index
    %87 = vector.load %arg9[%c0_18, %c0_19] : memref<8x128xf32, #tpu.memory_space<vmem>>, vector<8x128xf32>
    %88 = arith.addf %86, %87 : vector<8x128xf32>
    %c0_20 = arith.constant 0 : index
    %c0_21 = arith.constant 0 : index
    %c0_22 = arith.constant 0 : index
    %89 = vector.load %arg10[%c0_20, %c0_21, %c0_22] : memref<1x8x128xf32, #tpu.memory_space<vmem>>, vector<1x8x128xf32>
    %90 = vector.shape_cast %89 : vector<1x8x128xf32> to vector<8x128xf32>
    %91 = vector.shape_cast %88 : vector<8x128xf32> to vector<1x8x128xf32>
    tpu.vector_store %arg10[%c0_20, %c0_21, %c0_22], %91 {strides = array<i32>} : memref<1x8x128xf32, #tpu.memory_space<vmem>>, vector<1x8x128xf32>,
    return
  }
  func.func @transform_0(%arg0: i32, %arg1: i32) -> (i32, i32, i32) {
    %c0_i32 = arith.constant 0 : i32
    %c0_i32_0 = arith.constant 0 : i32
    %c0_i32_1 = arith.constant 0 : i32
    return %arg0, %c0_i32, %c0_i32_0 : i32, i32, i32
  }
  func.func @transform_1(%arg0: i32, %arg1: i32) -> (i32, i32) {
    %c0_i32 = arith.constant 0 : i32
    %c0_i32_0 = arith.constant 0 : i32
    %c0_i32_1 = arith.constant 0 : i32
    return %c0_i32, %c0_i32_0 : i32, i32
  }
  func.func @transform_2(%arg0: i32, %arg1: i32) -> (i32, i32) {
    %c0_i32 = arith.constant 0 : i32
    %c0_i32_0 = arith.constant 0 : i32
    %c0_i32_1 = arith.constant 0 : i32
    return %c0_i32, %c0_i32_0 : i32, i32
  }
  func.func @transform_3(%arg0: i32, %arg1: i32) -> (i32, i32) {
    %c0_i32 = arith.constant 0 : i32
    %c0_i32_0 = arith.constant 0 : i32
    %c0_i32_1 = arith.constant 0 : i32
    return %c0_i32, %c0_i32_0 : i32, i32
  }
  func.func @transform_4(%arg0: i32, %arg1: i32) -> (i32, i32) {
    %c0_i32 = arith.constant 0 : i32
    %c0_i32_0 = arith.constant 0 : i32
    %c0_i32_1 = arith.constant 0 : i32
    return %c0_i32, %c0_i32_0 : i32, i32
  }
  func.func @transform_5(%arg0: i32, %arg1: i32) -> (i32, i32) {
    %c0_i32 = arith.constant 0 : i32
    %c0_i32_0 = arith.constant 0 : i32
    %c0_i32_1 = arith.constant 0 : i32
    return %c0_i32, %c0_i32_0 : i32, i32
  }
  func.func @transform_6(%arg0: i32, %arg1: i32) -> (i32, i32) {
    %c0_i32 = arith.constant 0 : i32
    %c0_i32_0 = arith.constant 0 : i32
    %c0_i32_1 = arith.constant 0 : i32
    return %c0_i32, %c0_i32_0 : i32, i32
  }
  func.func @transform_7(%arg0: i32, %arg1: i32) -> (i32, i32) {
    %c0_i32 = arith.constant 0 : i32
    %c0_i32_0 = arith.constant 0 : i32
    return %arg1, %c0_i32 : i32, i32
  }
  func.func @transform_8(%arg0: i32, %arg1: i32) -> (i32, i32, i32) {
    %c0_i32 = arith.constant 0 : i32
    %c0_i32_0 = arith.constant 0 : i32
    return %arg0, %arg1, %c0_i32 : i32, i32, i32
  }
}

</mosaic_0001>

<bundles_post_ra>
// kernel: tpu_custom_call.1
= control target key start
LH: loop header
LB: loop body
LE: loop exit
PB: predicated region body
PF: predicated region fallthrough
CT: control target
= control target key end

     0   :  { %13 = vsyncpa [#allocation3], 0  ;;  %s9184_s0 = inlined_call_operand.vmem [shape: f32[2,28,16], index: 0, kind: input, shape index: {}]   ;;  %s9185_s1 = inlined_call_operand.vmem [shape: bf16[9,128], index: 1, kind: input, shape index: {}]   ;;  %s9186_s2 = inlined_call_operand.vmem [shape: f32[1,128], index: 2, kind: input, shape index: {}]   ;;  %s9187_s3 = inlined_call_operand.hbm [shape: bf16[1152,128], index: 3, kind: input, shape index: {}]   ;;  %s9188_s4 = inlined_call_operand.vmem [shape: f32[1,128], index: 4, kind: input, shape index: {}]   ;;  %s9189_s5 = inlined_call_operand.hbm [shape: bf16[1536,128], index: 5, kind: input, shape index: {}]   ;;  %s9190_s6 = inlined_call_operand.vmem [shape: f32[1,128], index: 6, kind: input, shape index: {}]   ;;  %s9191_s7 = inlined_call_operand.vmem [shape: f32[24,128], index: 7, kind: input, shape index: {}]   ;;  %s9192_s8 = inlined_call_operand.hbm [shape: f32[2,24,128], index: 8, kind: output, shape index: {}]  }
   0x1   :  { %14 = vsyncpa [#allocation6], 0 }
   0x2   :  { %15 = vsyncpa [#allocation4], 0 }
   0x3   :  { %17 = vsyncpa [#allocation4 + $0x1], 0  ;;  %s7457_s27 = smov 0   ;;  %s7459_s28 = smov 0  }
   0x4   :  { %s7461_s29 = smov 0   ;;  %s7463_s30 = smov 0  }
   0x5   :  { %s7465_s9 = smov 0   ;;  %s7467_s10 = smov 0  }
   0x6   :  { %s7469_s11 = smov 0   ;;  %s7471_s12 = smov 0  }
   0x7 LB: > { %9205 = sst [smem:[#allocation11_spill]] %s7393_s10  ;;  %s6319_s13 = sadd.s32 4294967295, %s7401_s12   ;;  %s7401_s12 = sphi %s7471_s12, %s23_s12   ;;  %s7397_s11 = sphi %s7469_s11, %s9269_s11   ;;  %s7393_s10 = sphi %s7467_s10, %s9268_s10   ;;  %s7389_s9 = sphi %s7465_s9, %s9267_s9   ;;  %s7385_s30 = sphi %s7463_s30, %s9266_s30   ;;  %s7381_s29 = sphi %s7461_s29, %s9272_s29   ;;  %s7377_s28 = sphi %s7459_s28, %s9271_s28   ;;  %s7373_s27 = sphi %s7457_s27, %s9270_s27  }
   0x8   : > { %9206 = sst [smem:[#allocation12_spill]] %s7397_s11  ;;  %s6320_s14 = sadd.s32 4294967294, %s7401_s12  }
   0x9   : > { %s32_s15 = sadd.s32 1, %s7393_s10  ;;  %s35_s16 = sadd.s32 1, %s7397_s11 }
   0xa   : > { %p33_p0 = scmp.ge.s32.totalorder %s32_s15, 3  ;;  %s222_s17 = sadd.s32 1, %s7381_s29 }
   0xb   : > { %p232_p1 = scmp.ne.s32.totalorder %s7381_s29, %s7377_s28  ;;  %p233_p2 = scmp.eq.s32.totalorder %s6319_s13, 5 }
   0xc   : > { %s9274_s15 = smov (%p33_p0, %s32_s15), 0  ;;  %s9276_s16 = smov (!%p33_p0, %s35_s16), %s7397_s11 }
   0xd   : > { %9207 = sst [smem:[#allocation13_spill]] %s9274_s15  ;;  %s218_s18 = ssub.s32 %s7393_s10, %s9274_s15 }
   0xe   : > { %p7509_p3 = por %p233_p2, %p232_p1  ;;  %p37_p4 = scmp.ge.s32.totalorder %s9276_s16, 2 }
   0xf   : > { %p238_p5 = scmp.ne.s32.totalorder %s7377_s28, %s7373_s27  ;;  %p239_p6 = scmp.eq.s32.totalorder %s6320_s14, 5 }
  0x10   : > { %p6321_p7 = scmp.ge.s32.totalorder %s7401_s12, 1  ;;  %s9278_s16 = smov (%p37_p4, %s9276_s16), 0 }
  0x11   : > { %9209 = sst [smem:[#allocation14_spill]] %s9278_s16  ;;  %p7518_p8 = por %p239_p6, %p238_p5 }
  0x12   : > { %p246_p9 = scmp.lt.s32.totalorder %s7401_s12, 7  ;;  %s217_s21 = ssub.s32 %s7397_s11, %s9278_s16 }
  0x13   : > { %s219_s22 = sor.u32 %s218_s18, %s217_s21  ;;  %p7529_p12 = scmp.eq.s32.totalorder %s6319_s13, 0 }
  0x14   : > { %p7525_p10 = pnand %p6321_p7, %p246_p9  ;;  %p220_p11 = scmp.eq.s32.totalorder %s219_s22, 0 }
  0x15   : > { %s7403_s26 = smov [#allocation2]  }
  0x16   : > { %p6992_p13 = pneg %p7525_p10  ;;  %s264_s14 = sshll.u32 %s7403_s26, 4  ;;  %s265_s14 = int_to_ptr.vmem [resolvable:$true] %s264_s14 }
  0x17   : > { %s7536_s25 = scalar_select %p220_p11, %s7381_s29, %s222_s17  }
  0x18   : > { %p7540_p0 = pnand %p7529_p12, %p6992_p13  ;;  %s7260_s13 = scalar_lea.vmem %s265_s14, 9216 }
  0x19   : > { %p7261_p2 = scmp.ne.s32.totalorder %s265_s14, %s7260_s13  ;;  %p7268_p6 = scmp.lt.s32.totalorder %s265_s14, %s265_s14 }
  0x1a   : > { %p7251_p1 = pneg %p7540_p0  ;;  %p7269_p7 = scmp.lt.s32.totalorder %s7260_s13, %s7260_s13 }
  0x1c   : > { %p7263_p4 = pnand %p7261_p2, %p7251_p1  ;;  %p7270_p9 = por %p7269_p7, %p7268_p6 }
  0x1e   : > { %p7264_p5 = pneg %p7263_p4 }
  0x20   : > { %p7271_p11 = pnand %p7270_p9, %p7264_p5 }
  0x22   : > { %7274 = shalt.err (!%p7271_p11)
}
  0x23   : > { %s7404_s17 = smov 64   ;;  %s7405_s21 = smov 4  }
  0x24   : > { %6995 = dma.hbm_to_vmem [thread:$0]  (!%p7540_p0), %s9187_s3, 9216, %s265_s14, [#allocation3], %s7404_s17, %s7404_s17, %s7405_s21  }
  0x25   : > { %s7406_s16 = smov [#allocation5]  }
  0x26   : > { %s280_s15 = sshll.u32 %s7406_s16, 4  ;;  %s281_s15 = int_to_ptr.vmem [resolvable:$true] %s280_s15 }
  0x27   : > { %s7286_s11 = scalar_lea.vmem %s281_s15, 12288  ;;  %p7294_p5 = scmp.lt.s32.totalorder %s281_s15, %s281_s15 }
  0x28   : > { %p7287_p13 = scmp.ne.s32.totalorder %s281_s15, %s7286_s11  ;;  %p7295_p6 = scmp.lt.s32.totalorder %s7286_s11, %s7286_s11 }
  0x2a   : > { %p7289_p2 = pnand %p7287_p13, %p7251_p1  ;;  %p7296_p7 = por %p7295_p6, %p7294_p5 }
  0x2c   : > { %p7290_p4 = pneg %p7289_p2 }
  0x2e   : > { %p7297_p9 = pnand %p7296_p7, %p7290_p4 }
  0x30   : > { %7300 = shalt.err (!%p7297_p9)
}
  0x31   : > { %6998 = dma.hbm_to_vmem [thread:$0]  (!%p7540_p0), %s9189_s5, 12288, %s281_s15, [#allocation6], %s7404_s17, %s7404_s17, %s7405_s21  }
  0x32   : > { %314 = sbr.rel (%p7525_p10) target bundleno = 1123 (0x463), region = 52 }
  0x37   : > { %7360 = dma.done.wait (%p7529_p12), [#allocation3], 9216  }
  0x38   : > { %7362 = vsyncadd (%p7529_p12), [#allocation3], 4294958080 }
  0x39   : > { %7364 = dma.done.wait (%p7529_p12), [#allocation6], 12288  }
  0x3a   : > { %7366 = vsyncadd (%p7529_p12), [#allocation6], 4294955008  ;;  %p356_p1 = scmp.lt.s32.totalorder %s7389_s9, 1  ;;  %v370_v0 = vlaneseq  ;;  %s6332_s11 = sshll.u32 %s7385_s30, 3  ;;  %vm1578_vm0 = vcmask 1043456   ;;  %vm1579_vm1 = vcmask 1044480  }
  0x3b   : > { %v7080_v15 = vld [vmem:[%s9185_s1] sm:$0x1f]   ;;  %v7407_v16 = vmov 65535   ;;  %v7408_v21 = vmov 0.0   ;;  %vm7409_vm2 = vmmov 0   ;;  %vm694_vm3 = vcmask 7168  }
  0x3c   : > { %s357_s10 = scalar_select %p356_p1, %s7389_s9, 1  ;;  %v7574_v1 = vshrl.u32 %v370_v0, 7  ;;  %v1580_v17 = vsel %vm1578_vm0, 4294967295, %v7407_v16  ;;  %6915 = vmatprep.subr.bf16.mxu0 %v7408_v21  ;;  %6917 = vmatprep.mubr.msk.bf16.mxu0 %vm7409_vm2, %v7408_v21  ;;  %vm715_vm4 = vcmask 15360   ;;  %vm736_vm5 = vcmask 23552  }
  0x3d   : > { %v1581_v18 = vsel %vm1579_vm1, %v1580_v17, 0  ;;  %vm757_vm6 = vcmask 31744   ;;  %vm778_vm7 = vcmask 39936   ;;  %vm799_vm8 = vcmask 48128   ;;  %p361_p10 = scmp.lt.s32.totalorder %s7385_s30, 2  ;;  %s353_s16 = sand.u32 1, %s7377_s28  }
  0x3e   : > { %s6550_s15 = sshll.u32 %s357_s10, 5  ;;  %v7578_v2 = vsub.s32 0, %v7574_v1  ;;  %v438_v3 = vsub.s32 6, %v7574_v1  ;;  %v449_v4 = vsub.s32 7, %v7574_v1  ;;  %v7594_v9 = vsub.s32 1, %v7574_v1 }
  0x3f   : > { %s360_s14 = scalar_lea.vmem %s9184_s0, %s6550_s15  ;;  %v7598_v11 = vsub.s32 2, %v7574_v1  ;;  %v7601_v12 = vsub.s32 3, %v7574_v1  ;;  %v416_v19 = vsub.s32 4, %v7574_v1  ;;  %v1583_v20 = vand.u32 %v7080_v15, %v1581_v18 }
  0x40   : > { %9214 = vst [vmem:[#allocation15_spill] sm:$0xff] %v7578_v2  ;;  %s7584_s24 = scalar_lea.vmem %s360_s14, %s6332_s11  ;;  %9215 = vst [vmem:[#allocation16_spill] sm:$0xff] %v7594_v9  ;;  %v427_v23 = vsub.s32 5, %v7574_v1  ;;  %v7410_v47 = vmov 1983009808   ;;  %vm820_vm9 = vcmask 56320  }
  0x41   : > { %v368_v5 = vld [vmem:[%s7584_s24] sm:$0xff]  ;;  %9216 = vst [vmem:[#allocation17_spill] sm:$0xff] %v7598_v11  ;;  %9217 = vst [vmem:[#allocation18_spill] sm:$0xff] %v7601_v12  ;;  %6916 = vmatpush3.bf16.msra.mxu0 %v1583_v20  ;;  %v369_v25 = vld [vmem:[%s7584_s24 + $0x8] sm:$0xf]  ;;  %v884_v48 = vunpack.c.l.s4 %v7410_v47  ;;  %vm841_vm10 = vcmask 64512  }
  0x42   : > { %v373_v6 = vrot.slane %v368_v5, %v7578_v2  ;;  %v7589_v7 = vrot.slane %v368_v5, %v438_v3  ;;  %v7591_v8 = vrot.slane %v368_v5, %v449_v4  ;;  %v384_v10 = vrot.slane %v368_v5, %v7594_v9  ;;  %s362_s15 = scalar_select %p361_p10, %s7385_s30, 2 }
  0x43   : > { %v395_v13 = vrot.slane %v368_v5, %v7598_v11  ;;  %v406_v14 = vrot.slane %v368_v5, %v7601_v12  ;;  %v417_v22 = vrot.slane %v368_v5, %v416_v19  ;;  %v428_v24 = vrot.slane %v368_v5, %v427_v23  ;;  %s6981_s14 = smul.u32 3, %s7389_s9  ;;  %s6328_s24 = sshll.u32 %s353_s16, 3 }
  0x44   : > { %562 = vbcast.lane.b32.xlu1 %v373_v6, 258  ;;  %375 = vbcast.lane.b32.xlu0 %v373_v6, 256  ;;  %v461_v26 = vrot.slane %v369_v25, %v7578_v2  ;;  %v472_v27 = vrot.slane %v369_v25, %v7594_v9  ;;  %v643_v30 = vrot.slane %v369_v25, %v7598_v11  ;;  %v885_v55 = vunpack.c.0.s8 %v884_v48  ;;  %s6331_s23 = sshll.u32 %s362_s15, 3  ;;  %s355_s26 = scalar_lea.vmem [#allocation7], %s6328_s24 }
  0x45   : > { %v670_v37 = vrot.slane %v369_v25, %v7601_v12  ;;  %vm1550_vm11 = vcmask 72704   ;;  %vm4709_vm12 = vcmask 1041409   ;;  %vm4711_vm13 = vcmask 1042434   ;;  %s364_s21 = scalar_lea.vmem %s9191_s7, %s6331_s23  ;;  %s6207_s22 = sadd.s32 %s7385_s30, %s6981_s14 }
  0x46   : > { %v7652_v62 = vsub.s32 %v885_v55, %v7574_v1  ;;  %vm4713_vm14 = vcmask 1043459   ;;  %vm4715_vm15 = vcmask 1044484   ;;  %vm4717_vm0 = vcmask 1045509   ;;  %s6547_s9 = sshll.u32 %s6207_s22, 7  ;;  %s6211_s13 = sshll.u32 %s355_s26, 4  ;;  %s6212_s13 = int_to_ptr.vmem [resolvable:$true] %s6211_s13 }
  0x47   : > { %vm4719_vm1 = vcmask 1046534   ;;  %s6209_s15 = scalar_lea.hbm %s9192_s8, %s6547_s9  ;;  %s6196_s23 = scalar_lea.sflag [#allocation4], %s353_s16 }
  0x48   : > { %379 = vbcast.lane.b32.xlu1 %v373_v6, 264  ;;  %482 = vbcast.lane.b32.xlu0 %v373_v6, 257  ;;  %s7301_s18 = scalar_lea.vmem %s6212_s13, 128  ;;  %s7411_s30 = smov [#allocation7]  }
  0x49   : > { %p7302_p12 = scmp.ne.s32.totalorder %s6212_s13, %s7301_s18  ;;  %s7305_s14 = sshll.u32 %s7411_s30, 4  ;;  %s7306_s14 = int_to_ptr.vmem [resolvable:$false] %s7305_s14 }
  0x4a   : > { %s7307_s17 = scalar_lea.vmem %s7306_s14, 256  ;;  %p7308_p13 = scmp.lt.s32.totalorder %s6212_s13, %s7306_s14 }
  0x4b   : > { %p7303_p0 = pnand %p7302_p12, %p7509_p3  ;;  %p7309_p2 = scmp.lt.s32.totalorder %s7307_s17, %s7301_s18 }
  0x4c   : > { %486 = vbcast.lane.b32.xlu1 %v373_v6, 265  ;;  %386 = vbcast.lane.b32.xlu0 %v384_v10, 256 }
  0x4d   : > { %p7304_p11 = pneg %p7303_p0  ;;  %p7310_p4 = por %p7309_p2, %p7308_p13 }
  0x4f   : > { %p7311_p5 = pnand %p7310_p4, %p7304_p11 }
  0x50   : > { %566 = vbcast.lane.b32.xlu1 %v373_v6, 266  ;;  %490 = vbcast.lane.b32.xlu0 %v384_v10, 257 }
  0x54   : > { %570 = vbcast.lane.b32.xlu1 %v384_v10, 258  ;;  %390 = vbcast.lane.b32.xlu0 %v384_v10, 264 }
  0x58   : > { %494 = vbcast.lane.b32.xlu1 %v384_v10, 265  ;;  %397 = vbcast.lane.b32.xlu0 %v395_v13, 256 }
  0x5c   : > { %574 = vbcast.lane.b32.xlu1 %v384_v10, 266  ;;  %498 = vbcast.lane.b32.xlu0 %v395_v13, 257 }
  0x60   : > { %578 = vbcast.lane.b32.xlu1 %v395_v13, 258  ;;  %401 = vbcast.lane.b32.xlu0 %v395_v13, 264 }
  0x64   : > { %408 = vbcast.lane.b32.xlu1 %v406_v14, 256  ;;  %502 = vbcast.lane.b32.xlu0 %v395_v13, 265 }
  0x68   : > { %506 = vbcast.lane.b32.xlu1 %v406_v14, 257  ;;  %582 = vbcast.lane.b32.xlu0 %v395_v13, 266 }
  0x6c   : > { %412 = vbcast.lane.b32.xlu1 %v406_v14, 264  ;;  %586 = vbcast.lane.b32.xlu0 %v406_v14, 258 }
  0x70   : > { %510 = vbcast.lane.b32.xlu1 %v406_v14, 265  ;;  %419 = vbcast.lane.b32.xlu0 %v417_v22, 256 }
  0x74   : > { %590 = vbcast.lane.b32.xlu1 %v406_v14, 266  ;;  %514 = vbcast.lane.b32.xlu0 %v417_v22, 257 }
  0x78   : > { %423 = vbcast.lane.b32.xlu1 %v417_v22, 264  ;;  %594 = vbcast.lane.b32.xlu0 %v417_v22, 258 }
  0x7c   : > { %518 = vbcast.lane.b32.xlu1 %v417_v22, 265  ;;  %430 = vbcast.lane.b32.xlu0 %v428_v24, 256 }
  0x80   : > { %598 = vbcast.lane.b32.xlu1 %v417_v22, 266  ;;  %522 = vbcast.lane.b32.xlu0 %v428_v24, 257 }
  0x84   : > { %441 = vbcast.lane.b32.xlu1 %v7589_v7, 256  ;;  %602 = vbcast.lane.b32.xlu0 %v428_v24, 258 }
  0x88   : > { %434 = vbcast.lane.b32.xlu1 %v428_v24, 264  ;;  %530 = vbcast.lane.b32.xlu0 %v7589_v7, 257 }
  0x8c   : > { %526 = vbcast.lane.b32.xlu1 %v428_v24, 265  ;;  %610 = vbcast.lane.b32.xlu0 %v7589_v7, 258 }
  0x90   : > { %452 = vbcast.lane.b32.xlu1 %v7591_v8, 256  ;;  %606 = vbcast.lane.b32.xlu0 %v428_v24, 266 }
  0x94   : > { %538 = vbcast.lane.b32.xlu1 %v7591_v8, 257  ;;  %445 = vbcast.lane.b32.xlu0 %v7589_v7, 264 }
  0x98   : > { %618 = vbcast.lane.b32.xlu1 %v7591_v8, 258  ;;  %534 = vbcast.lane.b32.xlu0 %v7589_v7, 265 }
  0x9c   : > { %456 = vbcast.lane.b32.xlu1 %v7591_v8, 264  ;;  %614 = vbcast.lane.b32.xlu0 %v7589_v7, 266 }
  0xa0   : > { %622 = vbcast.lane.b32.xlu1 %v7591_v8, 266  ;;  %542 = vbcast.lane.b32.xlu0 %v7591_v8, 265 }
  0xa4   : > { %546 = vbcast.lane.b32.xlu1 %v461_v26, 257  ;;  %463 = vbcast.lane.b32.xlu0 %v461_v26, 256 }
  0xa8   : > { %626 = vbcast.lane.b32.xlu1 %v461_v26, 258  ;;  %467 = vbcast.lane.b32.xlu0 %v461_v26, 264 }
  0xac   : > { %630 = vbcast.lane.b32.xlu1 %v461_v26, 266  ;;  %550 = vbcast.lane.b32.xlu0 %v461_v26, 265 }
  0xb0   : > { %554 = vbcast.lane.b32.xlu1 %v472_v27, 257  ;;  %474 = vbcast.lane.b32.xlu0 %v472_v27, 256 }
  0xb4   : > { %634 = vbcast.lane.b32.xlu1 %v472_v27, 258  ;;  %478 = vbcast.lane.b32.xlu0 %v472_v27, 264 }
  0xb6   : > { %v563_v28 = vpop.permute.xlu1 %562  ;;  %v376_v29 = vpop.permute.xlu0 %375 }
  0xb8   : > { %638 = vbcast.lane.b32.xlu1 %v472_v27, 266  ;;  %558 = vbcast.lane.b32.xlu0 %v472_v27, 265 }
  0xba   : > { %v380_v31 = vpop.permute.xlu1 %379  ;;  %v483_v32 = vpop.permute.xlu0 %482 }
  0xbb   : > { %v695_v40 = vsel %vm694_vm3, %v376_v29, %v483_v32 }
  0xbc   : > { %653 = vbcast.lane.b32.xlu1 %v643_v30, 257  ;;  %645 = vbcast.lane.b32.xlu0 %v643_v30, 256  ;;  %v716_v43 = vsel %vm715_vm4, %v695_v40, %v563_v28 }
  0xbe   : > { %v487_v33 = vpop.permute.xlu1 %486  ;;  %v387_v34 = vpop.permute.xlu0 %386 }
  0xbf   : > { %v737_v44 = vsel %vm736_vm5, %v716_v43, %v387_v34  ;;  %v696_v57 = vsel %vm694_vm3, %v380_v31, %v487_v33 }
  0xc0   : > { %661 = vbcast.lane.b32.xlu1 %v643_v30, 258  ;;  %649 = vbcast.lane.b32.xlu0 %v643_v30, 264 }
  0xc2   : > { %v567_v35 = vpop.permute.xlu1 %566  ;;  %v491_v36 = vpop.permute.xlu0 %490 }
  0xc3   : > { %v758_v49 = vsel %vm757_vm6, %v737_v44, %v491_v36  ;;  %v717_v59 = vsel %vm715_vm4, %v696_v57, %v567_v35  ;;  %v697_v3 = vsel %vm694_vm3, %v387_v34, %v491_v36 }
  0xc4   : > { %665 = vbcast.lane.b32.xlu1 %v643_v30, 266  ;;  %657 = vbcast.lane.b32.xlu0 %v643_v30, 265 }
  0xc6   : > { %v571_v38 = vpop.permute.xlu1 %570  ;;  %v7630_v39 = vpop.permute.xlu0 %390 }
  0xc7   : > { %v779_v50 = vsel %vm778_vm7, %v758_v49, %v571_v38  ;;  %v738_v63 = vsel %vm736_vm5, %v717_v59, %v7630_v39  ;;  %v718_v6 = vsel %vm715_vm4, %v697_v3, %v571_v38 }
  0xc8   : > { %680 = vbcast.lane.b32.xlu1 %v670_v37, 257  ;;  %672 = vbcast.lane.b32.xlu0 %v670_v37, 256 }
  0xca   : > { %v495_v41 = vpop.permute.xlu1 %494  ;;  %v7633_v42 = vpop.permute.xlu0 %397 }
  0xcb   : > { %v800_v51 = vsel %vm799_vm8, %v779_v50, %v7633_v42  ;;  %v759_v0 = vsel %vm757_vm6, %v738_v63, %v495_v41  ;;  %v739_v10 = vsel %vm736_vm5, %v718_v6, %v7633_v42  ;;  %v698_v28 = vsel %vm694_vm3, %v7630_v39, %v495_v41 }
  0xcc   : > { %676 = vbcast.lane.b32.xlu1 %v670_v37, 264  ;;  %688 = vbcast.lane.b32.xlu0 %v670_v37, 258 }
  0xce   : > { %v575_v45 = vpop.permute.xlu1 %574  ;;  %v499_v46 = vpop.permute.xlu0 %498 }
  0xcf   : > { %v821_v52 = vsel %vm820_vm9, %v800_v51, %v499_v46  ;;  %v780_v4 = vsel %vm778_vm7, %v759_v0, %v575_v45  ;;  %v760_v15 = vsel %vm757_vm6, %v739_v10, %v499_v46  ;;  %v719_v30 = vsel %vm715_vm4, %v698_v28, %v575_v45 }
  0xd0   : > { %684 = vbcast.lane.b32.xlu0 %v670_v37, 265  ;;  %692 = vbcast.lane.b32.xlu1 %v670_v37, 266  ;;  %v699_v44 = vsel %vm694_vm3, %v7633_v42, %v499_v46 }
  0xd2   : > { %v579_v53 = vpop.permute.xlu1 %578  ;;  %v7642_v54 = vpop.permute.xlu0 %401 }
  0xd3   : > { %v842_v56 = vsel %vm841_vm10, %v821_v52, %v579_v53  ;;  %v801_v7 = vsel %vm799_vm8, %v780_v4, %v7642_v54  ;;  %v781_v17 = vsel %vm778_vm7, %v760_v15, %v579_v53  ;;  %v740_v34 = vsel %vm736_vm5, %v719_v30, %v7642_v54 }
  0xd4   : > { %v882_v58 = vcombine.high %v842_v56, %v842_v56  ;;  %v889_v13 = vrot.slane %v842_v56, %v7652_v62  ;;  %v720_v49 = vsel %vm715_vm4, %v699_v44, %v579_v53 }
  0xd6   : > { %v7647_v60 = vpop.permute.xlu1 %408  ;;  %v7649_v61 = vpop.permute.xlu0 %502  ;;  %v896_v5 = vrot.slane %v882_v58, %v7652_v62  ;;  %v897_v25 = vcombine.high %v889_v13, %v889_v13 }
  0xd7   : > { %v822_v14 = vsel %vm820_vm9, %v801_v7, %v7649_v61  ;;  %v802_v22 = vsel %vm799_vm8, %v781_v17, %v7647_v60  ;;  %v761_v38 = vsel %vm757_vm6, %v740_v34, %v7649_v61  ;;  %v741_v42 = vsel %vm736_vm5, %v720_v49, %v7647_v60 }
  0xd8   : > { %v898_v18 = vcombine.high %v896_v5, %v896_v5  ;;  %v1212_v37 = vcombine.low %v889_v13, %v897_v25 }
  0xda   : > { %v7663_v8 = vpop.permute.xlu1 %506  ;;  %v7665_v1 = vpop.permute.xlu0 %582  ;;  %v1213_v31 = vcombine.low %v896_v5, %v898_v18  ;;  %v1220_v55 = vrot.slane %v1212_v37, %v7652_v62  ;;  %v700_v18 = vsel %vm694_vm3, %v7642_v54, %v7649_v61 }
  0xdb   : > { %v843_v16 = vsel %vm841_vm10, %v822_v14, %v7665_v1  ;;  %v823_v26 = vsel %vm820_vm9, %v802_v22, %v7663_v8  ;;  %v782_v41 = vsel %vm778_vm7, %v761_v38, %v7665_v1  ;;  %v762_v57 = vsel %vm757_vm6, %v741_v42, %v7663_v8 }
  0xdc   : > { %v899_v19 = vcombine.high %v843_v16, %v843_v16  ;;  %v906_v20 = vrot.slane %v843_v16, %v7652_v62  ;;  %v1227_v45 = vrot.slane %v1213_v31, %v7652_v62 }
  0xde   : > { %v7679_v23 = vpop.permute.xlu1 %412  ;;  %v7681_v24 = vpop.permute.xlu0 %586  ;;  %v914_v27 = vcombine.high %v906_v20, %v906_v20  ;;  %v913_v32 = vrot.slane %v899_v19, %v7652_v62  ;;  %v1228_v0 = vcombine.low %v1220_v55, %v1227_v45 }
  0xdf   : > { %v844_v29 = vsel %vm841_vm10, %v823_v26, %v7681_v24  ;;  %v803_v47 = vsel %vm799_vm8, %v782_v41, %v7679_v23  ;;  %v783_v63 = vsel %vm778_vm7, %v762_v57, %v7681_v24 }
  0xe0   : > { %v922_v33 = vrot.slane %v844_v29, %v7652_v62  ;;  %v1229_v39 = vcombine.low %v906_v20, %v914_v27  ;;  %v915_v43 = vcombine.high %v844_v29, %v844_v29  ;;  %v721_v20 = vsel %vm715_vm4, %v700_v18, %v7665_v1 }
  0xe1   : > { %v742_v27 = vsel %vm736_vm5, %v721_v20, %v7679_v23  ;;  %v701_v1 = vsel %vm694_vm3, %v7647_v60, %v7663_v8 }
  0xe2   : > { %v7694_v35 = vpop.permute.xlu1 %510  ;;  %v7696_v36 = vpop.permute.xlu0 %419  ;;  %v1230_v40 = vcombine.low %v913_v32, %v922_v33  ;;  %v1237_v46 = vrot.slane %v1229_v39, %v7652_v62  ;;  %v929_v53 = vrot.slane %v915_v43, %v7652_v62  ;;  %v930_v15 = vcombine.high %v922_v33, %v922_v33 }
  0xe3   : > { %v824_v50 = vsel %vm820_vm9, %v803_v47, %v7694_v35  ;;  %v804_v4 = vsel %vm799_vm8, %v783_v63, %v7696_v36  ;;  %v763_v29 = vsel %vm757_vm6, %v742_v27, %v7694_v35  ;;  %v722_v33 = vsel %vm715_vm4, %v701_v1, %v7681_v24 }
  0xe4   : > { %v1244_v48 = vrot.slane %v1230_v40, %v7652_v62  ;;  %v931_v16 = vcombine.high %v929_v53, %v929_v53  ;;  %v1246_v61 = vcombine.low %v930_v15, %v929_v53  ;;  %v743_v40 = vsel %vm736_vm5, %v722_v33, %v7696_v36 }
  0xe6   : > { %v7711_v51 = vpop.permute.xlu1 %590  ;;  %v515_v52 = vpop.permute.xlu0 %514  ;;  %v1245_v3 = vcombine.low %v1237_v46, %v1244_v48  ;;  %v1254_v24 = vrot.slane %v1246_v61, %v7652_v62 }
  0xe7   : > { %v845_v56 = vsel %vm841_vm10, %v824_v50, %v7711_v51  ;;  %v825_v13 = vsel %vm820_vm9, %v804_v4, %v515_v52  ;;  %v784_v31 = vsel %vm778_vm7, %v763_v29, %v7711_v51  ;;  %v764_v43 = vsel %vm757_vm6, %v743_v40, %v515_v52 }
  0xe8   : > { %v932_v58 = vcombine.high %v845_v56, %v845_v56  ;;  %v939_v59 = vrot.slane %v845_v56, %v7652_v62  ;;  %v1527_v14 = vpack.c.bf16 %v1245_v3, %v1228_v0  ;;  %v703_v57 = vsel %vm694_vm3, %v7696_v36, %v515_v52 }
  0xea   : > { %v7727_v5 = vpop.permute.xlu1 %423  ;;  %v595_v6 = vpop.permute.xlu0 %594  ;;  %v946_v7 = vrot.slane %v932_v58, %v7652_v62  ;;  %v947_v10 = vcombine.high %v939_v59, %v939_v59  ;;  %6918 = vmatmul.mubr.msk.bf16.vlgmr.msra.gmra.mxu0 %vm1550_vm11, %v1527_v14  ;;  %v1247_v22 = vcombine.low %v931_v16, %v939_v59 }
  0xeb   : > { %v846_v17 = vsel %vm841_vm10, %v825_v13, %v595_v6  ;;  %6921 = vmatprep.mubr.msk.bf16.mxu0 %vm7409_vm2, %v7408_v21  ;;  %v805_v37 = vsel %vm799_vm8, %v784_v31, %v7727_v5  ;;  %v785_v47 = vsel %vm778_vm7, %v764_v43, %v595_v6  ;;  %v724_v59 = vsel %vm715_vm4, %v703_v57, %v595_v6 }
  0xec   : > { %v955_v19 = vrot.slane %v846_v17, %v7652_v62  ;;  %v1263_v28 = vcombine.low %v947_v10, %v946_v7  ;;  %v948_v30 = vcombine.high %v846_v17, %v846_v17  ;;  %v1261_v34 = vrot.slane %v1247_v22, %v7652_v62 }
  0xee   : > { %v7739_v25 = vpop.permute.xlu1 %518  ;;  %v7741_v26 = vpop.permute.xlu0 %430  ;;  %v963_v54 = vcombine.high %v955_v19, %v955_v19  ;;  %v1271_v60 = vrot.slane %v1263_v28, %v7652_v62  ;;  %v962_v44 = vrot.slane %v948_v30, %v7652_v62  ;;  %v1262_v56 = vcombine.low %v1254_v24, %v1261_v34 }
  0xef   : > { %v826_v41 = vsel %vm820_vm9, %v805_v37, %v7739_v25  ;;  %v806_v55 = vsel %vm799_vm8, %v785_v47, %v7741_v26  ;;  %v745_v4 = vsel %vm736_vm5, %v724_v59, %v7741_v26 }
  0xf0   : > { %v1264_v32 = vcombine.low %v955_v19, %v963_v54  ;;  %v964_v63 = vcombine.high %v962_v44, %v962_v44  ;;  %v702_v19 = vsel %vm694_vm3, %v7679_v23, %v7694_v35 }
  0xf1   : > { %v723_v22 = vsel %vm715_vm4, %v702_v19, %v7711_v51 }
  0xf2   : > { %v7759_v38 = vpop.permute.xlu1 %598  ;;  %v523_v39 = vpop.permute.xlu0 %522  ;;  %v1278_v8 = vrot.slane %v1264_v32, %v7652_v62  ;;  %v1280_v20 = vcombine.low %v962_v44, %v964_v63  ;;  %v744_v28 = vsel %vm736_vm5, %v723_v22, %v7727_v5 }
  0xf3   : > { %v847_v45 = vsel %vm841_vm10, %v826_v41, %v7759_v38  ;;  %v827_v58 = vsel %vm820_vm9, %v806_v55, %v523_v39  ;;  %v766_v36 = vsel %vm757_vm6, %v745_v4, %v523_v39  ;;  %v765_v1 = vsel %vm757_vm6, %v744_v28, %v7739_v25 }
  0xf4   : > { %v965_v48 = vcombine.high %v847_v45, %v847_v45  ;;  %v972_v49 = vrot.slane %v847_v45, %v7652_v62  ;;  %v1279_v50 = vcombine.low %v1271_v60, %v1278_v8  ;;  %v1288_v31 = vrot.slane %v1280_v20, %v7652_v62 }
  0xf5   : > { %v786_v32 = vsel %vm778_vm7, %v765_v1, %v7759_v38  ;;  %v705_v34 = vsel %vm694_vm3, %v7741_v26, %v523_v39  ;;  %v704_v26 = vsel %vm694_vm3, %v7727_v5, %v7739_v25 }
  0xf6   : > { %v7776_v42 = vpop.permute.xlu1 %441  ;;  %v603_v46 = vpop.permute.xlu0 %602  ;;  %v980_v53 = vcombine.high %v972_v49, %v972_v49  ;;  %v1528_v3 = vpack.c.bf16 %v1279_v50, %v1262_v56  ;;  %v979_v7 = vrot.slane %v965_v48, %v7652_v62  ;;  %v725_v57 = vsel %vm715_vm4, %v704_v26, %v7759_v38 }
  0xf7   : > { %v848_v0 = vsel %vm841_vm10, %v827_v58, %v603_v46  ;;  %v787_v6 = vsel %vm778_vm7, %v766_v36, %v603_v46  ;;  %v726_v8 = vsel %vm715_vm4, %v705_v34, %v603_v46 }
  0xf8   : > { %v981_v10 = vcombine.high %v848_v0, %v848_v0  ;;  %v988_v13 = vrot.slane %v848_v0, %v7652_v62  ;;  %v1281_v14 = vcombine.low %v972_v49, %v980_v53  ;;  %6922 = vmatmul.mubr.msk.bf16.gmra.mxu0 %vm1550_vm11, %v1528_v3  ;;  %v808_v61 = vsel %vm799_vm8, %v787_v6, %v7776_v42 }
  0xf9   : > { %6925 = vmatprep.mubr.msk.bf16.mxu0 %vm7409_vm2, %v7408_v21  ;;  %v747_v50 = vsel %vm736_vm5, %v726_v8, %v7776_v42 }
  0xfa   : > { %v435_v52 = vpop.permute.xlu1 %434  ;;  %v7789_v15 = vpop.permute.xlu0 %530  ;;  %v995_v16 = vrot.slane %v981_v10, %v7652_v62  ;;  %v996_v17 = vcombine.high %v988_v13, %v988_v13  ;;  %v1297_v18 = vcombine.low %v979_v7, %v988_v13  ;;  %v1295_v54 = vrot.slane %v1281_v14, %v7652_v62 }
  0xfb   : > { %v829_v51 = vsel %vm820_vm9, %v808_v61, %v7789_v15  ;;  %v807_v41 = vsel %vm799_vm8, %v786_v32, %v435_v52  ;;  %v768_v53 = vsel %vm757_vm6, %v747_v50, %v7789_v15  ;;  %v746_v4 = vsel %vm736_vm5, %v725_v57, %v435_v52 }
  0xfc   : > { %v1298_v27 = vcombine.low %v996_v17, %v995_v16  ;;  %v1305_v23 = vrot.slane %v1297_v18, %v7652_v62  ;;  %v1296_v44 = vcombine.low %v1288_v31, %v1295_v54  ;;  %v997_v58 = vcombine.high %v995_v16, %v995_v16 }
  0xfe   : > { %v527_v29 = vpop.permute.xlu1 %526  ;;  %v7805_v30 = vpop.permute.xlu0 %610  ;;  %v1312_v35 = vrot.slane %v1298_v27, %v7652_v62 }
  0xff   : > { %v850_v33 = vsel %vm841_vm10, %v829_v51, %v7805_v30  ;;  %v828_v45 = vsel %vm820_vm9, %v807_v41, %v527_v29  ;;  %v789_v38 = vsel %vm778_vm7, %v768_v53, %v7805_v30  ;;  %v706_v10 = vsel %vm694_vm3, %v435_v52, %v527_v29 }
 0x100   : > { %v1014_v37 = vcombine.high %v850_v33, %v850_v33  ;;  %v1021_v40 = vrot.slane %v850_v33, %v7652_v62  ;;  %v1313_v60 = vcombine.low %v1305_v23, %v1312_v35  ;;  %v767_v6 = vsel %vm757_vm6, %v746_v4, %v527_v29 }
 0x102   : > { %v7823_v24 = vpop.permute.xlu1 %452  ;;  %v607_v43 = vpop.permute.xlu0 %606  ;;  %v1028_v47 = vrot.slane %v1014_v37, %v7652_v62  ;;  %v1029_v48 = vcombine.high %v1021_v40, %v1021_v40  ;;  %v1529_v49 = vpack.c.bf16 %v1313_v60, %v1296_v44 }
 0x103   : > { %v849_v39 = vsel %vm841_vm10, %v828_v45, %v607_v43  ;;  %v810_v14 = vsel %vm799_vm8, %v789_v38, %v7823_v24  ;;  %v727_v16 = vsel %vm715_vm4, %v706_v10, %v607_v43  ;;  %v788_v28 = vsel %vm778_vm7, %v767_v6, %v607_v43 }
 0x104   : > { %v1030_v55 = vcombine.high %v1028_v47, %v1028_v47  ;;  %v998_v46 = vcombine.high %v849_v39, %v849_v39  ;;  %v1005_v56 = vrot.slane %v849_v39, %v7652_v62  ;;  %6926 = vmatmul.mubr.msk.bf16.gmra.mxu0 %vm1550_vm11, %v1529_v49  ;;  %v1331_v59 = vcombine.low %v1021_v40, %v1029_v48 }
 0x105   : > { %6929 = vmatprep.mubr.msk.bf16.mxu0 %vm7409_vm2, %v7408_v21  ;;  %v707_v39 = vsel %vm694_vm3, %v7776_v42, %v7789_v15 }
 0x106   : > { %v7839_v5 = vpop.permute.xlu1 %538  ;;  %v446_v25 = vpop.permute.xlu0 %445  ;;  %v1332_v63 = vcombine.low %v1028_v47, %v1030_v55  ;;  %v1012_v0 = vrot.slane %v998_v46, %v7652_v62  ;;  %v1013_v3 = vcombine.high %v1005_v56, %v1005_v56  ;;  %v1314_v7 = vcombine.low %v997_v58, %v1005_v56 }
 0x107   : > { %v831_v17 = vsel %vm820_vm9, %v810_v14, %v7839_v5  ;;  %v1339_v20 = vrot.slane %v1331_v59, %v7652_v62  ;;  %v748_v54 = vsel %vm736_vm5, %v727_v16, %v446_v25  ;;  %v809_v61 = vsel %vm799_vm8, %v788_v28, %v446_v25 }
 0x108   : > { %v1346_v13 = vrot.slane %v1332_v63, %v7652_v62  ;;  %v1315_v36 = vcombine.low %v1013_v3, %v1012_v0  ;;  %v1322_v22 = vrot.slane %v1314_v7, %v7652_v62  ;;  %v728_v50 = vsel %vm715_vm4, %v707_v39, %v7805_v30 }
 0x109   : > { %v749_v57 = vsel %vm736_vm5, %v728_v50, %v7823_v24  ;;  %v709_v14 = vsel %vm694_vm3, %v7823_v24, %v7839_v5 }
 0x10a   : > { %v619_v18 = vpop.permute.xlu1 %618  ;;  %v535_v19 = vpop.permute.xlu0 %534  ;;  %v1329_v52 = vrot.slane %v1315_v36, %v7652_v62  ;;  %v1347_v23 = vcombine.low %v1339_v20, %v1346_v13  ;;  %v770_v42 = vsel %vm757_vm6, %v749_v57, %v7839_v5 }
 0x10b   : > { %v852_v27 = vsel %vm841_vm10, %v831_v17, %v619_v18  ;;  %v769_v51 = vsel %vm757_vm6, %v748_v54, %v535_v19  ;;  %v830_v31 = vsel %vm820_vm9, %v809_v61, %v535_v19  ;;  %v708_v58 = vsel %vm694_vm3, %v446_v25, %v535_v19 }
 0x10c   : > { %v1047_v29 = vcombine.high %v852_v27, %v852_v27  ;;  %v1330_v1 = vcombine.low %v1322_v22, %v1329_v52  ;;  %v1054_v35 = vrot.slane %v852_v27, %v7652_v62  ;;  %v791_v3 = vsel %vm778_vm7, %v770_v42, %v619_v18 }
 0x10d   : > { %v730_v20 = vsel %vm715_vm4, %v709_v14, %v619_v18 }
 0x10e   : > { %v7865_v32 = vpop.permute.xlu1 %456  ;;  %v615_v33 = vpop.permute.xlu0 %614  ;;  %v1530_v40 = vpack.c.bf16 %v1347_v23, %v1330_v1  ;;  %v1061_v41 = vrot.slane %v1047_v29, %v7652_v62  ;;  %v1062_v43 = vcombine.high %v1054_v35, %v1054_v35 }
 0x10f   : > { %v790_v34 = vsel %vm778_vm7, %v769_v51, %v615_v33  ;;  %v851_v37 = vsel %vm841_vm10, %v830_v31, %v615_v33  ;;  %v729_v63 = vsel %vm715_vm4, %v708_v58, %v615_v33 }
 0x110   : > { %v1031_v60 = vcombine.high %v851_v37, %v851_v37  ;;  %v1038_v8 = vrot.slane %v851_v37, %v7652_v62  ;;  %6930 = vmatmul.mubr.msk.bf16.gmra.mxu0 %vm1550_vm11, %v1530_v40  ;;  %v811_v48 = vsel %vm799_vm8, %v790_v34, %v7865_v32  ;;  %v1063_v53 = vcombine.high %v1061_v41, %v1061_v41 }
 0x111   : > { %6933 = vmatprep.mubr.msk.bf16.mxu0 %vm7409_vm2, %v7408_v21  ;;  %v1365_v15 = vcombine.low %v1062_v43, %v1061_v41  ;;  %v750_v25 = vsel %vm736_vm5, %v729_v63, %v7865_v32 }
 0x112   : > { %v1045_v44 = vrot.slane %v1031_v60, %v7652_v62  ;;  %v1046_v45 = vcombine.high %v1038_v8, %v1038_v8  ;;  %v7873_v47 = vpop.permute.xlu1 %622  ;;  %v543_v26 = vpop.permute.xlu0 %542 }
 0x113   : > { %v832_v49 = vsel %vm820_vm9, %v811_v48, %v543_v26  ;;  %v1373_v36 = vrot.slane %v1365_v15, %v7652_v62  ;;  %v771_v6 = vsel %vm757_vm6, %v750_v25, %v543_v26  ;;  %v710_v60 = vsel %vm694_vm3, %v7865_v32, %v543_v26 }
 0x114   : > { %v1348_v55 = vcombine.low %v1038_v8, %v1046_v45  ;;  %v1349_v46 = vcombine.low %v1045_v44, %v1054_v35  ;;  %v853_v56 = vsel %vm841_vm10, %v832_v49, %v7873_v47  ;;  %v792_v5 = vsel %vm778_vm7, %v771_v6, %v7873_v47 }
 0x115   : > { %v1071_v59 = vrot.slane %v853_v56, %v7652_v62  ;;  %v1064_v22 = vcombine.high %v853_v56, %v853_v56  ;;  %v731_v32 = vsel %vm715_vm4, %v710_v60, %v7873_v47 }
 0x116   : > { %v547_v30 = vpop.permute.xlu1 %546  ;;  %v464_v0 = vpop.permute.xlu0 %463  ;;  %v1356_v38 = vrot.slane %v1348_v55, %v7652_v62  ;;  %v1363_v7 = vrot.slane %v1349_v46, %v7652_v62 }
 0x117   : > { %v1366_v4 = vcombine.low %v1063_v53, %v1071_v59  ;;  %v812_v10 = vsel %vm799_vm8, %v791_v3, %v464_v0  ;;  %v751_v24 = vsel %vm736_vm5, %v730_v20, %v464_v0  ;;  %v1078_v31 = vrot.slane %v1064_v22, %v7652_v62 }
 0x118   : > { %v833_v17 = vsel %vm820_vm9, %v812_v10, %v547_v30  ;;  %v1364_v54 = vcombine.low %v1356_v38, %v1363_v7  ;;  %v1079_v33 = vcombine.high %v1071_v59, %v1071_v59  ;;  %v772_v8 = vsel %vm757_vm6, %v751_v24, %v547_v30 }
 0x119   : > { %v1380_v13 = vrot.slane %v1366_v4, %v7652_v62  ;;  %v711_v3 = vsel %vm694_vm3, %v464_v0, %v547_v30 }
 0x11a   : > { %v627_v16 = vpop.permute.xlu1 %626  ;;  %v7907_v19 = vpop.permute.xlu0 %467  ;;  %v1382_v39 = vcombine.low %v1079_v33, %v1078_v31 }
 0x11b   : > { %v854_v52 = vsel %vm841_vm10, %v833_v17, %v627_v16  ;;  %v1381_v61 = vcombine.low %v1373_v36, %v1380_v13  ;;  %v813_v23 = vsel %vm799_vm8, %v792_v5, %v7907_v19  ;;  %v793_v44 = vsel %vm778_vm7, %v772_v8, %v627_v16 }
 0x11c   : > { %v1080_v27 = vcombine.high %v854_v52, %v854_v52  ;;  %v1087_v28 = vrot.slane %v854_v52, %v7652_v62  ;;  %v752_v46 = vsel %vm736_vm5, %v731_v32, %v7907_v19  ;;  %v1390_v47 = vrot.slane %v1382_v39, %v7652_v62 }
 0x11d   : > { %v1531_v51 = vpack.c.bf16 %v1381_v61, %v1364_v54  ;;  %v732_v7 = vsel %vm715_vm4, %v711_v3, %v627_v16 }
 0x11e   : > { %v1094_v29 = vrot.slane %v1080_v27, %v7652_v62  ;;  %v1095_v1 = vcombine.high %v1087_v28, %v1087_v28  ;;  %v7918_v18 = vpop.permute.xlu1 %630  ;;  %v551_v35 = vpop.permute.xlu0 %550 }
 0x11f   : > { %v834_v34 = vsel %vm820_vm9, %v813_v23, %v551_v35  ;;  %6934 = vmatmul.mubr.msk.bf16.gmra.mxu0 %vm1550_vm11, %v1531_v51  ;;  %v773_v57 = vsel %vm757_vm6, %v752_v46, %v551_v35 }
 0x120   : > { %v1096_v37 = vcombine.high %v1094_v29, %v1094_v29  ;;  %v855_v40 = vsel %vm841_vm10, %v834_v34, %v7918_v18  ;;  %v1383_v41 = vcombine.low %v1087_v28, %v1095_v1  ;;  %6937 = vmatprep.mubr.msk.bf16.mxu0 %vm7409_vm2, %v7408_v21  ;;  %v794_v10 = vsel %vm778_vm7, %v773_v57, %v7918_v18 }
 0x121   : > { %v1104_v43 = vrot.slane %v855_v40, %v7652_v62  ;;  %v1097_v14 = vcombine.high %v855_v40, %v855_v40  ;;  %v712_v28 = vsel %vm694_vm3, %v7907_v19, %v551_v35 }
 0x122   : > { %v555_v45 = vpop.permute.xlu1 %554  ;;  %v475_v48 = vpop.permute.xlu0 %474  ;;  %v1399_v49 = vcombine.low %v1094_v29, %v1096_v37  ;;  %v1397_v26 = vrot.slane %v1383_v41, %v7652_v62  ;;  %v733_v33 = vsel %vm715_vm4, %v712_v28, %v7918_v18 }
 0x123   : > { %v1112_v50 = vcombine.high %v1104_v43, %v1104_v43  ;;  %v814_v55 = vsel %vm799_vm8, %v793_v44, %v475_v48  ;;  %v753_v30 = vsel %vm736_vm5, %v732_v7, %v475_v48  ;;  %v1111_v5 = vrot.slane %v1097_v14, %v7652_v62 }
 0x124   : > { %v835_v58 = vsel %vm820_vm9, %v814_v55, %v555_v45  ;;  %v1407_v42 = vrot.slane %v1399_v49, %v7652_v62  ;;  %v1398_v25 = vcombine.low %v1390_v47, %v1397_v26  ;;  %v774_v24 = vsel %vm757_vm6, %v753_v30, %v555_v45 }
 0x125   : > { %v1400_v56 = vcombine.low %v1104_v43, %v1112_v50  ;;  %v713_v8 = vsel %vm694_vm3, %v475_v48, %v555_v45 }
 0x126   : > { %v635_v53 = vpop.permute.xlu1 %634  ;;  %v7940_v59 = vpop.permute.xlu0 %478 }
 0x127   : > { %v1414_v15 = vrot.slane %v1400_v56, %v7652_v62  ;;  %v856_v63 = vsel %vm841_vm10, %v835_v58, %v635_v53  ;;  %v815_v17 = vsel %vm799_vm8, %v794_v10, %v7940_v59  ;;  %v795_v51 = vsel %vm778_vm7, %v774_v24, %v635_v53  ;;  %v7082_v24 = vld [vmem:[#allocation2 + $0x38] sm:$0xff]  }
 0x128   : > { %v1113_v4 = vcombine.high %v856_v63, %v856_v63  ;;  %v1120_v38 = vrot.slane %v856_v63, %v7652_v62  ;;  %v754_v40 = vsel %vm736_vm5, %v733_v33, %v7940_v59  ;;  %v734_v50 = vsel %vm715_vm4, %v713_v8, %v635_v53 }
 0x129   : > { %v1415_v13 = vcombine.low %v1407_v42, %v1414_v15 }
 0x12a   : > { %v1127_v36 = vrot.slane %v1113_v4, %v7652_v62  ;;  %v1128_v6 = vcombine.high %v1120_v38, %v1120_v38  ;;  %v639_v20 = vpop.permute.xlu1 %638  ;;  %v559_v22 = vpop.permute.xlu0 %558  ;;  %v1416_v35 = vcombine.low %v1111_v5, %v1120_v38 }
 0x12b   : > { %v836_v0 = vsel %vm820_vm9, %v815_v17, %v559_v22  ;;  %v1532_v52 = vpack.c.bf16 %v1415_v13, %v1398_v25  ;;  %v775_v43 = vsel %vm757_vm6, %v754_v40, %v559_v22  ;;  %v714_v38 = vsel %vm694_vm3, %v7940_v59, %v559_v22 }
 0x12c   : > { %v1129_v16 = vcombine.high %v1127_v36, %v1127_v36  ;;  %v857_v27 = vsel %vm841_vm10, %v836_v0, %v639_v20  ;;  %v1417_v29 = vcombine.low %v1128_v6, %v1127_v36  ;;  %v1424_v55 = vrot.slane %v1416_v35, %v7652_v62  ;;  %v7083_v35 = vld [vmem:[#allocation2 + $0x70] sm:$0xff]  }
 0x12d   : > { %v1130_v54 = vcombine.high %v857_v27, %v857_v27  ;;  %v1137_v61 = vrot.slane %v857_v27, %v7652_v62  ;;  %6938 = vmatmul.mubr.msk.bf16.gmra.mxu0 %vm1550_vm11, %v1532_v52  ;;  %v796_v48 = vsel %vm778_vm7, %v775_v43, %v639_v20  ;;  %v735_v30 = vsel %vm715_vm4, %v714_v38, %v639_v20 }
 0x12e   : > { %v654_v1 = vpop.permute.xlu1 %653  ;;  %v646_v23 = vpop.permute.xlu0 %645  ;;  %6941 = vmatprep.mubr.msk.bf16.mxu0 %vm7409_vm2, %v7408_v21  ;;  %v1431_v41 = vrot.slane %v1417_v29, %v7652_v62 }
 0x12f   : > { %v1144_v31 = vrot.slane %v1130_v54, %v7652_v62  ;;  %v1145_v19 = vcombine.high %v1137_v61, %v1137_v61  ;;  %v1433_v34 = vcombine.low %v1129_v16, %v1137_v61  ;;  %v816_v37 = vsel %vm799_vm8, %v795_v51, %v646_v23  ;;  %v7081_v16 = vld [vmem:[#allocation2 + $0x78] sm:$0xff]  }
 0x130   : > { %v837_v39 = vsel %vm820_vm9, %v816_v37, %v654_v1  ;;  %v755_v45 = vsel %vm736_vm5, %v734_v50, %v646_v23  ;;  %v1432_v53 = vcombine.low %v1424_v55, %v1431_v41  ;;  %6561 = vmatprep.subr.bf16.mxu1 %v7081_v16  ;;  %v7084_v41 = vld [vmem:[#allocation2 + $0x30] sm:$0xff]   ;;  %v7101_v16 = vld [vmem:[#allocation2 + $0xd8] sm:$0xff]  }
 0x131   : > { %v1434_v60 = vcombine.low %v1145_v19, %v1144_v31  ;;  %v1441_v32 = vrot.slane %v1433_v34, %v7652_v62  ;;  %v776_v7 = vsel %vm757_vm6, %v755_v45, %v654_v1  ;;  %6562 = vmatpush3.bf16.msra.mxu1 %v7082_v24  ;;  %v7087_v45 = vld [vmem:[#allocation2 + $0x68] sm:$0xff]   ;;  %v7106_v24 = vld [vmem:[#allocation2 + $0x90] sm:$0xff]  }
 0x132   : > { %v662_v44 = vpop.permute.xlu1 %661  ;;  %v650_v49 = vpop.permute.xlu0 %649  ;;  %6563 = vmatprep.subr.bf16.mxu1 %v7083_v35  ;;  %v8025_v35 = vld [vmem:[%s9186_s2] ss:$0 sm:$0xff] }
 0x133   : > { %v858_v18 = vsel %vm841_vm10, %v837_v39, %v662_v44  ;;  %v1448_v46 = vrot.slane %v1434_v60, %v7652_v62  ;;  %v817_v57 = vsel %vm799_vm8, %v796_v48, %v650_v49  ;;  %v797_v13 = vsel %vm778_vm7, %v776_v7, %v662_v44  ;;  %v7085_v39 = vld [vmem:[#allocation2 + $0xf8] sm:$0xff]   ;;  %v7091_v7 = vld [vmem:[#allocation2 + $0x60] sm:$0xff]  }
 0x134   : > { %v1146_v26 = vcombine.high %v858_v18, %v858_v18  ;;  %v1153_v63 = vrot.slane %v858_v18, %v7652_v62  ;;  %v756_v52 = vsel %vm736_vm5, %v735_v30, %v650_v49  ;;  %6613 = vmatprep.subr.bf16.mxu0 %v7085_v39  ;;  %v7096_v30 = vld [vmem:[#allocation2 + $0x18] sm:$0xff]  }
 0x135   : > { %v1449_v15 = vcombine.low %v1441_v32, %v1448_v46  ;;  %6564 = vmatpush3.bf16.msra.mxu1 %v7084_v41  ;;  %v7086_v32 = vld [vmem:[#allocation2 + $0xb8] sm:$0xff]  }
 0x136   : > { %v1160_v56 = vrot.slane %v1146_v26, %v7652_v62  ;;  %v666_v58 = vpop.permute.xlu1 %665  ;;  %v658_v42 = vpop.permute.xlu0 %657  ;;  %v1161_v6 = vcombine.high %v1153_v63, %v1153_v63  ;;  %6614 = vmatpush3.bf16.msra.mxu0 %v7086_v32  ;;  %6565 = vmatprep.subr.bf16.mxu1 %v7087_v45 }
 0x137   : > { %v838_v47 = vsel %vm820_vm9, %v817_v57, %v658_v42  ;;  %v1533_v4 = vpack.c.bf16 %v1449_v15, %v1432_v53  ;;  %v777_v27 = vsel %vm757_vm6, %v756_v52, %v658_v42  ;;  %v7099_v52 = vld [vmem:[#allocation2 + $0x50] sm:$0xff]  }
 0x138   : > { %v859_v3 = vsel %vm841_vm10, %v838_v47, %v666_v58  ;;  %v1162_v10 = vcombine.high %v1160_v56, %v1160_v56  ;;  %v1450_v5 = vcombine.low %v1153_v63, %v1161_v6  ;;  %v798_v19 = vsel %vm778_vm7, %v777_v27, %v666_v58  ;;  %v7088_v58 = vld [vmem:[#allocation2 + $0x28] sm:$0xff]   ;;  %v7089_v63 = vld [vmem:[#allocation2 + $0xf0] sm:$0xff]   ;;  %v7102_v27 = vld [vmem:[#allocation2 + $0x98] sm:$0xff]  }
 0x139   : > { %v1170_v25 = vrot.slane %v859_v3, %v7652_v62  ;;  %6942 = vmatmul.mubr.msk.bf16.gmra.mxu0 %vm1550_vm11, %v1533_v4  ;;  %v1163_v59 = vcombine.high %v859_v3, %v859_v3  ;;  %6566 = vmatpush3.bf16.msra.mxu1 %v7088_v58  ;;  %v7090_v3 = vld [vmem:[#allocation2 + $0xb0] sm:$0xff]   ;;  %v7094_v6 = vld [vmem:[#allocation2 + $0xa8] sm:$0xff]  }
 0x13a   : > { %v681_v14 = vpop.permute.xlu1 %680  ;;  %v673_v36 = vpop.permute.xlu0 %672  ;;  %6945 = vmatprep.mubr.msk.bf16.mxu0 %vm7409_vm2, %v7408_v21  ;;  %v1451_v0 = vcombine.low %v1160_v56, %v1162_v10  ;;  %v1458_v43 = vrot.slane %v1450_v5, %v7652_v62  ;;  %6615 = vmatprep.subr.bf16.mxu0 %v7089_v63  ;;  %v7107_v5 = vld [vmem:[#allocation2 + $0x40] sm:$0xff]  }
 0x13b   : > { %v818_v17 = vsel %vm799_vm8, %v797_v13, %v673_v36  ;;  %v1178_v22 = vcombine.high %v1170_v25, %v1170_v25  ;;  %v1177_v20 = vrot.slane %v1163_v59, %v7652_v62  ;;  %6616 = vmatpush3.bf16.msra.mxu0 %v7090_v3  ;;  %v7093_v13 = vld [vmem:[#allocation2 + $0xe8] sm:$0xff]   ;;  %6567 = vmatprep.subr.bf16.mxu1 %v7091_v7  ;;  %v7097_v59 = vld [vmem:[#allocation2 + $0xe0] sm:$0xff]  }
 0x13c   : > { %v839_v54 = vsel %vm820_vm9, %v818_v17, %v681_v14  ;;  %v1465_v31 = vrot.slane %v1451_v0, %v7652_v62  ;;  %6617 = vmatprep.subr.bf16.mxu0 %v7093_v13  ;;  %v7095_v17 = vld [vmem:[#allocation2 + $0x58] sm:$0xff]   ;;  %v7098_v0 = vld [vmem:[#allocation2 + $0xa0] sm:$0xff]  }
 0x13d   : > { %v1467_v1 = vcombine.low %v1170_v25, %v1178_v22  ;;  %v7092_v25 = vld [vmem:[#allocation2 + $0x20] sm:$0xff]  }
 0x13e   : > { %v677_v28 = vpop.permute.xlu1 %676  ;;  %v689_v61 = vpop.permute.xlu0 %688  ;;  %v1466_v48 = vcombine.low %v1458_v43, %v1465_v31  ;;  %6568 = vmatpush3.bf16.msra.mxu1 %v7092_v25  ;;  %v7113_v31 = vld [vmem:[#allocation2 + $0x178] sm:$0xff]  }
 0x13f   : > { %v860_v29 = vsel %vm841_vm10, %v839_v54, %v689_v61  ;;  %v819_v33 = vsel %vm799_vm8, %v798_v19, %v677_v28  ;;  %v1475_v49 = vrot.slane %v1467_v1, %v7652_v62  ;;  %6618 = vmatpush3.bf16.msra.mxu0 %v7094_v6  ;;  %6569 = vmatprep.subr.bf16.mxu1 %v7095_v17  ;;  %v7103_v28 = vld [vmem:[#allocation2 + $0x48] sm:$0xff]   ;;  %v7105_v61 = vld [vmem:[#allocation2 + $0xd0] sm:$0xff]   ;;  %v7119_v19 = vld [vmem:[#allocation2 + $0x1f8] sm:$0xff]  }
 0x140   : > { %v1179_v23 = vcombine.high %v860_v29, %v860_v29  ;;  %v1186_v51 = vrot.slane %v860_v29, %v7652_v62  ;;  %6619 = vmatprep.subr.bf16.mxu0 %v7097_v59  ;;  %v7104_v54 = vld [vmem:[#allocation2 + $0x8] sm:$0xff]   ;;  %v7108_v29 = vld [vmem:[#allocation2] sm:$0xff]  }
 0x141   : > { %v7109_v1 = vld [vmem:[#allocation2 + $0xc8] sm:$0xff]  }
 0x142   : > { %v1193_v34 = vrot.slane %v1179_v23, %v7652_v62  ;;  %v1194_v37 = vcombine.high %v1186_v51, %v1186_v51  ;;  %v1468_v40 = vcombine.low %v1177_v20, %v1186_v51  ;;  %v685_v60 = vpop.permute.xlu0 %684  ;;  %v693_v8 = vpop.permute.xlu1 %692  ;;  %6570 = vmatpush3.bf16.msra.mxu1 %v7096_v30  ;;  %v7110_v20 = vld [vmem:[#allocation2 + $0x88] sm:$0xff]   ;;  %v7111_v23 = vld [vmem:[#allocation2 + $0xc0] sm:$0xff]  }
 0x143   : > { %v840_v44 = vsel %vm820_vm9, %v819_v33, %v685_v60  ;;  %6620 = vmatpush3.bf16.msra.mxu0 %v7098_v0  ;;  %6571 = vmatprep.subr.bf16.mxu1 %v7099_v52  ;;  %v7112_v51 = vld [vmem:[#allocation2 + $0x80] sm:$0xff]  }
 0x144   : > { %v1482_v50 = vrot.slane %v1468_v40, %v7652_v62  ;;  %v861_v18 = vsel %vm841_vm10, %v840_v44, %v693_v8  ;;  %v1195_v55 = vcombine.high %v1193_v34, %v1193_v34  ;;  %v1484_v57 = vcombine.low %v1194_v37, %v1193_v34  ;;  %6621 = vmatprep.subr.bf16.mxu0 %v7101_v16 }
 0x145   : > { %v1196_v26 = vcombine.high %v861_v18, %v861_v18  ;;  %v1203_v46 = vrot.slane %v861_v18, %v7652_v62 }
 0x146   : > { %v1483_v56 = vcombine.low %v1475_v49, %v1482_v50  ;;  %v1492_v10 = vrot.slane %v1484_v57, %v7652_v62 }
 0x147   : > { %v1210_v42 = vrot.slane %v1196_v26, %v7652_v62  ;;  %v1211_v53 = vcombine.high %v1203_v46, %v1203_v46  ;;  %v1485_v15 = vcombine.low %v1195_v55, %v1203_v46  ;;  %6622 = vmatpush3.bf16.msra.mxu0 %v7102_v27 }
 0x148   : > { %v1534_v47 = vpack.c.bf16 %v1483_v56, %v1466_v48  ;;  %6623 = vmatprep.subr.bf16.mxu0 %v7105_v61 }
 0x149   : > { %v1499_v4 = vrot.slane %v1485_v15, %v7652_v62  ;;  %v1501_v38 = vcombine.low %v1211_v53, %v1210_v42 }
 0x14a   : > { %6946 = vmatmul.mubr.msk.bf16.gmra.mxu0 %vm1550_vm11, %v1534_v47 }
 0x14b   : > { %6949 = vmatprep.mubr.msk.bf16.mxu0 %vm7409_vm2, %v7408_v21  ;;  %v1500_v14 = vcombine.low %v1492_v10, %v1499_v4  ;;  %v1508_v36 = vrot.slane %v1501_v38, %v7652_v62  ;;  %v7100_v21 = vld [vmem:[#allocation2 + $0x10] sm:$0xff]   ;;  %6624 = vmatpush3.bf16.msra.mxu0 %v7106_v24  ;;  %vm4721_vm2 = vcmask 1047559  }
 0x14c   : > { %6572 = vmatpush3.bf16.msra.mxu1 %v7100_v21  ;;  %6625 = vmatprep.subr.bf16.mxu0 %v7109_v1 }
 0x14d   : > { %v1535_v22 = vpack.c.bf16 %v1508_v36, %v1500_v14  ;;  %6573 = vmatprep.subr.bf16.mxu1 %v7103_v28 }
 0x14f   : > { %6626 = vmatpush3.bf16.msra.mxu0 %v7110_v20 }
 0x150   : > { %6574 = vmatpush3.bf16.msra.mxu1 %v7104_v54  ;;  %6627 = vmatprep.subr.bf16.mxu0 %v7111_v23 }
 0x151   : > { %6575 = vmatprep.subr.bf16.mxu1 %v7107_v5 }
 0x152   : > { %6950 = vmatmul.mubr.msk.bf16.gmra.mxu0 %vm1550_vm11, %v1535_v22 }
 0x153   : > { %6628 = vmatpush3.bf16.msra.mxu0 %v7112_v51 }
 0x154   : > { %6576 = vmatpush3.bf16.msra.mxu1 %v7108_v29  ;;  %6717 = vmatprep.subr.bf16.mxu0 %v7119_v19 }
 0x155   : > { %6665 = vmatprep.subr.bf16.mxu1 %v7113_v31 }
 0x1aa   : > { %v1619_v33 = vpop.f32.mrf.mxu0 }
 0x1ab   : > { %v1620_v34 = vadd.f32 %v8025_v35, %v1619_v33 }
 0x1ac   : > { %v6919_v37 = vpop.f32.mrf.mxu0 }
 0x1ad   : > { %v1690_v40 = vmax.f32 %v1620_v34, 0.0 }
 0x1ae   : > { %v1622_v60 = vpop.f32.mrf.mxu0 }
 0x1af   : > { %v1726_v8 = vcombine.high %v1690_v40, %v1690_v40  ;;  %v1733_v41 = vrot.slane %v1690_v40, %v7652_v62  ;;  %v1623_v43 = vadd.f32 %v8025_v35, %v1622_v60 }
 0x1b0   : > { %v6920_v44 = vpop.f32.mrf.mxu0 }
 0x1b1   : > { %v1740_v39 = vrot.slane %v1726_v8, %v7652_v62  ;;  %v1741_v49 = vcombine.high %v1733_v41, %v1733_v41  ;;  %v1691_v50 = vmax.f32 %v1623_v43, 0.0 }
 0x1b3   : > { %v1742_v18 = vcombine.high %v1740_v39, %v1740_v39  ;;  %v1743_v55 = vcombine.high %v1691_v50, %v1691_v50  ;;  %v1750_v32 = vrot.slane %v1691_v50, %v7652_v62  ;;  %v2023_v26 = vcombine.low %v1733_v41, %v1741_v49 }
 0x1b5   : > { %v2024_v46 = vcombine.low %v1740_v39, %v1742_v18  ;;  %v1757_v45 = vrot.slane %v1743_v55, %v7652_v62  ;;  %v1758_v48 = vcombine.high %v1750_v32, %v1750_v32  ;;  %v2031_v53 = vrot.slane %v2023_v26, %v7652_v62 }
 0x1b7   : > { %v2038_v56 = vrot.slane %v2024_v46, %v7652_v62  ;;  %v2040_v57 = vcombine.low %v1750_v32, %v1758_v48  ;;  %v2054_v63 = vrot.slane %v1757_v45, %v7652_v62  ;;  %v1759_v6 = vcombine.high %v1757_v45, %v1757_v45 }
 0x1b8   : > { %v1627_v58 = vpop.f32.mrf.mxu0 }
 0x1b9   : > { %v1628_v42 = vadd.f32 %v8025_v35, %v1627_v58  ;;  %v2047_v15 = vrot.slane %v2040_v57, %v7652_v62  ;;  %v2039_v4 = vcombine.low %v2031_v53, %v2038_v56 }
 0x1ba   : > { %v6923_v47 = vpop.f32.mrf.mxu0 }
 0x1bb   : > { %v1692_v3 = vmax.f32 %v1628_v42, 0.0  ;;  %v2055_v38 = vcombine.low %v2047_v15, %v2054_v63 }
 0x1bc   : > { %v1630_v7 = vpop.f32.mrf.mxu0 }
 0x1bd   : > { %v1760_v10 = vcombine.high %v1692_v3, %v1692_v3  ;;  %v1767_v25 = vrot.slane %v1692_v3, %v7652_v62  ;;  %v1631_v13 = vadd.f32 %v8025_v35, %v1630_v7  ;;  %v8040_v14 = vpack.c.bf16 %v2055_v38, %v2039_v4 }
 0x1be   : > { %v6924_v36 = vpop.f32.mrf.mxu0 }
 0x1bf   : > { %v1774_v17 = vrot.slane %v1760_v10, %v7652_v62  ;;  %v1775_v30 = vcombine.high %v1767_v25, %v1767_v25  ;;  %v1693_v59 = vmax.f32 %v1631_v13, 0.0  ;;  %v2386_v22 = vshll.u32 %v8040_v14, 16 }
 0x1c0   : > { %v2056_v0 = vcombine.low %v1759_v6, %v1767_v25  ;;  %v2384_v28 = vshrl.u32 %v8040_v14, 16  ;;  %v2447_v26 = vrot.slane %v8040_v14, 1 }
 0x1c1   : > { %v2057_v52 = vcombine.low %v1775_v30, %v1774_v17  ;;  %v1776_v21 = vcombine.high %v1774_v17, %v1774_v17  ;;  %v1777_v16 = vcombine.high %v1693_v59, %v1693_v59  ;;  %v1784_v27 = vrot.slane %v1693_v59, %v7652_v62 }
 0x1c2   : > { %v2388_v54 = vrot.slane %v2386_v22, 1  ;;  %v2064_v23 = vrot.slane %v2056_v0, %v7652_v62 }
 0x1c3   : > { %v1791_v61 = vrot.slane %v1777_v16, %v7652_v62  ;;  %v2071_v24 = vrot.slane %v2057_v52, %v7652_v62  ;;  %v1792_v5 = vcombine.high %v1784_v27, %v1784_v27  ;;  %v2073_v29 = vcombine.low %v1776_v21, %v1784_v27 }
 0x1c4   : > { %v1635_v1 = vpop.f32.mrf.mxu0  ;;  %v2389_v20 = vor.u32 %v2388_v54, %v2384_v28 }
 0x1c5   : > { %v1636_v51 = vadd.f32 %v8025_v35, %v1635_v1  ;;  %v1793_v31 = vcombine.high %v1791_v61, %v1791_v61  ;;  %v2080_v19 = vrot.slane %v2073_v29, %v7652_v62  ;;  %v2087_v33 = vrot.slane %v1792_v5, %v7652_v62 }
 0x1c6   : > { %v6927_v34 = vpop.f32.mrf.mxu0  ;;  %v2473_v37 = vcombine.low %v8040_v14, %v2389_v20  ;;  %v2072_v60 = vcombine.low %v2064_v23, %v2071_v24  ;;  %v2474_v43 = vcombine.high %v8040_v14, %v2389_v20 }
 0x1c7   : > { %v1694_v40 = vmax.f32 %v1636_v51, 0.0  ;;  %v2088_v8 = vcombine.low %v2080_v19, %v2087_v33  ;;  %v2089_v50 = vcombine.low %v1791_v61, %v1793_v31 }
 0x1c8   : > { %v1638_v41 = vpop.f32.mrf.mxu0  ;;  %v2483_v32 = vrot.slane %v2473_v37, %v7652_v62  ;;  %v2490_v57 = vrot.slane %v2474_v43, %v7652_v62 }
 0x1c9   : > { %v1794_v44 = vcombine.high %v1694_v40, %v1694_v40  ;;  %v1801_v39 = vrot.slane %v1694_v40, %v7652_v62  ;;  %v1639_v49 = vadd.f32 %v8025_v35, %v1638_v41  ;;  %v2374_v18 = vpack.c.bf16 %v2088_v8, %v2072_v60 }
 0x1ca   : > { %v6928_v55 = vpop.f32.mrf.mxu0  ;;  %v2097_v47 = vrot.slane %v2089_v50, %v7652_v62  ;;  %v8065_v38 = vrot.slane %v2483_v32, %v7652_v62 }
 0x1cb   : > { %v1808_v46 = vrot.slane %v1794_v44, %v7652_v62  ;;  %v1809_v45 = vcombine.high %v1801_v39, %v1801_v39  ;;  %v1695_v48 = vmax.f32 %v1639_v49, 0.0  ;;  %v2393_v56 = vshll.u32 %v2374_v18, 16 }
 0x1cc   : > { %v8060_v58 = vcombine.low %v2447_v26, %v2374_v18  ;;  %v2391_v3 = vshrl.u32 %v2374_v18, 16  ;;  %v8072_v17 = vrot.slane %v2374_v18, 1  ;;  %v2476_v30 = vcombine.high %v2447_v26, %v2374_v18 }
 0x1cd   : > { %v1810_v42 = vcombine.high %v1808_v46, %v1808_v46  ;;  %v2090_v53 = vcombine.low %v1801_v39, %v1809_v45  ;;  %v1811_v15 = vcombine.high %v1695_v48, %v1695_v48  ;;  %v1818_v63 = vrot.slane %v1695_v48, %v7652_v62 }
 0x1ce   : > { %v2395_v4 = vrot.slane %v2393_v56, 1  ;;  %v2497_v21 = vrot.slane %v8060_v58, %v7652_v62  ;;  %v2504_v37 = vrot.slane %v2476_v30, %v7652_v62 }
 0x1cf   : > { %v2104_v7 = vrot.slane %v2090_v53, %v7652_v62  ;;  %v2106_v10 = vcombine.low %v1808_v46, %v1810_v42  ;;  %v1825_v25 = vrot.slane %v1811_v15, %v7652_v62  ;;  %v1826_v13 = vcombine.high %v1818_v63, %v1818_v63 }
 0x1d0   : > { %v1643_v14 = vpop.f32.mrf.mxu0  ;;  %v8070_v6 = vor.u32 %v2395_v4, %v2391_v3  ;;  %v2120_v22 = vrot.slane %v1818_v63, %v7652_v62  ;;  %v7114_v4 = vld [vmem:[#allocation2 + $0x138] sm:$0xff]   ;;  %v3233_v30 = vrot.slane %v2497_v21, %v7652_v62 }
 0x1d1   : > { %v1644_v36 = vadd.f32 %v8025_v35, %v1643_v14  ;;  %v2113_v59 = vrot.slane %v2106_v10, %v7652_v62  ;;  %v2122_v0 = vcombine.low %v1826_v13, %v1825_v25  ;;  %v2105_v16 = vcombine.low %v2097_v47, %v2104_v7  ;;  %v7115_v14 = vld [vmem:[#allocation2 + $0x170] sm:$0xff]  }
 0x1d2   : > { %v6931_v52 = vpop.f32.mrf.mxu0  ;;  %v2559_v28 = vcombine.low %v2374_v18, %v8070_v6  ;;  %v2560_v54 = vcombine.high %v2374_v18, %v8070_v6  ;;  %v1827_v24 = vcombine.high %v1825_v25, %v1825_v25  ;;  %v2508_v29 = vcombine.low %v8070_v6, %v8072_v17 }
 0x1d3   : > { %v1696_v27 = vmax.f32 %v1644_v36, 0.0  ;;  %v2121_v61 = vcombine.low %v2113_v59, %v2120_v22  ;;  %v2509_v1 = vcombine.high %v8070_v6, %v8072_v17  ;;  %v2130_v19 = vrot.slane %v2122_v0, %v7652_v62 }
 0x1d4   : > { %v1646_v5 = vpop.f32.mrf.mxu0  ;;  %v2569_v31 = vrot.slane %v2559_v28, %v7652_v62  ;;  %v8092_v40 = vrot.slane %v2560_v54, %v7652_v62  ;;  %v8127_v54 = vrot.slane %v2508_v29, %v7652_v62 }
 0x1d5   : > { %v1828_v20 = vcombine.high %v1696_v27, %v1696_v27  ;;  %v1835_v23 = vrot.slane %v1696_v27, %v7652_v62  ;;  %v1647_v51 = vadd.f32 %v8025_v35, %v1646_v5  ;;  %v8088_v33 = vpack.c.bf16 %v2121_v61, %v2105_v16 }
 0x1d6   : > { %v6932_v34 = vpop.f32.mrf.mxu0  ;;  %v6345_v39 = vcombine.low %v2490_v57, %v2569_v31 }
 0x1d7   : > { %v1842_v60 = vrot.slane %v1828_v20, %v7652_v62  ;;  %v1843_v8 = vcombine.high %v1835_v23, %v1835_v23  ;;  %v2123_v41 = vcombine.low %v1827_v24, %v1835_v23  ;;  %v1697_v43 = vmax.f32 %v1647_v51, 0.0  ;;  %v7116_v51 = vld [vmem:[#allocation2 + $0x130] sm:$0xff]  }
 0x1d8   : > { %v2561_v44 = vcombine.low %v8072_v17, %v8088_v33  ;;  %v2398_v49 = vshrl.u32 %v8088_v33, 16  ;;  %v2400_v50 = vshll.u32 %v8088_v33, 16  ;;  %v3240_v48 = vrot.slane %v6345_v39, %v7652_v62 }
 0x1d9   : > { %v1844_v18 = vcombine.high %v1842_v60, %v1842_v60  ;;  %v2137_v55 = vrot.slane %v2123_v41, %v7652_v62  ;;  %v2139_v32 = vcombine.low %v1843_v8, %v1842_v60  ;;  %v1845_v26 = vcombine.high %v1697_v43, %v1697_v43  ;;  %v7117_v60 = vld [vmem:[#allocation2 + $0x168] sm:$0xff]   ;;  %v7123_v8 = vld [vmem:[#allocation2 + $0x1f0] sm:$0xff]  }
 0x1da   : > { %v1852_v46 = vrot.slane %v1697_v43, %v7652_v62  ;;  %v2583_v45 = vrot.slane %v2561_v44, %v7652_v62  ;;  %v2402_v56 = vrot.slane %v2400_v50, 1  ;;  %v3249_v47 = vcombine.high %v8065_v38, %v3240_v48 }
 0x1db   : > { %v2138_v58 = vcombine.low %v2130_v19, %v2137_v55  ;;  %v2146_v42 = vrot.slane %v2139_v32, %v7652_v62  ;;  %v2153_v57 = vrot.slane %v1844_v18, %v7652_v62  ;;  %v1859_v53 = vrot.slane %v1845_v26, %v7652_v62 }
 0x1dc   : > { %v1860_v15 = vcombine.high %v1852_v46, %v1852_v46  ;;  %v2592_v63 = vcombine.high %v2569_v31, %v2583_v45  ;;  %v3248_v3 = vcombine.low %v8065_v38, %v3240_v48  ;;  %v6346_v25 = vcombine.low %v2504_v37, %v2583_v45  ;;  %4268 = vmatprep.mubr.bf16.mxu1 %v3249_v47  ;;  %v7121_v31 = vld [vmem:[#allocation2 + $0x1b8] sm:$0xff]  }
 0x1dd   : > { %v2154_v7 = vcombine.low %v2146_v42, %v2153_v57  ;;  %v1861_v10 = vcombine.high %v1859_v53, %v1859_v53  ;;  %v8108_v13 = vor.u32 %v2402_v56, %v2398_v49  ;;  %v2562_v59 = vcombine.high %v8072_v17, %v8088_v33  ;;  %v7126_v17 = vld [vmem:[#allocation2 + $0x118] sm:$0xff]  }
 0x1de   : > { %v8110_v36 = vcombine.low %v1852_v46, %v1860_v15  ;;  %4269 = vmatmul.mubr.bf16.vlgmr.msra.gmra.mxu1 %v3248_v3  ;;  %v3247_v38 = vrot.slane %v6346_v25, %v7652_v62  ;;  %v6349_v16 = vcombine.low %v2592_v63, %v8092_v40  ;;  %v8123_v28 = vrot.slane %v8088_v33, 1  ;;  %v7120_v63 = vld [vmem:[#allocation2 + $0x160] sm:$0xff]  }
 0x1df   : > { %v8115_v22 = vpack.c.bf16 %v2154_v7, %v2138_v58  ;;  %v1651_v0 = vpop.f32.mrf.mxu0  ;;  %v2510_v52 = vcombine.low %v8088_v33, %v8108_v13  ;;  %v2590_v21 = vrot.slane %v2562_v59, %v7652_v62  ;;  %6666 = vmatpush3.bf16.msra.mxu1 %v7114_v4  ;;  %v8129_v61 = vcombine.low %v1859_v53, %v1861_v10  ;;  %v7118_v58 = vld [vmem:[#allocation2 + $0x128] sm:$0xff]   ;;  %v7124_v7 = vld [vmem:[#allocation2 + $0x1b0] sm:$0xff]  }
 0x1e0   : > { %v1652_v27 = vadd.f32 %v8025_v35, %v1651_v0  ;;  %v3250_v5 = vcombine.low %v3233_v30, %v3247_v38  ;;  %v3251_v20 = vcombine.high %v3233_v30, %v3247_v38  ;;  %6667 = vmatprep.subr.bf16.mxu1 %v7115_v14  ;;  %v2163_v19 = vrot.slane %v8110_v36, %v7652_v62 }
 0x1e1   : > { %v6935_v24 = vpop.f32.mrf.mxu0  ;;  %v2532_v23 = vrot.slane %v2510_v52, %v7652_v62  ;;  %v2593_v37 = vcombine.low %v8092_v40, %v2590_v21  ;;  %v2645_v29 = vcombine.low %v8123_v28, %v8115_v22  ;;  %v3315_v44 = vrot.slane %v6349_v16, %v7652_v62  ;;  %v7122_v52 = vld [vmem:[#allocation2 + $0x120] sm:$0xff]   ;;  %v7127_v16 = vld [vmem:[#allocation2 + $0x1e8] sm:$0xff]  }
 0x1e2   : > { %v1698_v34 = vmax.f32 %v1652_v27, 0.0  ;;  %4349 = vmatprep.mubr.bf16.mxu0 %v3251_v20  ;;  %v2405_v39 = vshrl.u32 %v8115_v22, 16  ;;  %v2407_v49 = vshll.u32 %v8115_v22, 16  ;;  %v2170_v47 = vrot.slane %v8129_v61, %v7652_v62  ;;  %v7125_v24 = vld [vmem:[#allocation2 + $0x158] sm:$0xff]  }
 0x1e3   : > { %v1654_v41 = vpop.f32.mrf.mxu0  ;;  %v8138_v43 = vrot.slane %v2532_v23, %v7652_v62  ;;  %4350 = vmatmul.mubr.bf16.vlgmr.msra.gmra.mxu0 %v3250_v5  ;;  %v2653_v55 = vrot.slane %v2645_v29, %v7652_v62  ;;  %v6350_v48 = vcombine.high %v2583_v45, %v2593_v37  ;;  %6668 = vmatpush3.bf16.msra.mxu1 %v7116_v51  ;;  %v7128_v23 = vld [vmem:[#allocation2 + $0x1a8] sm:$0xff]  }
 0x1e4   : > { %v1862_v50 = vcombine.high %v1698_v34, %v1698_v34  ;;  %v1869_v18 = vrot.slane %v1698_v34, %v7652_v62  ;;  %v1655_v40 = vadd.f32 %v8025_v35, %v1654_v41  ;;  %v2409_v56 = vrot.slane %v2407_v49, 1  ;;  %6718 = vmatpush3.bf16.msra.mxu0 %v7121_v31  ;;  %6669 = vmatprep.subr.bf16.mxu1 %v7117_v60 }
 0x1e5   : > { %v6936_v32 = vpop.f32.mrf.mxu0  ;;  %v3338_v26 = vcombine.high %v3315_v44, %v8138_v43  ;;  %v3337_v46 = vcombine.low %v3315_v44, %v8138_v43  ;;  %v3336_v15 = vrot.slane %v2653_v55, %v7652_v62  ;;  %6719 = vmatprep.subr.bf16.mxu0 %v7123_v8  ;;  %v3322_v3 = vrot.slane %v6350_v48, %v7652_v62  ;;  %v7129_v8 = vld [vmem:[#allocation2 + $0x1e0] sm:$0xff]  }
 0x1e6   : > { %v1876_v42 = vrot.slane %v1862_v50, %v7652_v62  ;;  %v1877_v57 = vcombine.high %v1869_v18, %v1869_v18  ;;  %v1699_v53 = vmax.f32 %v1655_v40, 0.0  ;;  %v8153_v45 = vor.u32 %v2409_v56, %v2405_v39  ;;  %v7130_v40 = vld [vmem:[#allocation2 + $0x150] sm:$0xff]  }
 0x1e7   : > { %4276 = vmatprep.mubr.bf16.mxu1 %v3338_v26  ;;  %v2511_v4 = vcombine.high %v8088_v33, %v8108_v13  ;;  %v2646_v36 = vcombine.high %v8123_v28, %v8115_v22  ;;  %v3340_v0 = vcombine.high %v3322_v3, %v3336_v15  ;;  %v3339_v38 = vcombine.low %v3322_v3, %v3336_v15  ;;  %v7131_v26 = vld [vmem:[#allocation2 + $0x1a0] sm:$0xff]  }
 0x1e8   : > { %v2172_v10 = vcombine.low %v1869_v18, %v1877_v57  ;;  %v1878_v25 = vcombine.high %v1876_v42, %v1876_v42  ;;  %v1879_v14 = vcombine.high %v1699_v53, %v1699_v53  ;;  %4277 = vmatmul.mubr.bf16.gmra.mxu1 %v3337_v46  ;;  %v2186_v30 = vrot.slane %v1876_v42, %v7652_v62  ;;  %v7133_v57 = vld [vmem:[#allocation2 + $0x1d8] sm:$0xff]  }
 0x1e9   : > { %v1886_v59 = vrot.slane %v1699_v53, %v7652_v62  ;;  %6670 = vmatpush3.bf16.msra.mxu1 %v7118_v58  ;;  %v2596_v21 = vcombine.low %v8115_v22, %v8153_v45  ;;  %v2597_v61 = vcombine.high %v8115_v22, %v8153_v45  ;;  %4357 = vmatprep.mubr.bf16.mxu0 %v3340_v0  ;;  %v8179_v39 = vrot.slane %v8115_v22, 1 }
 0x1ea   : > { %v2179_v27 = vrot.slane %v2172_v10, %v7652_v62  ;;  %v1893_v33 = vrot.slane %v1879_v14, %v7652_v62  ;;  %6671 = vmatprep.subr.bf16.mxu1 %v7120_v63  ;;  %6720 = vmatpush3.bf16.msra.mxu0 %v7124_v7  ;;  %v8171_v51 = vrot.slane %v2509_v1, %v7652_v62 }
 0x1eb   : > { %v1894_v5 = vcombine.high %v1886_v59, %v1886_v59  ;;  %v2188_v20 = vcombine.low %v1878_v25, %v1886_v59  ;;  %v2171_v31 = vcombine.low %v2163_v19, %v2170_v47  ;;  %4358 = vmatmul.mubr.bf16.gmra.mxu0 %v3339_v38  ;;  %v2539_v29 = vrot.slane %v2511_v4, %v7652_v62  ;;  %v7132_v4 = vld [vmem:[#allocation2 + $0x110] sm:$0xff]  }
 0x1ec   : > { %v2187_v34 = vcombine.low %v2179_v27, %v2186_v30  ;;  %v8175_v60 = vrot.slane %v2596_v21, %v7652_v62  ;;  %v8182_v6 = vrot.slane %v2646_v36, %v7652_v62  ;;  %6721 = vmatprep.subr.bf16.mxu0 %v7127_v16  ;;  %v1895_v19 = vcombine.high %v1893_v33, %v1893_v33 }
 0x1ed   : > { %v1659_v37 = vpop.f32.mrf.mxu0  ;;  %v2189_v41 = vcombine.low %v1894_v5, %v1893_v33  ;;  %6672 = vmatpush3.bf16.msra.mxu1 %v7122_v52  ;;  %v8187_v50 = vrot.slane %v2597_v61, %v7652_v62  ;;  %v2196_v22 = vrot.slane %v2188_v20, %v7652_v62  ;;  %v2594_v46 = vcombine.low %v8108_v13, %v8123_v28  ;;  %v7134_v52 = vld [vmem:[#allocation2 + $0x198] sm:$0xff]   ;;  %v7137_v61 = vld [vmem:[#allocation2 + $0x1d0] sm:$0xff]  }
 0x1ee   : > { %v1660_v44 = vadd.f32 %v8025_v35, %v1659_v37  ;;  %v8184_v1 = vpack.c.bf16 %v2187_v34, %v2171_v31  ;;  %v6348_v18 = vcombine.low %v2539_v29, %v8175_v60  ;;  %6673 = vmatprep.subr.bf16.mxu1 %v7125_v24  ;;  %6722 = vmatpush3.bf16.msra.mxu0 %v7128_v23  ;;  %v7136_v31 = vld [vmem:[#allocation2 + $0x108] sm:$0xff]  }
 0x1ef   : > { %v6939_v49 = vpop.f32.mrf.mxu0  ;;  %v2203_v55 = vrot.slane %v2189_v41, %v7652_v62  ;;  %6723 = vmatprep.subr.bf16.mxu0 %v7129_v8  ;;  %v8203_v53 = vrot.slane %v8127_v54, %v7652_v62  ;;  %v7135_v54 = vld [vmem:[#allocation2 + $0x148] sm:$0xff]   ;;  %v7140_v41 = vld [vmem:[#allocation2 + $0x140] sm:$0xff]  }
 0x1f0   : > { %v1700_v32 = vmax.f32 %v1660_v44, 0.0  ;;  %v2715_v56 = vcombine.low %v8179_v39, %v8184_v1  ;;  %v8197_v58 = vrot.slane %v6348_v18, %v7652_v62  ;;  %v2716_v42 = vcombine.high %v8179_v39, %v8184_v1  ;;  %v7138_v49 = vld [vmem:[#allocation2 + $0x190] sm:$0xff]  }
 0x1f1   : > { %v1662_v48 = vpop.f32.mrf.mxu0  ;;  %v2412_v3 = vshrl.u32 %v8184_v1, 16  ;;  %6674 = vmatpush3.bf16.msra.mxu1 %v7126_v17  ;;  %v2204_v7 = vcombine.low %v2196_v22, %v2203_v55  ;;  %v2414_v36 = vshll.u32 %v8184_v1, 16  ;;  %v8220_v8 = vrot.slane %v8184_v1, 1 }
 0x1f2   : > { %v1896_v15 = vcombine.high %v1700_v32, %v1700_v32  ;;  %v1903_v63 = vrot.slane %v1700_v32, %v7652_v62  ;;  %v1663_v47 = vadd.f32 %v8025_v35, %v1662_v48  ;;  %v2723_v25 = vrot.slane %v2715_v56, %v7652_v62  ;;  %6675 = vmatprep.subr.bf16.mxu1 %v7130_v40 }
 0x1f3   : > { %v6940_v10 = vpop.f32.mrf.mxu0  ;;  %v2730_v14 = vrot.slane %v2716_v42, %v7652_v62  ;;  %6724 = vmatpush3.bf16.msra.mxu0 %v7131_v26  ;;  %v2416_v21 = vrot.slane %v2414_v36, 1  ;;  %v8233_v42 = vrot.slane %v2594_v46, %v7652_v62  ;;  %v7141_v36 = vld [vmem:[#allocation2 + $0x188] sm:$0xff]  }
 0x1f4   : > { %v1910_v30 = vrot.slane %v1896_v15, %v7652_v62  ;;  %v1911_v59 = vcombine.high %v1903_v63, %v1903_v63  ;;  %v2205_v0 = vcombine.low %v1895_v19, %v1903_v63  ;;  %v1701_v38 = vmax.f32 %v1663_v47, 0.0  ;;  %6725 = vmatprep.subr.bf16.mxu0 %v7133_v57 }
 0x1f5   : > { %v2732_v16 = vcombine.high %v8175_v60, %v2723_v25  ;;  %v2733_v27 = vcombine.low %v8187_v50, %v2730_v14  ;;  %v6354_v33 = vcombine.low %v8182_v6, %v2723_v25  ;;  %6676 = vmatpush3.bf16.msra.mxu1 %v7132_v4  ;;  %v8223_v19 = vor.u32 %v2416_v21, %v2412_v3  ;;  %v7139_v3 = vld [vmem:[#allocation2 + $0x1c8] sm:$0xff]  }
 0x1f6   : > { %v1912_v24 = vcombine.high %v1910_v30, %v1910_v30  ;;  %v2212_v5 = vrot.slane %v2205_v0, %v7652_v62  ;;  %v2219_v20 = vrot.slane %v1911_v59, %v7652_v62  ;;  %v1913_v23 = vcombine.high %v1701_v38, %v1701_v38  ;;  %6677 = vmatprep.subr.bf16.mxu1 %v7135_v54  ;;  %v7142_v54 = vld [vmem:[#allocation2 + $0x100] sm:$0xff]  }
 0x1f7   : > { %v1920_v34 = vrot.slane %v1701_v38, %v7652_v62  ;;  %v6355_v37 = vcombine.low %v2732_v16, %v8187_v50  ;;  %v6356_v29 = vcombine.high %v2723_v25, %v2733_v27  ;;  %6726 = vmatpush3.bf16.msra.mxu0 %v7134_v52  ;;  %v3411_v22 = vrot.slane %v6354_v33, %v7652_v62  ;;  %v7143_v38 = vld [vmem:[#allocation2 + $0x1c0] sm:$0xff]   ;;  %v8243_v52 = vld [vmem:[#allocation2 + $0x238] sm:$0xff]  }
 0x1f8   : > { %v2220_v44 = vcombine.low %v2212_v5, %v2219_v20  ;;  %v2221_v6 = vcombine.low %v1910_v30, %v1912_v24  ;;  %v1927_v17 = vrot.slane %v1913_v23, %v7652_v62  ;;  %6727 = vmatprep.subr.bf16.mxu0 %v7137_v61  ;;  %v2666_v56 = vcombine.low %v8184_v1, %v8223_v19 }
 0x1f9   : > { %v1928_v18 = vcombine.high %v1920_v34, %v1920_v34  ;;  %v3418_v40 = vrot.slane %v6355_v37, %v7652_v62  ;;  %v3425_v55 = vrot.slane %v6356_v29, %v7652_v62  ;;  %v1667_v48 = vpop.f32.mrf.mxu0  ;;  %6678 = vmatpush3.bf16.msra.mxu1 %v7136_v31  ;;  %v2667_v0 = vcombine.high %v8184_v1, %v8223_v19 }
 0x1fa   : > { %v8228_v32 = vpack.c.bf16 %v2220_v44, %v2204_v7  ;;  %v1929_v26 = vcombine.high %v1927_v17, %v1927_v17  ;;  %v1668_v15 = vadd.f32 %v8025_v35, %v1667_v48  ;;  %6679 = vmatprep.subr.bf16.mxu1 %v7140_v41  ;;  %v2229_v4 = vrot.slane %v2221_v6, %v7652_v62  ;;  %v7144_v41 = vld [vmem:[#allocation2 + $0x180] sm:$0xff]  }
 0x1fb   : > { %v2222_v57 = vcombine.low %v1920_v34, %v1928_v18  ;;  %v3427_v63 = vcombine.high %v8197_v58, %v3418_v40  ;;  %v3429_v47 = vcombine.high %v3411_v22, %v3425_v55  ;;  %v6943_v10 = vpop.f32.mrf.mxu0  ;;  %v3426_v25 = vcombine.low %v8197_v58, %v3418_v40  ;;  %6728 = vmatpush3.bf16.msra.mxu0 %v7138_v49 }
 0x1fc   : > { %v2238_v7 = vcombine.low %v1927_v17, %v1929_v26  ;;  %v3428_v14 = vcombine.low %v3411_v22, %v3425_v55  ;;  %v1702_v30 = vmax.f32 %v1668_v15, 0.0  ;;  %v2421_v59 = vshll.u32 %v8228_v32, 16  ;;  %6729 = vmatprep.subr.bf16.mxu0 %v7139_v3 }
 0x1fd   : > { %v2236_v46 = vrot.slane %v2222_v57, %v7652_v62  ;;  %4284 = vmatprep.mubr.bf16.mxu1 %v3427_v63  ;;  %4365 = vmatprep.mubr.bf16.mxu0 %v3429_v47  ;;  %v1670_v27 = vpop.f32.mrf.mxu0  ;;  %v2419_v33 = vshrl.u32 %v8228_v32, 16  ;;  %v2688_v21 = vrot.slane %v2666_v56, %v7652_v62  ;;  %v2785_v61 = vcombine.low %v8220_v8, %v8228_v32 }
 0x1fe   : > { %v2245_v16 = vrot.slane %v2238_v7, %v7652_v62  ;;  %4285 = vmatmul.mubr.bf16.gmra.mxu1 %v3426_v25  ;;  %4366 = vmatmul.mubr.bf16.gmra.mxu0 %v3428_v14  ;;  %v1930_v24 = vcombine.high %v1702_v30, %v1702_v30  ;;  %v1937_v5 = vrot.slane %v1702_v30, %v7652_v62  ;;  %v8253_v20 = vrot.slane %v8228_v32, 1 }
 0x1ff   : > { %v1671_v1 = vadd.f32 %v8025_v35, %v1670_v27  ;;  %v2237_v23 = vcombine.low %v2229_v4, %v2236_v46  ;;  %v6944_v31 = vpop.f32.mrf.mxu0  ;;  %v2423_v34 = vrot.slane %v2421_v59, 1  ;;  %v2695_v37 = vrot.slane %v2667_v0, %v7652_v62  ;;  %6730 = vmatpush3.bf16.msra.mxu0 %v7141_v36  ;;  %6680 = vmatpush3.bf16.msra.mxu1 %v7142_v54 }
 0x200   : > { %v2786_v29 = vcombine.high %v8220_v8, %v8228_v32  ;;  %v1944_v44 = vrot.slane %v1930_v24, %v7652_v62  ;;  %v1945_v6 = vcombine.high %v1937_v5, %v1937_v5  ;;  %v2252_v17 = vrot.slane %v1937_v5, %v7652_v62  ;;  %6731 = vmatprep.subr.bf16.mxu0 %v7143_v38 }
 0x201   : > { %v1703_v49 = vmax.f32 %v1671_v1, 0.0  ;;  %6953 = vmatprep.subr.bf16.mxu1 %v8243_v52  ;;  %v8261_v18 = vor.u32 %v2423_v34, %v2419_v33  ;;  %v8264_v40 = vrot.slane %v2688_v21, %v7652_v62  ;;  %v2793_v22 = vrot.slane %v2785_v61, %v7652_v62 }
 0x202   : > { %v6347_v55 = vcombine.low %v8171_v51, %v8233_v42  ;;  %v2253_v26 = vcombine.low %v2245_v16, %v2252_v17  ;;  %v2254_v48 = vcombine.low %v1945_v6, %v1944_v44  ;;  %v1946_v56 = vcombine.high %v1944_v44, %v1944_v44 }
 0x203   : > { %v1947_v57 = vcombine.high %v1703_v49, %v1703_v49  ;;  %v1954_v15 = vrot.slane %v1703_v49, %v7652_v62  ;;  %v2736_v63 = vcombine.low %v8228_v32, %v8261_v18  ;;  %v2800_v47 = vrot.slane %v2786_v29, %v7652_v62  ;;  %6732 = vmatpush3.bf16.msra.mxu0 %v7144_v41 }
 0x204   : > { %v2737_v3 = vcombine.high %v8228_v32, %v8261_v18  ;;  %v2262_v4 = vrot.slane %v2254_v48, %v7652_v62  ;;  %v8276_v7 = vpack.c.bf16 %v2253_v26, %v2237_v23  ;;  %v3500_v10 = vrot.slane %v2793_v22, %v7652_v62 }
 0x205   : > { %v1961_v51 = vrot.slane %v1947_v57, %v7652_v62  ;;  %v1962_v25 = vcombine.high %v1954_v15, %v1954_v15  ;;  %v2255_v14 = vcombine.low %v1946_v56, %v1954_v15  ;;  %v8281_v36 = vrot.slane %v2736_v63, %v7652_v62 }
 0x206   : > { %v8284_v54 = vrot.slane %v6347_v55, %v7652_v62  ;;  %v2855_v32 = vcombine.low %v8253_v20, %v8276_v7  ;;  %v2428_v30 = vshll.u32 %v8276_v7, 16  ;;  %v8290_v59 = vrot.slane %v2737_v3, %v7652_v62 }
 0x207   : > { %v1963_v46 = vcombine.high %v1961_v51, %v1961_v51  ;;  %v2269_v0 = vrot.slane %v2255_v14, %v7652_v62  ;;  %v2271_v38 = vcombine.low %v1962_v25, %v1961_v51  ;;  %v6358_v16 = vcombine.low %v2695_v37, %v8281_v36 }
 0x208   : > { %v2426_v27 = vshrl.u32 %v8276_v7, 16  ;;  %v2863_v21 = vrot.slane %v2855_v32, %v7652_v62  ;;  %v2430_v61 = vrot.slane %v2428_v30, 1  ;;  %v2856_v24 = vcombine.high %v8253_v20, %v8276_v7 }
 0x209   : > { %v2285_v33 = vrot.slane %v1963_v46, %v7652_v62  ;;  %v2270_v5 = vcombine.low %v2262_v4, %v2269_v0  ;;  %v2278_v1 = vrot.slane %v2271_v38, %v7652_v62  ;;  %v8301_v31 = vrot.slane %v6358_v16, %v7652_v62 }
 0x20a   : > { %v1675_v23 = vpop.f32.mrf.mxu0  ;;  %v3284_v34 = vcombine.low %v8203_v53, %v8284_v54  ;;  %v6362_v29 = vcombine.low %v2800_v47, %v2863_v21  ;;  %v8306_v41 = vor.u32 %v2430_v61, %v2426_v27  ;;  %v2872_v44 = vcombine.high %v8281_v36, %v2863_v21 }
 0x20b   : > { %v1676_v37 = vadd.f32 %v8025_v35, %v1675_v23  ;;  %v2286_v6 = vcombine.low %v2278_v1, %v2285_v33  ;;  %v3516_v49 = vcombine.high %v8264_v40, %v8301_v31  ;;  %v3515_v22 = vcombine.low %v8264_v40, %v8301_v31 }
 0x20c   : > { %v6947_v17 = vpop.f32.mrf.mxu0  ;;  %v2870_v55 = vrot.slane %v2856_v24, %v7652_v62  ;;  %v3514_v48 = vrot.slane %v6362_v29, %v7652_v62  ;;  %v2806_v56 = vcombine.low %v8276_v7, %v8306_v41  ;;  %v6365_v57 = vcombine.low %v2872_v44, %v8290_v59 }
 0x20d   : > { %v1704_v26 = vmax.f32 %v1676_v37, 0.0  ;;  %v8318_v15 = vpack.c.bf16 %v2286_v6, %v2270_v5  ;;  %4292 = vmatprep.mubr.bf16.mxu1 %v3516_v49  ;;  %v8321_v47 = vrot.slane %v8276_v7, 1  ;;  %v3285_v4 = vcombine.high %v8203_v53, %v8284_v54 }
 0x20e   : > { %v1678_v63 = vpop.f32.mrf.mxu0  ;;  %v2873_v3 = vcombine.low %v8290_v59, %v2870_v55  ;;  %4293 = vmatmul.mubr.bf16.gmra.mxu1 %v3515_v22  ;;  %v3518_v46 = vcombine.high %v3500_v10, %v3514_v48  ;;  %v3517_v30 = vcombine.low %v3500_v10, %v3514_v48  ;;  %v2828_v0 = vrot.slane %v2806_v56, %v7652_v62 }
 0x20f   : > { %v1964_v51 = vcombine.high %v1704_v26, %v1704_v26  ;;  %v1971_v25 = vrot.slane %v1704_v26, %v7652_v62  ;;  %v1679_v14 = vadd.f32 %v8025_v35, %v1678_v63  ;;  %v2925_v38 = vcombine.low %v8321_v47, %v8318_v15 }
 0x210   : > { %v6948_v32 = vpop.f32.mrf.mxu0  ;;  %4373 = vmatprep.mubr.bf16.mxu0 %v3518_v46  ;;  %v3582_v61 = vrot.slane %v6365_v57, %v7652_v62  ;;  %v8334_v5 = vrot.slane %v2828_v0, %v7652_v62  ;;  %v6366_v10 = vcombine.high %v2863_v21, %v2873_v3  ;;  %v2435_v23 = vshll.u32 %v8318_v15, 16 }
 0x211   : > { %v1978_v16 = vrot.slane %v1964_v51, %v7652_v62  ;;  %v1979_v27 = vcombine.high %v1971_v25, %v1971_v25  ;;  %v1705_v33 = vmax.f32 %v1679_v14, 0.0  ;;  %4374 = vmatmul.mubr.bf16.gmra.mxu0 %v3517_v30  ;;  %v2933_v1 = vrot.slane %v2925_v38, %v7652_v62 }
 0x212   : > { %v1683_v24 = vpop.f32.mrf.mxu0  ;;  %v3605_v22 = vcombine.high %v3582_v61, %v8334_v5  ;;  %v3604_v55 = vcombine.low %v3582_v61, %v8334_v5  ;;  %v3589_v63 = vrot.slane %v6366_v10, %v7652_v62  ;;  %v2437_v51 = vrot.slane %v2435_v23, 1 }
 0x213   : > { %v1980_v37 = vcombine.high %v1978_v16, %v1978_v16  ;;  %v1981_v29 = vcombine.high %v1705_v33, %v1705_v33  ;;  %v1988_v44 = vrot.slane %v1705_v33, %v7652_v62  ;;  %v2287_v6 = vcombine.low %v1971_v25, %v1979_v27 }
 0x214   : > { %v1684_v17 = vadd.f32 %v8025_v35, %v1683_v24  ;;  %v6951_v49 = vpop.f32.mrf.mxu0  ;;  %4300 = vmatprep.mubr.bf16.mxu1 %v3605_v22  ;;  %v3603_v3 = vrot.slane %v2933_v1, %v7652_v62  ;;  %v2433_v46 = vshrl.u32 %v8318_v15, 16  ;;  %v2926_v22 = vcombine.high %v8321_v47, %v8318_v15 }
 0x215   : > { %v2288_v26 = vcombine.low %v1978_v16, %v1980_v37  ;;  %v1995_v48 = vrot.slane %v1981_v29, %v7652_v62  ;;  %v1996_v56 = vcombine.high %v1988_v44, %v1988_v44  ;;  %v2295_v32 = vrot.slane %v2287_v6, %v7652_v62 }
 0x216   : > { %v1706_v57 = vmax.f32 %v1684_v17, 0.0  ;;  %v1686_v21 = vpop.f32.mrf.mxu0  ;;  %4301 = vmatmul.mubr.bf16.gmra.mxu1 %v3604_v55  ;;  %v3607_v38 = vcombine.high %v3589_v63, %v3603_v3  ;;  %v3606_v61 = vcombine.low %v3589_v63, %v3603_v3  ;;  %v8351_v24 = vor.u32 %v2437_v51, %v2433_v46 }
 0x217   : > { %v2302_v25 = vrot.slane %v2288_v26, %v7652_v62  ;;  %v2304_v14 = vcombine.low %v1988_v44, %v1996_v56  ;;  %v1687_v0 = vadd.f32 %v8025_v35, %v1686_v21  ;;  %v2318_v33 = vrot.slane %v1995_v48, %v7652_v62 }
 0x218   : > { %v1998_v30 = vcombine.high %v1706_v57, %v1706_v57  ;;  %v6952_v16 = vpop.f32.mrf.mxu0  ;;  %4381 = vmatprep.mubr.bf16.mxu0 %v3607_v38  ;;  %v2876_v29 = vcombine.low %v8318_v15, %v8351_v24  ;;  %v2005_v35 = vrot.slane %v1706_v57, %v7652_v62  ;;  %v2807_v44 = vcombine.high %v8276_v7, %v8306_v41 }
 0x219   : > { %v2311_v27 = vrot.slane %v2304_v14, %v7652_v62  ;;  %v1707_v10 = vmax.f32 %v1687_v0, 0.0  ;;  %v2303_v23 = vcombine.low %v2295_v32, %v2302_v25  ;;  %4382 = vmatmul.mubr.bf16.gmra.mxu0 %v3606_v61  ;;  %v8362_v17 = vrot.slane %v8318_v15, 1 }
 0x21a   : > { %v2012_v1 = vrot.slane %v1998_v30, %v7652_v62  ;;  %v2877_v49 = vcombine.high %v8318_v15, %v8351_v24  ;;  %v8370_v56 = vrot.slane %v2876_v29, %v7652_v62  ;;  %v2013_v21 = vcombine.high %v2005_v35, %v2005_v35 }
 0x21b   : > { %v2319_v37 = vcombine.low %v2311_v27, %v2318_v33  ;;  %v2021_v26 = vrot.slane %v1707_v10, %v7652_v62  ;;  %v2835_v63 = vrot.slane %v2807_v44, %v7652_v62  ;;  %v2940_v51 = vrot.slane %v2926_v22, %v7652_v62 }
 0x21c   : > { %v2014_v55 = vcombine.high %v2012_v1, %v2012_v1  ;;  %v8378_v3 = vrot.slane %v2877_v49, %v7652_v62  ;;  %v1997_v14 = vcombine.high %v1995_v48, %v1995_v48  ;;  %v2321_v27 = vcombine.low %v2013_v21, %v2012_v1 }
 0x21d   : > { %v8359_v6 = vpack.c.bf16 %v2319_v37, %v2303_v23  ;;  %v2022_v46 = vcombine.high %v2021_v26, %v2021_v26  ;;  %v6364_v0 = vcombine.low %v2835_v63, %v8370_v56  ;;  %v2595_v33 = vcombine.high %v8108_v13, %v8123_v28 }
 0x21e   : > { %v2337_v32 = vcombine.low %v2014_v55, %v2021_v26  ;;  %v2664_v23 = vcombine.low %v8153_v45, %v8179_v39  ;;  %v2320_v48 = vcombine.low %v1997_v14, %v2005_v35  ;;  %v2627_v44 = vcombine.high %v8233_v42, %v8175_v60 }
 0x21f   : > { %v2995_v7 = vcombine.low %v8362_v17, %v8359_v6  ;;  %v2996_v57 = vcombine.high %v8362_v17, %v8359_v6  ;;  %v2351_v29 = vrot.slane %v2022_v46, %v7652_v62  ;;  %v8396_v49 = vrot.slane %v6364_v0, %v7652_v62 }
 0x220   : > { %v2344_v37 = vrot.slane %v2337_v32, %v7652_v62  ;;  %v2335_v55 = vrot.slane %v2321_v27, %v7652_v62  ;;  %v2611_v35 = vrot.slane %v2595_v33, %v7652_v62  ;;  %v2734_v26 = vcombine.low %v8223_v19, %v8220_v8 }
 0x221   : > { %v3003_v15 = vrot.slane %v2995_v7, %v7652_v62  ;;  %v3010_v25 = vrot.slane %v2996_v57, %v7652_v62  ;;  %v2735_v7 = vcombine.high %v8223_v19, %v8220_v8  ;;  %v3287_v46 = vcombine.high %v8138_v43, %v8197_v58 }
 0x222   : > { %v2352_v14 = vcombine.low %v2344_v37, %v2351_v29  ;;  %v2674_v19 = vrot.slane %v2664_v23, %v7652_v62  ;;  %v2744_v32 = vrot.slane %v2734_v26, %v7652_v62  ;;  %v7146_v37 = vld [vmem:[#allocation2 + $0x230] sm:$0xff]  }
 0x223   : > { %v3012_v30 = vcombine.high %v8370_v56, %v3003_v15  ;;  %v3013_v38 = vcombine.low %v8378_v3, %v3010_v25  ;;  %v6370_v16 = vcombine.low %v2940_v51, %v3003_v15  ;;  %v2628_v51 = vcombine.low %v2611_v35, %v8187_v50 }
 0x224   : > { %v2328_v25 = vrot.slane %v2320_v48, %v7652_v62  ;;  %v2751_v50 = vrot.slane %v2735_v7, %v7652_v62  ;;  %v2767_v27 = vcombine.high %v2744_v32, %v8281_v36  ;;  %v2456_v7 = vshrl.u32 %v8359_v6, 16 }
 0x225   : > { %v6371_v61 = vcombine.low %v3012_v30, %v8378_v3  ;;  %v6372_v10 = vcombine.high %v3003_v15, %v3013_v38  ;;  %v3678_v13 = vrot.slane %v6370_v16, %v7652_v62  ;;  %v6351_v15 = vcombine.low %v2627_v44, %v2611_v35 }
 0x226   : > { %v2336_v30 = vcombine.low %v2328_v25, %v2335_v55  ;;  %v6352_v38 = vcombine.high %v8175_v60, %v2628_v51  ;;  %v2665_v16 = vcombine.high %v8153_v45, %v8179_v39  ;;  %v6359_v29 = vcombine.low %v2767_v27, %v2751_v50 }
 0x227   : > { %v3685_v1 = vrot.slane %v6371_v61, %v7652_v62  ;;  %v3692_v22 = vrot.slane %v6372_v10, %v7652_v62  ;;  %v3351_v0 = vrot.slane %v6351_v15, %v7652_v62  ;;  %v2768_v61 = vcombine.low %v2751_v50, %v8290_v59 }
 0x228   : > { %v8424_v33 = vpack.c.bf16 %v2352_v14, %v2336_v30  ;;  %v3365_v10 = vrot.slane %v2674_v19, %v7652_v62  ;;  %v3358_v48 = vrot.slane %v6352_v38, %v7652_v62  ;;  %v2681_v60 = vrot.slane %v2665_v16, %v7652_v62  ;;  %v7148_v14 = vld [vmem:[#allocation2 + $0x220] sm:$0xff]  }
 0x229   : > { %v3694_v42 = vcombine.high %v8396_v49, %v3685_v1  ;;  %v3696_v57 = vcombine.high %v3678_v13, %v3692_v22  ;;  %v3693_v21 = vcombine.low %v8396_v49, %v3685_v1  ;;  %v3695_v63 = vcombine.low %v3678_v13, %v3692_v22  ;;  %v7147_v22 = vld [vmem:[#allocation2 + $0x228] sm:$0xff]  }
 0x22a   : > { %v3374_v23 = vcombine.high %v3351_v0, %v3365_v10  ;;  %v6360_v45 = vcombine.high %v8281_v36, %v2768_v61  ;;  %v2874_v44 = vcombine.low %v8306_v41, %v8321_v47  ;;  %v2458_v1 = vshll.u32 %v8359_v6, 16 }
 0x22b   : > { %4308 = vmatprep.mubr.bf16.mxu1 %v3694_v42  ;;  %4389 = vmatprep.mubr.bf16.mxu0 %v3696_v57  ;;  %v2467_v59 = vshll.u32 %v8424_v33, 16  ;;  %v2805_v36 = vcombine.high %v8261_v18, %v8253_v20  ;;  %v3454_v13 = vrot.slane %v6359_v29, %v7652_v62  ;;  %v2465_v42 = vshrl.u32 %v8424_v33, 16 }
 0x22c   : > { %4309 = vmatmul.mubr.bf16.gmra.mxu1 %v3693_v21  ;;  %4390 = vmatmul.mubr.bf16.gmra.mxu0 %v3695_v63  ;;  %v3461_v55 = vrot.slane %v6360_v45, %v7652_v62  ;;  %v2884_v53 = vrot.slane %v2874_v44, %v7652_v62  ;;  %v2460_v54 = vrot.slane %v2458_v1, 1  ;;  %v3373_v57 = vcombine.low %v3351_v0, %v3365_v10  ;;  %v7149_v0 = vld [vmem:[#allocation2 + $0x218] sm:$0xff]  }
 0x22d   : > { %4430 = vmatprep.mubr.bf16.mxu1 %v3285_v4  ;;  %4511 = vmatprep.mubr.bf16.mxu0 %v3287_v46  ;;  %v3286_v4 = vcombine.low %v8138_v43, %v8197_v58  ;;  %v3376_v43 = vcombine.high %v3358_v48, %v8264_v40  ;;  %v6357_v58 = vcombine.low %v2681_v60, %v2744_v32  ;;  %v8465_v30 = vrot.slane %v8359_v6, 1 }
 0x22e   : > { %v2821_v26 = vrot.slane %v2805_v36, %v7652_v62  ;;  %v3375_v21 = vcombine.low %v3358_v48, %v8264_v40  ;;  %v2875_v15 = vcombine.high %v8306_v41, %v8321_v47  ;;  %v3465_v51 = vcombine.high %v8301_v31, %v3461_v55 }
 0x22f   : > { %v3440_v35 = vrot.slane %v6357_v58, %v7652_v62  ;;  %v2907_v32 = vcombine.high %v2884_v53, %v8370_v56  ;;  %v2944_v41 = vcombine.low %v8351_v24, %v8362_v17  ;;  %v3554_v10 = vcombine.high %v8334_v5, %v8396_v49 }
 0x230   : > { %v6363_v25 = vcombine.low %v2821_v26, %v2884_v53  ;;  %v2891_v40 = vrot.slane %v2875_v15, %v7652_v62  ;;  %v3464_v60 = vcombine.low %v8301_v31, %v3461_v55  ;;  %v2945_v58 = vcombine.high %v8351_v24, %v8362_v17  ;;  %v7151_v26 = vld [vmem:[#allocation2 + $0x208] sm:$0xff]  }
 0x231   : > { %v3463_v63 = vcombine.high %v3440_v35, %v3454_v13  ;;  %v2954_v29 = vrot.slane %v2944_v41, %v7652_v62  ;;  %v2839_v31 = vcombine.high %v8321_v47, %v8321_v47  ;;  %v2846_v36 = vrot.slane %v8321_v47, %v7652_v62 }
 0x232   : > { %v3543_v50 = vrot.slane %v6363_v25, %v7652_v62  ;;  %v6367_v45 = vcombine.low %v2907_v32, %v2891_v40  ;;  %v2961_v25 = vrot.slane %v2945_v58, %v7652_v62  ;;  %v7152_v32 = vld [vmem:[#allocation2 + $0x200] sm:$0xff]  }
 0x233   : > { %v2854_v24 = vcombine.high %v2846_v36, %v2846_v36 }
 0x234   : > { %4431 = vmatmul.mubr.bf16.vlgmr.msra.gmra.mxu1 %v3284_v34  ;;  %4512 = vmatmul.mubr.bf16.vlgmr.msra.gmra.mxu0 %v3286_v4  ;;  %v2469_v34 = vrot.slane %v2467_v59, 1  ;;  %v2908_v4 = vcombine.low %v2891_v40, %v8378_v3  ;;  %v7150_v59 = vld [vmem:[#allocation2 + $0x210] sm:$0xff]   ;;  %v3618_v53 = vrot.slane %v6367_v45, %v7652_v62 }
 0x235   : > { %6954 = vmatpush3.bf16.msra.mxu1 %v8243_v52  ;;  %4438 = vmatprep.mubr.bf16.mxu1 %v3374_v23  ;;  %v2804_v52 = vcombine.low %v8261_v18, %v8253_v20  ;;  %v8457_v18 = vor.u32 %v2460_v54, %v2456_v7  ;;  %v2853_v54 = vrot.slane %v2839_v31, %v7652_v62 }
 0x236   : > { %4519 = vmatprep.mubr.bf16.mxu0 %v3376_v43  ;;  %6955 = vmatprep.subr.bf16.mxu1 %v7146_v37  ;;  %v2470_v46 = vor.u32 %v2469_v34, %v2465_v42  ;;  %v8498_v34 = vrot.slane %v8362_v17, %v7652_v62  ;;  %v3632_v7 = vrot.slane %v2954_v29, %v7652_v62 }
 0x237   : > { %v2814_v19 = vrot.slane %v2804_v52, %v7652_v62  ;;  %v2946_v38 = vcombine.low %v8359_v6, %v8457_v18  ;;  %v3014_v23 = vcombine.low %v8457_v18, %v8465_v30  ;;  %v3015_v48 = vcombine.high %v8457_v18, %v8465_v30 }
 0x238   : > { %v3016_v16 = vcombine.low %v8424_v33, %v2470_v46  ;;  %v3017_v27 = vcombine.high %v8424_v33, %v2470_v46  ;;  %v3555_v42 = vcombine.low %v2846_v36, %v2854_v24  ;;  %v2699_v31 = vcombine.high %v8220_v8, %v8220_v8 }
 0x239   : > { %6956 = vmatpush3.bf16.msra.mxu1 %v7146_v37  ;;  %v3529_v61 = vrot.slane %v2814_v19, %v7652_v62  ;;  %v3462_v37 = vcombine.low %v3440_v35, %v3454_v13  ;;  %v2968_v1 = vrot.slane %v2946_v38, %v7652_v62  ;;  %v6368_v13 = vcombine.high %v8370_v56, %v2908_v4 }
 0x23a   : > { %6957 = vmatprep.subr.bf16.mxu1 %v7147_v22  ;;  %v3038_v3 = vrot.slane %v3016_v16, %v7652_v62  ;;  %v3045_v43 = vrot.slane %v3017_v27, %v7652_v62  ;;  %v3031_v55 = vrot.slane %v3015_v48, %v7652_v62  ;;  %v2947_v56 = vcombine.high %v8359_v6, %v8457_v18 }
 0x23b   : > { %v3552_v44 = vcombine.high %v3529_v61, %v3543_v50  ;;  %v3639_v47 = vrot.slane %v2968_v1, %v7652_v62  ;;  %v3625_v15 = vrot.slane %v6368_v13, %v7652_v62  ;;  %v2636_v38 = vrot.slane %v8179_v39, %v7652_v62 }
 0x23c   : > { %4439 = vmatmul.mubr.bf16.gmra.mxu1 %v3373_v57  ;;  %4520 = vmatmul.mubr.bf16.gmra.mxu0 %v3375_v21  ;;  %v3048_v52 = vcombine.low %v3031_v55, %v3045_v43  ;;  %v3556_v57 = vcombine.low %v2853_v54, %v8498_v34  ;;  %v3551_v21 = vcombine.low %v3529_v61, %v3543_v50 }
 0x23d   : > { %4446 = vmatprep.mubr.bf16.mxu1 %v3463_v63  ;;  %4527 = vmatprep.mubr.bf16.mxu0 %v3465_v51  ;;  %v3553_v63 = vcombine.low %v8334_v5, %v8396_v49  ;;  %v3641_v51 = vcombine.high %v3618_v53, %v3632_v7  ;;  %v3643_v18 = vcombine.high %v3625_v15, %v3639_v47 }
 0x23e   : > { %6958 = vmatpush3.bf16.msra.mxu1 %v7147_v22  ;;  %v3024_v22 = vrot.slane %v3014_v23, %v7652_v62  ;;  %v3570_v6 = vrot.slane %v3556_v57, %v7652_v62  ;;  %v2975_v19 = vrot.slane %v2947_v56, %v7652_v62  ;;  %v6376_v40 = vcombine.high %v3038_v3, %v3048_v52 }
 0x23f   : > { %6959 = vmatprep.subr.bf16.mxu1 %v7148_v14  ;;  %v2543_v5 = vcombine.high %v8123_v28, %v8123_v28  ;;  %v3640_v48 = vcombine.low %v3618_v53, %v3632_v7  ;;  %v2776_v1 = vrot.slane %v8253_v20, %v7652_v62  ;;  %v2986_v56 = vrot.slane %v8465_v30, %v7652_v62 }
 0x240   : > { %v3047_v35 = vcombine.high %v3024_v22, %v3038_v3  ;;  %v6373_v41 = vcombine.low %v2961_v25, %v3024_v22  ;;  %v6374_v50 = vcombine.low %v2975_v19, %v3038_v3  ;;  %v3728_v27 = vrot.slane %v6376_v40, %v7652_v62 }
 0x241   : > { %v2557_v61 = vrot.slane %v2543_v5, %v7652_v62  ;;  %v2784_v13 = vcombine.high %v2776_v1, %v2776_v1  ;;  %v2924_v25 = vcombine.high %v8498_v34, %v8498_v34  ;;  %v2979_v19 = vcombine.high %v8465_v30, %v8465_v30 }
 0x242   : > { %6960 = vmatpush3.bf16.msra.mxu1 %v7148_v14  ;;  %v3563_v14 = vrot.slane %v3555_v42, %v7652_v62  ;;  %v6375_v46 = vcombine.low %v3047_v35, %v3031_v55  ;;  %v3714_v4 = vrot.slane %v6374_v50, %v7652_v62  ;;  %v2472_v42 = vrot.slane %v8424_v33, 1 }
 0x243   : > { %6961 = vmatprep.subr.bf16.mxu1 %v7149_v0  ;;  %v2993_v34 = vrot.slane %v2979_v19, %v7652_v62  ;;  %v7168_v19 = vld [vmem:[#allocation5 + $0x98] sm:$0xff]  }
 0x244   : > { %4447 = vmatmul.mubr.bf16.gmra.mxu1 %v3462_v37  ;;  %4528 = vmatmul.mubr.bf16.gmra.mxu0 %v3464_v60  ;;  %v8514_v49 = vcombine.low %v3563_v14, %v3570_v6  ;;  %v3721_v16 = vrot.slane %v6375_v46, %v7652_v62  ;;  %v3642_v37 = vcombine.low %v3625_v15, %v3639_v47 }
 0x245   : > { %4454 = vmatprep.mubr.bf16.mxu1 %v3552_v44  ;;  %4535 = vmatprep.mubr.bf16.mxu0 %v3554_v10  ;;  %v3707_v10 = vrot.slane %v6373_v41, %v7652_v62  ;;  %v3289_v60 = vcombine.low %v2557_v61, %v2636_v38  ;;  %v3732_v45 = vcombine.high %v3714_v4, %v3728_v27  ;;  %v7153_v61 = vld [vmem:[#allocation5 + $0xf8] sm:$0xff]  }
 0x246   : > { %6962 = vmatpush3.bf16.msra.mxu1 %v7149_v0  ;;  %v2550_v0 = vrot.slane %v8123_v28, %v7652_v62  ;;  %v2706_v28 = vrot.slane %v8220_v8, %v7652_v62  ;;  %v2769_v44 = vcombine.high %v8253_v20, %v8253_v20  ;;  %v2644_v20 = vcombine.high %v2636_v38, %v2636_v38 }
 0x247   : > { %6963 = vmatprep.subr.bf16.mxu1 %v7150_v59  ;;  %v3730_v29 = vcombine.high %v3707_v10, %v3721_v16  ;;  %v3303_v58 = vrot.slane %v3289_v60, %v7652_v62  ;;  %v3729_v53 = vcombine.low %v3707_v10, %v3721_v16  ;;  %v3731_v54 = vcombine.low %v3714_v4, %v3728_v27  ;;  %v7154_v10 = vld [vmem:[#allocation5 + $0xb8] sm:$0xff]   ;;  %v7155_v4 = vld [vmem:[#allocation5 + $0xf0] sm:$0xff]  }
 0x248   : > { %v2558_v23 = vcombine.high %v2550_v0, %v2550_v0  ;;  %v2714_v43 = vcombine.high %v2706_v28, %v2706_v28  ;;  %v2783_v36 = vrot.slane %v2769_v44, %v7652_v62  ;;  %v2713_v47 = vrot.slane %v2699_v31, %v7652_v62  ;;  %6805 = vmatprep.subr.bf16.mxu0 %v7153_v61 }
 0x249   : > { %v3049_v6 = vcombine.high %v2472_v42, %v2472_v42  ;;  %6806 = vmatpush3.bf16.msra.mxu0 %v7154_v10  ;;  %v7175_v10 = vld [vmem:[#allocation5 + $0x50] sm:$0xff]  }
 0x24a   : > { %6964 = vmatpush3.bf16.msra.mxu1 %v7150_v59  ;;  %v2629_v59 = vcombine.high %v8179_v39, %v8179_v39  ;;  %v3288_v3 = vcombine.low %v2550_v0, %v2558_v23  ;;  %v3378_v39 = vcombine.low %v2706_v28, %v2714_v43  ;;  %v3467_v35 = vcombine.low %v2784_v13, %v2783_v36  ;;  %v8565_v28 = vld [vmem:[%s9188_s4] ss:$0 sm:$0xff] }
 0x24b   : > { %6965 = vmatprep.subr.bf16.mxu1 %v7151_v26  ;;  %v3466_v52 = vcombine.low %v2713_v47, %v2776_v1  ;;  %v3063_v40 = vrot.slane %v3049_v6, %v7652_v62  ;;  %6807 = vmatprep.subr.bf16.mxu0 %v7155_v4  ;;  %v7164_v6 = vld [vmem:[#allocation5 + $0xa0] sm:$0xff]  }
 0x24c   : > { %4455 = vmatmul.mubr.bf16.gmra.mxu1 %v3551_v21  ;;  %4536 = vmatmul.mubr.bf16.gmra.mxu0 %v3553_v63  ;;  %v2643_v22 = vrot.slane %v2629_v59, %v7652_v62  ;;  %v3296_v55 = vrot.slane %v3288_v3, %v7652_v62  ;;  %v3392_v7 = vrot.slane %v3378_v39, %v7652_v62 }
 0x24d   : > { %4462 = vmatprep.mubr.bf16.mxu1 %v3641_v51  ;;  %4543 = vmatprep.mubr.bf16.mxu0 %v3643_v18  ;;  %v3481_v57 = vrot.slane %v3467_v35, %v7652_v62  ;;  %v2994_v21 = vcombine.high %v2986_v56, %v2986_v56  ;;  %v3474_v15 = vrot.slane %v3466_v52, %v7652_v62  ;;  %v7160_v35 = vld [vmem:[#allocation5 + $0x38] sm:$0xff]  }
 0x24e   : > { %6966 = vmatpush3.bf16.msra.mxu1 %v7151_v26  ;;  %v3304_v24 = vcombine.low %v3296_v55, %v3303_v58  ;;  %v3377_v8 = vcombine.low %v2644_v20, %v2643_v22  ;;  %v2909_v26 = vcombine.high %v8362_v17, %v8362_v17  ;;  %v3056_v17 = vrot.slane %v2472_v42, %v7652_v62  ;;  %v7158_v22 = vld [vmem:[#allocation5 + $0xa8] sm:$0xff]   ;;  %v7159_v20 = vld [vmem:[#allocation5 + $0x78] sm:$0xff]  }
 0x24f   : > { %6967 = vmatprep.subr.bf16.mxu1 %v7152_v32  ;;  %v3482_v18 = vcombine.low %v3474_v15, %v3481_v57  ;;  %v3645_v46 = vcombine.low %v2986_v56, %v2994_v21  ;;  %v7161_v57 = vld [vmem:[#allocation5 + $0x70] sm:$0xff]   ;;  %v7162_v21 = vld [vmem:[#allocation5 + $0xe0] sm:$0xff]  }
 0x250   : > { %v3385_v63 = vrot.slane %v3377_v8, %v7652_v62  ;;  %v2923_v51 = vrot.slane %v2909_v26, %v7652_v62  ;;  %v3733_v38 = vcombine.low %v2993_v34, %v3056_v17  ;;  %v7171_v34 = vld [vmem:[#allocation5 + $0x58] sm:$0xff]  }
 0x251   : > { %v3659_v5 = vrot.slane %v3645_v46, %v7652_v62  ;;  %v7166_v46 = vld [vmem:[#allocation5 + $0x28] sm:$0xff]  }
 0x252   : > { %6968 = vmatpush3.bf16.msra.mxu1 %v7152_v32  ;;  %v3393_v14 = vcombine.low %v3385_v63, %v3392_v7  ;;  %v3644_v33 = vcombine.low %v2924_v25, %v2923_v51  ;;  %v3064_v32 = vcombine.high %v3056_v17, %v3056_v17  ;;  %v3741_v27 = vrot.slane %v3733_v38, %v7652_v62  ;;  %v7165_v17 = vld [vmem:[#allocation5 + $0x68] sm:$0xff]  }
 0x253   : > { %6783 = vmatprep.subr.bf16.mxu1 %v7159_v20  ;;  %v7186_v20 = vld [vmem:[#allocation5 + $0x1f8] sm:$0xff]  }
 0x254   : > { %4463 = vmatmul.mubr.bf16.gmra.mxu1 %v3640_v48  ;;  %4544 = vmatmul.mubr.bf16.gmra.mxu0 %v3642_v37  ;;  %v3652_v41 = vrot.slane %v3644_v33, %v7652_v62  ;;  %v3734_v50 = vcombine.low %v3064_v32, %v3063_v40  ;;  %v7156_v48 = vld [vmem:[#allocation5 + $0xb0] sm:$0xff]   ;;  %v7167_v33 = vld [vmem:[#allocation5 + $0xd8] sm:$0xff]   ;;  %v7169_v40 = vld [vmem:[#allocation5 + $0x60] sm:$0xff]  }
 0x255   : > { %4470 = vmatprep.mubr.bf16.mxu1 %v3730_v29  ;;  %4551 = vmatprep.mubr.bf16.mxu0 %v3732_v45  ;;  %v7157_v29 = vld [vmem:[#allocation5 + $0xe8] sm:$0xff]  }
 0x256   : > { %v3660_v0 = vcombine.low %v3652_v41, %v3659_v5  ;;  %v3748_v16 = vrot.slane %v3734_v50, %v7652_v62  ;;  %6808 = vmatpush3.bf16.msra.mxu0 %v7156_v48  ;;  %v7170_v41 = vld [vmem:[#allocation5 + $0x20] sm:$0xff]   ;;  %v7172_v50 = vld [vmem:[#allocation5 + $0xd0] sm:$0xff]   ;;  %v7177_v48 = vld [vmem:[#allocation5 + $0xc8] sm:$0xff]  }
 0x257   : > { %6809 = vmatprep.subr.bf16.mxu0 %v7157_v29  ;;  %v7176_v29 = vld [vmem:[#allocation5 + $0x10] sm:$0xff]  }
 0x258   : > { %v3749_v30 = vcombine.low %v3741_v27, %v3748_v16  ;;  %v7173_v27 = vld [vmem:[#allocation5 + $0x18] sm:$0xff]  }
 0x25a   : > { %6810 = vmatpush3.bf16.msra.mxu0 %v7158_v22  ;;  %v7181_v22 = vld [vmem:[#allocation5 + $0x40] sm:$0xff]  }
 0x25b   : > { %6811 = vmatprep.subr.bf16.mxu0 %v7162_v21 }
 0x25c   : > { %4471 = vmatmul.mubr.bf16.gmra.mxu1 %v3729_v53  ;;  %4552 = vmatmul.mubr.bf16.gmra.mxu0 %v3731_v54 }
 0x25d   : > { %6969 = vmatprep.mubr.bf16.mxu1 %v3304_v24 }
 0x25e   : > { %6812 = vmatpush3.bf16.msra.mxu0 %v7164_v6 }
 0x25f   : > { %6813 = vmatprep.subr.bf16.mxu0 %v7167_v33 }
 0x262   : > { %6814 = vmatpush3.bf16.msra.mxu0 %v7168_v19 }
 0x263   : > { %6815 = vmatprep.subr.bf16.mxu0 %v7172_v50 }
 0x264   : > { %6970 = vmatmul.mubr.bf16.vlgmr.msra.gmra.mxu1 %v3393_v14  ;;  %v7163_v14 = vld [vmem:[#allocation5 + $0x30] sm:$0xff]  }
 0x265   : > { %6973 = vmatprep.mubr.bf16.mxu1 %v3482_v18  ;;  %6784 = vmatpush3.bf16.msra.mxu1 %v7160_v35 }
 0x266   : > { %6785 = vmatprep.subr.bf16.mxu1 %v7161_v57 }
 0x269   : > { %6786 = vmatpush3.bf16.msra.mxu1 %v7163_v14 }
 0x26a   : > { %6787 = vmatprep.subr.bf16.mxu1 %v7165_v17 }
 0x26c   : > { %6974 = vmatmul.mubr.bf16.gmra.mxu1 %v8514_v49 }
 0x26d   : > { %6977 = vmatprep.mubr.bf16.mxu1 %v3660_v0  ;;  %6788 = vmatpush3.bf16.msra.mxu1 %v7166_v46  ;;  %v7174_v0 = vld [vmem:[#allocation5 + $0x90] sm:$0xff]  }
 0x26e   : > { %6789 = vmatprep.subr.bf16.mxu1 %v7169_v40  ;;  %6816 = vmatpush3.bf16.msra.mxu0 %v7174_v0 }
 0x26f   : > { %6817 = vmatprep.subr.bf16.mxu0 %v7177_v48 }
 0x271   : > { %6790 = vmatpush3.bf16.msra.mxu1 %v7170_v41 }
 0x272   : > { %6791 = vmatprep.subr.bf16.mxu1 %v7171_v34 }
 0x274   : > { %6978 = vmatmul.mubr.bf16.gmra.mxu1 %v3749_v30 }
 0x275   : > { %6792 = vmatpush3.bf16.msra.mxu1 %v7173_v27 }
 0x276   : > { %6793 = vmatprep.subr.bf16.mxu1 %v7175_v10 }
 0x279   : > { %6794 = vmatpush3.bf16.msra.mxu1 %v7176_v29 }
 0x29e   : > { %v6577_v23 = vpop.f32.mrf.mxu1 }
 0x2a0   : > { %v6578_v37 = vpop.f32.mrf.mxu1 }
 0x2a1   : > { %v6579_v60 = vadd.f32 %v6578_v37, %v6577_v23  ;;  %v7178_v37 = vld [vmem:[#allocation5 + $0x88] sm:$0xff]  }
 0x2a2   : > { %v6580_v49 = vpop.f32.mrf.mxu1  ;;  %6818 = vmatpush3.bf16.msra.mxu0 %v7178_v37 }
 0x2a3   : > { %v6629_v62 = vpop.f32.mrf.mxu0  ;;  %v4271_v59 = vadd.f32 %v6579_v60, %v8565_v28 }
 0x2a4   : > { %v6581_v45 = vpop.f32.mrf.mxu1 }
 0x2a5   : > { %v6582_v44 = vadd.f32 %v6581_v45, %v6580_v49  ;;  %v6630_v1 = vpop.f32.mrf.mxu0  ;;  %v7182_v45 = vld [vmem:[#allocation5 + $0xc0] sm:$0xff]  }
 0x2a6   : > { %v6631_v3 = vadd.f32 %v6630_v1, %v6629_v62  ;;  %6819 = vmatprep.subr.bf16.mxu0 %v7182_v45 }
 0x2a7   : > { %v6632_v58 = vpop.f32.mrf.mxu0  ;;  %v4274_v55 = vadd.f32 %v6582_v44, %v8565_v28 }
 0x2a8   : > { %v6583_v43 = vpop.f32.mrf.mxu1  ;;  %v8568_v31 = vadd.f32 %v6631_v3, %v4271_v59  ;;  %v7179_v3 = vld [vmem:[#allocation5 + $0x48] sm:$0xff]  }
 0x2a9   : > { %v6633_v13 = vpop.f32.mrf.mxu0  ;;  %6795 = vmatprep.subr.bf16.mxu1 %v7179_v3 }
 0x2aa   : > { %v6584_v36 = vpop.f32.mrf.mxu1  ;;  %v6634_v54 = vadd.f32 %v6633_v13, %v6632_v58 }
 0x2ab   : > { %v6585_v53 = vadd.f32 %v6584_v36, %v6583_v43  ;;  %v6635_v24 = vpop.f32.mrf.mxu0  ;;  %v7184_v43 = vld [vmem:[#allocation5 + $0x80] sm:$0xff]   ;;  %v7180_v36 = vld [vmem:[#allocation5 + $0x8] sm:$0xff]  }
 0x2ac   : > { %v6586_v39 = vpop.f32.mrf.mxu1  ;;  %v8571_v47 = vadd.f32 %v6634_v54, %v4274_v55  ;;  %6820 = vmatpush3.bf16.msra.mxu0 %v7184_v43  ;;  %6796 = vmatpush3.bf16.msra.mxu1 %v7180_v36  ;;  %v7183_v55 = vld [vmem:[#allocation5] sm:$0xff]  }
 0x2ad   : > { %v6636_v8 = vpop.f32.mrf.mxu0  ;;  %v4279_v52 = vadd.f32 %v6585_v53, %v8565_v28  ;;  %6797 = vmatprep.subr.bf16.mxu1 %v7181_v22  ;;  %v7185_v53 = vld [vmem:[#allocation5 + $0x178] sm:$0xff]   ;;  %6849 = vmatprep.subr.bf16.mxu0 %v7186_v20 }
 0x2ae   : > { %v6587_v56 = vpop.f32.mrf.mxu1  ;;  %v6637_v7 = vadd.f32 %v6636_v8, %v6635_v24 }
 0x2af   : > { %v6588_v26 = vadd.f32 %v6587_v56, %v6586_v39  ;;  %v6638_v42 = vpop.f32.mrf.mxu0 }
 0x2b0   : > { %v8574_v63 = vadd.f32 %v6637_v7, %v4279_v52  ;;  %6798 = vmatpush3.bf16.msra.mxu1 %v7183_v55 }
 0x2b1   : > { %v6639_v15 = vpop.f32.mrf.mxu0  ;;  %v4282_v51 = vadd.f32 %v6588_v26, %v8565_v28  ;;  %6827 = vmatprep.subr.bf16.mxu1 %v7185_v53 }
 0x2b2   : > { %v6640_v25 = vadd.f32 %v6639_v15, %v6638_v42 }
 0x2b4   : > { %v8577_v18 = vadd.f32 %v6640_v25, %v4282_v51 }
 0x2be   : > { %v6589_v32 = vpop.f32.mrf.mxu1  ;;  %v6641_v5 = vpop.f32.mrf.mxu0 }
 0x2c0   : > { %v6590_v38 = vpop.f32.mrf.mxu1  ;;  %v6642_v16 = vpop.f32.mrf.mxu0 }
 0x2c1   : > { %v6591_v30 = vadd.f32 %v6590_v38, %v6589_v32  ;;  %v6643_v61 = vadd.f32 %v6642_v16, %v6641_v5 }
 0x2c2   : > { %v6592_v4 = vpop.f32.mrf.mxu1  ;;  %v6644_v23 = vpop.f32.mrf.mxu0 }
 0x2c3   : > { %v4287_v60 = vadd.f32 %v6591_v30, %v8565_v28 }
 0x2c4   : > { %v6593_v49 = vpop.f32.mrf.mxu1  ;;  %v6645_v62 = vpop.f32.mrf.mxu0 }
 0x2c5   : > { %v8580_v44 = vadd.f32 %v6643_v61, %v4287_v60  ;;  %v6594_v1 = vadd.f32 %v6593_v49, %v6592_v4  ;;  %v6646_v59 = vadd.f32 %v6645_v62, %v6644_v23 }
 0x2c7   : > { %v4290_v58 = vadd.f32 %v6594_v1, %v8565_v28 }
 0x2c9   : > { %v8583_v13 = vadd.f32 %v6646_v59, %v4290_v58 }
 0x2cb   : > { %9218 = vst [vmem:[#allocation19_spill] sm:$0xff] %v8583_v13 }
 0x2ce   : > { %v6595_v54 = vpop.f32.mrf.mxu1 }
 0x2d0   : > { %v6596_v39 = vpop.f32.mrf.mxu1 }
 0x2d1   : > { %v8585_v24 = vadd.f32 %v6596_v39, %v6595_v54  ;;  %v8587_v35 = vpop.f32.mrf.mxu0 }
 0x2d2   : > { %v6598_v56 = vpop.f32.mrf.mxu1 }
 0x2d3   : > { %v8589_v8 = vpop.f32.mrf.mxu0 }
 0x2d4   : > { %v6599_v52 = vpop.f32.mrf.mxu1  ;;  %v6649_v11 = vadd.f32 %v8589_v8, %v8587_v35 }
 0x2d5   : > { %v8591_v26 = vadd.f32 %v6599_v52, %v6598_v56  ;;  %v8593_v7 = vpop.f32.mrf.mxu0 }
 0x2d6   : > { %v6601_v42 = vpop.f32.mrf.mxu1 }
 0x2d7   : > { %v6651_v57 = vpop.f32.mrf.mxu0 }
 0x2d8   : > { %v6602_v21 = vpop.f32.mrf.mxu1  ;;  %v6652_v9 = vadd.f32 %v6651_v57, %v8593_v7 }
 0x2d9   : > { %v6603_v15 = vadd.f32 %v6602_v21, %v6601_v42  ;;  %v6653_v25 = vpop.f32.mrf.mxu0 }
 0x2da   : > { %v6604_v51 = vpop.f32.mrf.mxu1 }
 0x2db   : > { %v6654_v6 = vpop.f32.mrf.mxu0  ;;  %v4303_v17 = vadd.f32 %v6603_v15, %v8565_v28 }
 0x2dc   : > { %v6605_v14 = vpop.f32.mrf.mxu1  ;;  %v6655_v33 = vadd.f32 %v6654_v6, %v6653_v25 }
 0x2dd   : > { %v6606_v46 = vadd.f32 %v6605_v14, %v6604_v51  ;;  %v6656_v40 = vpop.f32.mrf.mxu0 }
 0x2de   : > { %v8596_v19 = vadd.f32 %v6655_v33, %v4303_v17 }
 0x2df   : > { %v6657_v32 = vpop.f32.mrf.mxu0 }
 0x2e0   : > { %9219 = vst [vmem:[#allocation20_spill] sm:$0xff] %v8596_v19  ;;  %v6658_v2 = vadd.f32 %v6657_v32, %v6656_v40 }
 0x2ec   : > { %v6607_v5 = vpop.f32.mrf.mxu1  ;;  %v6659_v41 = vpop.f32.mrf.mxu0 }
 0x2ee   : > { %v6608_v34 = vpop.f32.mrf.mxu1  ;;  %v6660_v50 = vpop.f32.mrf.mxu0 }
 0x2ef   : > { %v6609_v0 = vadd.f32 %v6608_v34, %v6607_v5 }
 0x2f0   : > { %v6610_v38 = vpop.f32.mrf.mxu1  ;;  %v8598_v16 = vpop.f32.mrf.mxu0 }
 0x2f2   : > { %v6611_v27 = vpop.f32.mrf.mxu1  ;;  %v6663_v30 = vpop.f32.mrf.mxu0 }
 0x2f3   : > { %v6612_v61 = vadd.f32 %v6611_v27, %v6610_v38 }
 0x2f4   : > { %v6681_v10 = vpop.f32.mrf.mxu1  ;;  %v6733_v4 = vpop.f32.mrf.mxu0 }
 0x2f6   : > { %v6682_v23 = vpop.f32.mrf.mxu1  ;;  %v6734_v48 = vpop.f32.mrf.mxu0 }
 0x2f8   : > { %v6684_v37 = vpop.f32.mrf.mxu1  ;;  %v6736_v60 = vpop.f32.mrf.mxu0 }
 0x2fa   : > { %v6685_v49 = vpop.f32.mrf.mxu1  ;;  %v6737_v62 = vpop.f32.mrf.mxu0 }
 0x2fc   : > { %v6687_v29 = vpop.f32.mrf.mxu1  ;;  %v6739_v45 = vpop.f32.mrf.mxu0 }
 0x2fe   : > { %v6688_v1 = vpop.f32.mrf.mxu1  ;;  %v6740_v59 = vpop.f32.mrf.mxu0 }
 0x300   : > { %v6690_v3 = vpop.f32.mrf.mxu1  ;;  %v6742_v43 = vpop.f32.mrf.mxu0 }
 0x302   : > { %v6691_v58 = vpop.f32.mrf.mxu1  ;;  %v6743_v36 = vpop.f32.mrf.mxu0 }
 0x303   : > { %v6692_v35 = vadd.f32 %v6691_v58, %v6690_v3 }
 0x304   : > { %v6693_v22 = vpop.f32.mrf.mxu1  ;;  %v8600_v20 = vpop.f32.mrf.mxu0 }
 0x305   : > { %9220 = vst [vmem:[#allocation21_spill] sm:$0xff] %v8600_v20 }
 0x306   : > { %v6694_v55 = vpop.f32.mrf.mxu1  ;;  %v6746_v53 = vpop.f32.mrf.mxu0 }
 0x307   : > { %v6695_v8 = vadd.f32 %v6694_v55, %v6693_v22 }
 0x308   : > { %v6696_v54 = vpop.f32.mrf.mxu1  ;;  %v8602_v39 = vpop.f32.mrf.mxu0 }
 0x309   : > { %9221 = vst [vmem:[#allocation22_spill] sm:$0xff] %v8602_v39  ;;  %v6689_v39 = vadd.f32 %v6688_v1, %v6687_v29 }
 0x30a   : > { %v6697_v56 = vpop.f32.mrf.mxu1  ;;  %v8604_v52 = vpop.f32.mrf.mxu0 }
 0x30b   : > { %9222 = vst [vmem:[#allocation23_spill] sm:$0xff] %v8604_v52  ;;  %v6686_v52 = vadd.f32 %v6685_v49, %v6684_v37  ;;  %v4441_v37 = vadd.f32 %v6689_v39, %v8574_v63  ;;  %v4444_v49 = vadd.f32 %v6692_v35, %v8577_v18 }
 0x30c   : > { %v6699_v42 = vpop.f32.mrf.mxu1  ;;  %v8606_v21 = vpop.f32.mrf.mxu0  ;;  %v9230_v29 = vld [vmem:[#allocation21_spill] sm:$0xff] }
 0x30d   : > { %9223 = vst [vmem:[#allocation24_spill] sm:$0xff] %v8606_v21  ;;  %v6747_v1 = vadd.f32 %v6746_v53, %v9230_v29 }
 0x30e   : > { %v6700_v15 = vpop.f32.mrf.mxu1  ;;  %v8608_v51 = vpop.f32.mrf.mxu0 }
 0x30f   : > { %9224 = vst [vmem:[#allocation25_spill] sm:$0xff] %v8608_v51  ;;  %v4306_v51 = vadd.f32 %v6606_v46, %v8565_v28 }
 0x310   : > { %v6702_v25 = vpop.f32.mrf.mxu1  ;;  %v8610_v14 = vpop.f32.mrf.mxu0  ;;  %v9232_v58 = vld [vmem:[#allocation22_spill] sm:$0xff] }
 0x311   : > { %9225 = vst [vmem:[#allocation26_spill] sm:$0xff] %v8610_v14  ;;  %v4311_v14 = vadd.f32 %v6609_v0, %v8565_v28  ;;  %v4387_v0 = vadd.f32 %v6658_v2, %v4306_v51  ;;  %v4449_v2 = vadd.f32 %v6695_v8, %v8580_v44 }
 0x312   : > { %v6703_v6 = vpop.f32.mrf.mxu1  ;;  %v8612_v17 = vpop.f32.mrf.mxu0  ;;  %v9233_v22 = vld [vmem:[#allocation23_spill] sm:$0xff] }
 0x313   : > { %9226 = vst [vmem:[#allocation27_spill] sm:$0xff] %v8612_v17  ;;  %v4295_v17 = vadd.f32 %v8585_v24, %v8565_v28  ;;  %v4314_v24 = vadd.f32 %v6612_v61, %v8565_v28  ;;  %v6744_v61 = vadd.f32 %v6743_v36, %v6742_v43  ;;  %v6750_v55 = vadd.f32 %v9233_v22, %v9232_v58 }
 0x314   : > { %v6705_v33 = vpop.f32.mrf.mxu1  ;;  %v8614_v5 = vpop.f32.mrf.mxu0 }
 0x315   : > { %9227 = vst [vmem:[#allocation28_spill] sm:$0xff] %v8614_v5  ;;  %v4298_v5 = vadd.f32 %v8591_v26, %v8565_v28  ;;  %v4376_v40 = vadd.f32 %v6649_v11, %v4295_v17  ;;  %v6664_v26 = vadd.f32 %v6663_v30, %v8598_v16  ;;  %v6741_v11 = vadd.f32 %v6740_v59, %v6739_v45  ;;  %v9231_v59 = vld [vmem:[#allocation19_spill] sm:$0xff] }
 0x316   : > { %v6706_v34 = vpop.f32.mrf.mxu1  ;;  %v8616_v38 = vpop.f32.mrf.mxu0  ;;  %v6704_v16 = vadd.f32 %v6703_v6, %v6702_v25  ;;  %v4525_v18 = vadd.f32 %v6744_v61, %v4444_v49  ;;  %v9236_v51 = vld [vmem:[#allocation25_spill] sm:$0xff] }
 0x317   : > { %9228 = vst [vmem:[#allocation29_spill] sm:$0xff] %v8616_v38  ;;  %v6683_v38 = vadd.f32 %v6682_v23, %v6681_v10  ;;  %v4379_v32 = vadd.f32 %v6652_v9, %v4298_v5  ;;  %v6735_v10 = vadd.f32 %v6734_v48, %v6733_v4  ;;  %v6698_v9 = vadd.f32 %v6697_v56, %v6696_v54  ;;  %v9234_v56 = vld [vmem:[#allocation20_spill] sm:$0xff] }
 0x318   : > { %v6708_v27 = vpop.f32.mrf.mxu1  ;;  %v8618_v12 = vpop.f32.mrf.mxu0  ;;  %v6707_v30 = vadd.f32 %v6706_v34, %v6705_v33  ;;  %v4395_v48 = vadd.f32 %v6664_v26, %v4314_v24  ;;  %v4522_v3 = vadd.f32 %v6741_v11, %v4441_v37  ;;  %v4530_v54 = vadd.f32 %v6747_v1, %v4449_v2 }
 0x319   : > { %9229 = vst [vmem:[#allocation30_spill] sm:$0xff] %v8618_v12  ;;  %v6661_v12 = vadd.f32 %v6660_v50, %v6659_v41  ;;  %v4433_v46 = vadd.f32 %v6683_v38, %v8568_v31  ;;  %v4436_v41 = vadd.f32 %v6686_v52, %v8571_v47  ;;  %v6738_v50 = vadd.f32 %v6737_v62, %v6736_v60 }
 0x31a   : > { %v6709_v21 = vpop.f32.mrf.mxu1  ;;  %v6761_v19 = vpop.f32.mrf.mxu0  ;;  %v4452_v44 = vadd.f32 %v6698_v9, %v9231_v59  ;;  %v4460_v39 = vadd.f32 %v6704_v16, %v4379_v32  ;;  %v4465_v52 = vadd.f32 %v6707_v30, %v9234_v56  ;;  %v9238_v6 = vld [vmem:[#allocation27_spill] sm:$0xff]  ;;  %v9243_v9 = vld [vmem:[#allocation16_spill] sm:$0xff]  ;;  %v9245_v16 = vld [vmem:[#allocation18_spill] sm:$0xff] }
 0x31b   : > { %v4392_v13 = vadd.f32 %v6661_v12, %v4311_v14  ;;  %v6701_v12 = vadd.f32 %v6700_v15, %v6699_v42  ;;  %v6710_v31 = vadd.f32 %v6709_v21, %v6708_v27  ;;  %v4514_v62 = vadd.f32 %v6735_v10, %v4433_v46  ;;  %v9235_v15 = vld [vmem:[#allocation24_spill] sm:$0xff]  ;;  %v9237_v14 = vld [vmem:[#allocation26_spill] sm:$0xff] }
 0x31c   : > { %v6711_v7 = vpop.f32.mrf.mxu1  ;;  %v6763_v57 = vpop.f32.mrf.mxu0  ;;  %v4517_v45 = vadd.f32 %v6738_v50, %v4436_v41  ;;  %v6753_v25 = vadd.f32 %v9236_v51, %v9235_v15  ;;  %v6756_v17 = vadd.f32 %v9238_v6, %v9237_v14  ;;  %v9239_v38 = vld [vmem:[#allocation28_spill] sm:$0xff]  ;;  %v8650_v10 = vadd.f32 %v6750_v55, %v4452_v44 }
 0x31d   : > { %v4457_v43 = vadd.f32 %v6701_v12, %v4376_v40  ;;  %v4468_v42 = vadd.f32 %v6710_v31, %v4387_v0 }
 0x31e   : > { %v6712_v23 = vpop.f32.mrf.mxu1  ;;  %v6764_v20 = vpop.f32.mrf.mxu0  ;;  %v9240_v27 = vld [vmem:[#allocation29_spill] sm:$0xff] }
 0x31f   : > { %v6713_v47 = vadd.f32 %v6712_v23, %v6711_v7  ;;  %v6759_v35 = vadd.f32 %v9240_v27, %v9239_v38  ;;  %v6765_v0 = vadd.f32 %v6764_v20, %v6763_v57  ;;  %v4538_v46 = vadd.f32 %v6753_v25, %v4457_v43  ;;  %v9242_v57 = vld [vmem:[#allocation15_spill] sm:$0xff] }
 0x320   : > { %v6714_v28 = vpop.f32.mrf.mxu1  ;;  %v6766_v4 = vpop.f32.mrf.mxu0  ;;  %v9241_v8 = vld [vmem:[#allocation30_spill] sm:$0xff] }
 0x321   : > { %v4473_v33 = vadd.f32 %v6713_v47, %v4392_v13  ;;  %v6762_v7 = vadd.f32 %v6761_v19, %v9241_v8  ;;  %v4541_v13 = vadd.f32 %v6756_v17, %v4460_v39  ;;  %v8656_v41 = vadd.f32 %v6759_v35, %v4465_v52 }
 0x322   : > { %v6715_v60 = vpop.f32.mrf.mxu1  ;;  %v6767_v53 = vpop.f32.mrf.mxu0 }
 0x323   : > { %v6716_v63 = vadd.f32 %v6715_v60, %v6714_v28  ;;  %v6768_v24 = vadd.f32 %v6767_v53, %v6766_v4  ;;  %v8658_v50 = vadd.f32 %v6762_v7, %v4468_v42  ;;  %v4554_v11 = vadd.f32 %v6765_v0, %v4473_v33  ;;  %v9244_v28 = vld [vmem:[#allocation17_spill] sm:$0xff] }
 0x324   : > { %v6971_v36 = vpop.f32.mrf.mxu1 }
 0x325   : > { %v4603_v21 = vadd.f32 %v6971_v36, %v4522_v3  ;;  %v4476_v5 = vadd.f32 %v6716_v63, %v4395_v48 }
 0x326   : > { %v4594_v34 = vpop.f32.mrf.mxu1 }
 0x327   : > { %v8648_v40 = vmax.f32 %v4603_v21, 0.0  ;;  %v4595_v32 = vadd.f32 %v4594_v34, %v4514_v62  ;;  %v8662_v20 = vadd.f32 %v6768_v24, %v4476_v5 }
 0x328   : > { %v6972_v26 = vpop.f32.mrf.mxu1 }
 0x329   : > { %v8654_v23 = vcombine.high %v8648_v40, %v8648_v40  ;;  %v8660_v37 = vmax.f32 %v4595_v32, 0.0  ;;  %v4606_v19 = vadd.f32 %v6972_v26, %v4525_v18  ;;  %v4891_v12 = vrot.slane %v8648_v40, %v9243_v9 }
 0x32a   : > { %v4597_v49 = vpop.f32.mrf.mxu1  ;;  %v4971_v30 = vrot.slane %v8648_v40, %v9245_v16 }
 0x32b   : > { %v5011_v31 = vrot.slane %v8654_v23, %v9242_v57  ;;  %v5091_v48 = vrot.slane %v8654_v23, %v9244_v28  ;;  %v8680_v29 = vcombine.high %v8660_v37, %v8660_v37  ;;  %v8684_v60 = vmax.f32 %v4606_v19, 0.0 }
 0x32c   : > { %v6975_v1 = vpop.f32.mrf.mxu1  ;;  %v4598_v62 = vadd.f32 %v4597_v49, %v4517_v45  ;;  %v4680_v3 = vrot.slane %v8660_v37, %v9242_v57  ;;  %v4727_v18 = vrot.slane %v8660_v37, %v9243_v9  ;;  %v4767_v59 = vrot.slane %v8660_v37, %v9244_v28 }
 0x32d   : > { %v4619_v63 = vadd.f32 %v6975_v1, %v4538_v46  ;;  %v4807_v44 = vrot.slane %v8660_v37, %v9245_v16  ;;  %v4887_v45 = vrot.slane %v8680_v29, %v9243_v9  ;;  %v8702_v43 = vcombine.high %v8684_v60, %v8684_v60 }
 0x32e   : > { %v4610_v58 = vpop.f32.mrf.mxu1  ;;  %v4967_v36 = vrot.slane %v8680_v29, %v9245_v16  ;;  %v4688_v39 = vrot.slane %v8684_v60, %v9242_v57  ;;  %v4735_v56 = vrot.slane %v8684_v60, %v9243_v9  ;;  %v8710_v52 = vmax.f32 %v4598_v62, 0.0 }
 0x32f   : > { %v4775_v53 = vrot.slane %v8684_v60, %v9244_v28  ;;  %v4815_v21 = vrot.slane %v8684_v60, %v9245_v16  ;;  %v8716_v15 = vmax.f32 %v4619_v63, 0.0  ;;  %v4611_v51 = vadd.f32 %v4610_v58, %v4530_v54 }
 0x330   : > { %v6976_v42 = vpop.f32.mrf.mxu1  ;;  %v8720_v25 = vcombine.high %v8710_v52, %v8710_v52  ;;  %v5007_v14 = vrot.slane %v8710_v52, %v9242_v57  ;;  %v5087_v6 = vrot.slane %v8710_v52, %v9244_v28  ;;  %v4895_v38 = vrot.slane %v8702_v43, %v9243_v9 }
 0x331   : > { %v4622_v17 = vadd.f32 %v6976_v42, %v4541_v13  ;;  %v8746_v26 = vcombine.high %v8716_v15, %v8716_v15  ;;  %v4696_v46 = vrot.slane %v8716_v15, %v9242_v57  ;;  %v4743_v13 = vrot.slane %v8716_v15, %v9243_v9 }
 0x332   : > { %v4613_v33 = vpop.f32.mrf.mxu1  ;;  %v4684_v27 = vrot.slane %v8720_v25, %v9242_v57  ;;  %v4731_v35 = vrot.slane %v8720_v25, %v9243_v9  ;;  %v4811_v8 = vrot.slane %v8720_v25, %v9245_v16  ;;  %v5036_v0 = vsel %vm4709_vm12, %v5011_v31, %v5007_v14 }
 0x333   : > { %v5116_v24 = vsel %vm4709_vm12, %v5091_v48, %v5087_v6  ;;  %v8752_v19 = vmax.f32 %v4611_v51, 0.0  ;;  %v8754_v49 = vmax.f32 %v4622_v17, 0.0  ;;  %v4614_v1 = vadd.f32 %v4613_v33, %v8650_v10 }
 0x334   : > { %v6979_v32 = vpop.f32.mrf.mxu1  ;;  %v4756_v48 = vsel %vm4709_vm12, %v4731_v35, %v4727_v18  ;;  %v4836_v63 = vsel %vm4709_vm12, %v4811_v8, %v4807_v44  ;;  %v8760_v58 = vsel %vm4709_vm12, %v4684_v27, %v4680_v3  ;;  %v4771_v18 = vrot.slane %v8720_v25, %v9244_v28 }
 0x335   : > { %v4635_v31 = vadd.f32 %v6979_v32, %v4554_v11  ;;  %v8764_v42 = vcombine.high %v8752_v19, %v8752_v19  ;;  %v5015_v51 = vrot.slane %v8752_v19, %v9242_v57  ;;  %v5095_v10 = vrot.slane %v8752_v19, %v9244_v28 }
 0x336   : > { %v4626_v62 = vpop.f32.mrf.mxu1  ;;  %v4783_v3 = vrot.slane %v8716_v15, %v9244_v28  ;;  %v4823_v44 = vrot.slane %v8716_v15, %v9245_v16  ;;  %v8789_v27 = vcombine.high %v8754_v49, %v8754_v49  ;;  %v4903_v60 = vrot.slane %v8746_v26, %v9243_v9 }
 0x337   : > { %v4627_v14 = vadd.f32 %v4626_v62, %v8656_v41  ;;  %v8780_v17 = vsel %vm4711_vm13, %v5015_v51, %v5036_v0  ;;  %v8783_v41 = vsel %vm4711_vm13, %v5095_v10, %v5116_v24  ;;  %v8795_v0 = vmax.f32 %v4614_v1, 0.0 }
 0x338   : > { %v6980_v11 = vpop.f32.mrf.mxu1  ;;  %v8797_v62 = vmax.f32 %v4635_v31, 0.0  ;;  %v4692_v24 = vrot.slane %v8764_v42, %v9242_v57  ;;  %v4779_v8 = vrot.slane %v8764_v42, %v9244_v28  ;;  %v4739_v31 = vrot.slane %v8764_v42, %v9243_v9 }
 0x339   : > { %v8801_v51 = vmax.f32 %v4627_v14, 0.0  ;;  %v4638_v10 = vadd.f32 %v6980_v11, %v8662_v20  ;;  %v8811_v1 = vcombine.high %v8795_v0, %v8795_v0  ;;  %v4899_v20 = vrot.slane %v8795_v0, %v9243_v9 }
 0x33a   : > { %v4629_v35 = vpop.f32.mrf.mxu1  ;;  %v8823_v11 = vcombine.high %v8797_v62, %v8797_v62  ;;  %v4747_v54 = vrot.slane %v8789_v27, %v9243_v9  ;;  %v4819_v6 = vrot.slane %v8764_v42, %v9245_v16  ;;  %v4837_v42 = vsel %vm4711_vm13, %v4815_v21, %v4836_v63 }
 0x33b   : > { %v4630_v33 = vadd.f32 %v4629_v35, %v8658_v50  ;;  %v4979_v35 = vrot.slane %v8795_v0, %v9245_v16  ;;  %v8831_v47 = vcombine.high %v8801_v51, %v8801_v51  ;;  %v8833_v7 = vmax.f32 %v4638_v10, 0.0 }
 0x33c   : > { %v4757_v50 = vsel %vm4711_vm13, %v4735_v56, %v4756_v48  ;;  %v4755_v34 = vrot.slane %v8823_v11, %v9243_v9  ;;  %v4827_v56 = vrot.slane %v8789_v27, %v9245_v16  ;;  %v4838_v5 = vsel %vm4713_vm14, %v4819_v6, %v4837_v42 }
 0x33d   : > { %v4650_v4 = vmax.f32 %v4630_v33, 0.0  ;;  %v4758_v10 = vsel %vm4713_vm14, %v4739_v31, %v4757_v50  ;;  %v8852_v33 = vcombine.high %v8833_v7, %v8833_v7  ;;  %v4700_v2 = vrot.slane %v8789_v27, %v9242_v57 }
 0x33e   : > { %v4759_v32 = vsel %vm4715_vm15, %v4743_v13, %v4758_v10  ;;  %v4835_v13 = vrot.slane %v8823_v11, %v9245_v16  ;;  %v4839_v10 = vsel %vm4715_vm15, %v4823_v44, %v4838_v5  ;;  %v4795_v25 = vrot.slane %v8823_v11, %v9244_v28 }
 0x33f   : > { %v8854_v61 = vcombine.high %v4650_v4, %v4650_v4  ;;  %v4751_v55 = vrot.slane %v4650_v4, %v9243_v9  ;;  %v4704_v48 = vrot.slane %v4650_v4, %v9242_v57  ;;  %v4831_v31 = vrot.slane %v4650_v4, %v9245_v16 }
 0x340   : > { %v4791_v50 = vrot.slane %v4650_v4, %v9244_v28  ;;  %v4760_v14 = vsel %vm4717_vm0, %v4747_v54, %v4759_v32  ;;  %v4712_v4 = vsel %vm4711_vm13, %v4688_v39, %v8760_v58  ;;  %v4840_v54 = vsel %vm4717_vm0, %v4827_v56, %v4839_v10 }
 0x341   : > { %v4761_v22 = vsel %vm4719_vm1, %v4751_v55, %v4760_v14  ;;  %v4714_v63 = vsel %vm4713_vm14, %v4692_v24, %v4712_v4  ;;  %v4787_v55 = vrot.slane %v8789_v27, %v9244_v28  ;;  %v4841_v32 = vsel %vm4719_vm1, %v4831_v31, %v4840_v54  ;;  %v7187_v27 = vld [vmem:[#allocation5 + $0x138] sm:$0xff]   ;;  %v7191_v54 = vld [vmem:[#allocation5 + $0x130] sm:$0xff]  }
 0x342   : > { %v4762_v21 = vsel %vm4721_vm2, %v4755_v34, %v4761_v22  ;;  %v4716_v5 = vsel %vm4715_vm15, %v4696_v46, %v4714_v63  ;;  %v4796_v22 = vsel %vm4709_vm12, %v4771_v18, %v4767_v59  ;;  %v4842_v39 = vsel %vm4721_vm2, %v4835_v13, %v4841_v32  ;;  %v7193_v32 = vld [vmem:[#allocation5 + $0x168] sm:$0xff]  }
 0x343   : > { %v5165_v6 = vpack.c.bf16 %v4762_v21, %v4762_v21  ;;  %v4708_v34 = vrot.slane %v8823_v11, %v9242_v57  ;;  %v4718_v58 = vsel %vm4717_vm0, %v4700_v2, %v4716_v5  ;;  %v4797_v46 = vsel %vm4711_vm13, %v4775_v53, %v4796_v22  ;;  %v7190_v21 = vld [vmem:[#allocation5 + $0x1f0] sm:$0xff]  }
 0x344   : > { %v5167_v44 = vpack.c.bf16 %v4842_v39, %v4842_v39  ;;  %v4720_v37 = vsel %vm4719_vm1, %v4704_v48, %v4718_v58  ;;  %v4798_v59 = vsel %vm4713_vm14, %v4779_v8, %v4797_v46  ;;  %v4907_v53 = vrot.slane %v8801_v51, %v9243_v9  ;;  %v7189_v8 = vld [vmem:[#allocation5 + $0x170] sm:$0xff]  }
 0x345   : > { %5983 = vmatprep.mubr.bf16.mxu1 %v5165_v6  ;;  %v4722_v18 = vsel %vm4721_vm2, %v4708_v34, %v4720_v37  ;;  %v4799_v2 = vsel %vm4715_vm15, %v4783_v3, %v4798_v59  ;;  %v4916_v15 = vsel %vm4709_vm12, %v4891_v12, %v4887_v45  ;;  %v4975_v3 = vrot.slane %v8702_v43, %v9245_v16  ;;  %v7188_v45 = vld [vmem:[#allocation5 + $0x1b8] sm:$0xff]   ;;  %v7192_v37 = vld [vmem:[#allocation5 + $0x1b0] sm:$0xff]  }
 0x346   : > { %6023 = vmatprep.mubr.bf16.mxu0 %v5167_v44  ;;  %v5164_v24 = vpack.c.bf16 %v4722_v18, %v4722_v18  ;;  %v4800_v14 = vsel %vm4717_vm0, %v4787_v55, %v4799_v2  ;;  %v4911_v56 = vrot.slane %v8854_v61, %v9243_v9  ;;  %v4915_v48 = vrot.slane %v8833_v7, %v9243_v9 }
 0x347   : > { %v4801_v11 = vsel %vm4719_vm1, %v4791_v50, %v4800_v14  ;;  %v4917_v31 = vsel %vm4711_vm13, %v4895_v38, %v4916_v15  ;;  %v4983_v50 = vrot.slane %v8746_v26, %v9245_v16  ;;  %v4987_v13 = vrot.slane %v8801_v51, %v9245_v16  ;;  %v7197_v15 = vld [vmem:[#allocation5 + $0x160] sm:$0xff]  }
 0x348   : > { %5984 = vmatmul.mubr.bf16.vlgmr.msra.gmra.mxu1 %v5164_v24  ;;  %v4802_v12 = vsel %vm4721_vm2, %v4795_v25, %v4801_v11  ;;  %v4918_v42 = vsel %vm4713_vm14, %v4899_v20, %v4917_v31  ;;  %v4991_v38 = vrot.slane %v8854_v61, %v9245_v16  ;;  %v4996_v20 = vsel %vm4709_vm12, %v4971_v30, %v4967_v36 }
 0x349   : > { %v5166_v10 = vpack.c.bf16 %v4802_v12, %v4802_v12  ;;  %6828 = vmatpush3.bf16.msra.mxu1 %v7187_v27  ;;  %v4919_v4 = vsel %vm4715_vm15, %v4903_v60, %v4918_v42  ;;  %v4995_v55 = vrot.slane %v8833_v7, %v9245_v16  ;;  %v4997_v6 = vsel %vm4711_vm13, %v4975_v3, %v4996_v20  ;;  %v7194_v27 = vld [vmem:[#allocation5 + $0x1e8] sm:$0xff]   ;;  %v7199_v20 = vld [vmem:[#allocation5 + $0x120] sm:$0xff]  }
 0x34a   : > { %v4920_v63 = vsel %vm4717_vm0, %v4907_v53, %v4919_v4  ;;  %6829 = vmatprep.subr.bf16.mxu1 %v7189_v8  ;;  %v4863_v5 = vrot.slane %v8746_v26, %v9242_v57  ;;  %v4998_v30 = vsel %vm4713_vm14, %v4979_v35, %v4997_v6  ;;  %v4871_v36 = vrot.slane %v8854_v61, %v9242_v57  ;;  %v7195_v60 = vld [vmem:[#allocation5 + $0x128] sm:$0xff]  }
 0x34b   : > { %6024 = vmatmul.mubr.bf16.vlgmr.msra.gmra.mxu0 %v5166_v10  ;;  %v4921_v22 = vsel %vm4719_vm1, %v4911_v56, %v4920_v63  ;;  %v9246_v39 = vrot.slane %v8680_v29, %v9242_v57  ;;  %v9247_v34 = vrot.slane %v8648_v40, %v9242_v57  ;;  %v4999_v44 = vsel %vm4715_vm15, %v4983_v50, %v4998_v30 }
 0x34c   : > { %6850 = vmatpush3.bf16.msra.mxu0 %v7188_v45  ;;  %v4922_v46 = vsel %vm4721_vm2, %v4915_v48, %v4921_v22  ;;  %v4875_v35 = vrot.slane %v8833_v7, %v9242_v57  ;;  %v9248_v25 = vrot.slane %v8702_v43, %v9242_v57  ;;  %v5000_v2 = vsel %vm4717_vm0, %v4987_v13, %v4999_v44 }
 0x34d   : > { %v4876_v58 = vsel %vm4709_vm12, %v9247_v34, %v9246_v39  ;;  %v5169_v18 = vpack.c.bf16 %v4922_v46, %v4922_v46  ;;  %6851 = vmatprep.subr.bf16.mxu0 %v7190_v21  ;;  %6830 = vmatpush3.bf16.msra.mxu1 %v7191_v54  ;;  %v9249_v53 = vrot.slane %v8795_v0, %v9242_v57  ;;  %v7200_v39 = vld [vmem:[#allocation5 + $0x1a0] sm:$0xff]  }
 0x34e   : > { %v4877_v59 = vsel %vm4711_vm13, %v9248_v25, %v4876_v58  ;;  %v5001_v14 = vsel %vm4719_vm1, %v4991_v38, %v5000_v2  ;;  %6831 = vmatprep.subr.bf16.mxu1 %v7193_v32  ;;  %v4943_v8 = vrot.slane %v8746_v26, %v9244_v28  ;;  %v9250_v11 = vrot.slane %v8680_v29, %v9244_v28  ;;  %v7203_v25 = vld [vmem:[#allocation5 + $0x118] sm:$0xff]  }
 0x34f   : > { %v4878_v24 = vsel %vm4713_vm14, %v9249_v53, %v4877_v59  ;;  %v9251_v56 = vrot.slane %v8648_v40, %v9244_v28  ;;  %6063 = vmatprep.mubr.bf16.mxu1 %v5169_v18  ;;  %v5002_v31 = vsel %vm4721_vm2, %v4995_v55, %v5001_v14  ;;  %v9252_v12 = vrot.slane %v8801_v51, %v9242_v57  ;;  %v7196_v40 = vld [vmem:[#allocation5 + $0x1a8] sm:$0xff]   ;;  %v7205_v53 = vld [vmem:[#allocation5 + $0x150] sm:$0xff]  }
 0x350   : > { %v4879_v3 = vsel %vm4715_vm15, %v4863_v5, %v4878_v24  ;;  %v4951_v42 = vrot.slane %v8854_v61, %v9244_v28  ;;  %v9253_v26 = vrot.slane %v8702_v43, %v9244_v28  ;;  %v5171_v50 = vpack.c.bf16 %v5002_v31, %v5002_v31  ;;  %6852 = vmatpush3.bf16.msra.mxu0 %v7192_v37  ;;  %v7198_v61 = vld [vmem:[#allocation5 + $0x1e0] sm:$0xff]  }
 0x351   : > { %v4956_v48 = vsel %vm4709_vm12, %v9251_v56, %v9250_v11  ;;  %v4880_v45 = vsel %vm4717_vm0, %v9252_v12, %v4879_v3  ;;  %v4955_v10 = vrot.slane %v8833_v7, %v9244_v28  ;;  %v9254_v4 = vrot.slane %v8795_v0, %v9244_v28  ;;  %6853 = vmatprep.subr.bf16.mxu0 %v7194_v27  ;;  %v7201_v7 = vld [vmem:[#allocation5 + $0x158] sm:$0xff]  }
 0x352   : > { %v4957_v29 = vsel %vm4711_vm13, %v9253_v26, %v4956_v48  ;;  %v4881_v13 = vsel %vm4719_vm1, %v4871_v36, %v4880_v45  ;;  %6832 = vmatpush3.bf16.msra.mxu1 %v7195_v60  ;;  %v5059_v54 = vrot.slane %v8811_v1, %v9243_v9  ;;  %6103 = vmatprep.mubr.bf16.mxu0 %v5171_v50  ;;  %v7206_v26 = vld [vmem:[#allocation5 + $0x1d0] sm:$0xff]  }
 0x353   : > { %v4958_v38 = vsel %vm4713_vm14, %v9254_v4, %v4957_v29  ;;  %v9019_v43 = vsel %vm4721_vm2, %v4875_v35, %v4881_v13  ;;  %6833 = vmatprep.subr.bf16.mxu1 %v7197_v15  ;;  %v9255_v0 = vrot.slane %v8801_v51, %v9244_v28  ;;  %v5067_v55 = vrot.slane %v8831_v47, %v9243_v9  ;;  %v7202_v35 = vld [vmem:[#allocation5 + $0x1d8] sm:$0xff]   ;;  %v7207_v29 = vld [vmem:[#allocation5 + $0x110] sm:$0xff]  }
 0x354   : > { %v4959_v21 = vsel %vm4715_vm15, %v4943_v8, %v4958_v38  ;;  %v5071_v6 = vrot.slane %v8797_v62, %v9243_v9  ;;  %v5075_v5 = vrot.slane %v8852_v33, %v9243_v9  ;;  %v9256_v22 = vrot.slane %v8710_v52, %v9243_v9  ;;  %6854 = vmatpush3.bf16.msra.mxu0 %v7196_v40 }
 0x355   : > { %v4960_v63 = vsel %vm4717_vm0, %v9255_v0, %v4959_v21  ;;  %v9257_v30 = vrot.slane %v8654_v23, %v9243_v9  ;;  %v5139_v36 = vrot.slane %v8811_v1, %v9245_v16  ;;  %v9258_v58 = vrot.slane %v8752_v19, %v9243_v9  ;;  %6855 = vmatprep.subr.bf16.mxu0 %v7198_v61 }
 0x356   : > { %v4961_v32 = vsel %vm4719_vm1, %v4951_v42, %v4960_v63  ;;  %v5147_v44 = vrot.slane %v8831_v47, %v9245_v16  ;;  %v5151_v37 = vrot.slane %v8797_v62, %v9245_v16  ;;  %6834 = vmatpush3.bf16.msra.mxu1 %v7199_v20  ;;  %v5155_v18 = vrot.slane %v8852_v33, %v9245_v16  ;;  %v7211_v63 = vld [vmem:[#allocation5 + $0x108] sm:$0xff]  }
 0x357   : > { %v5076_v51 = vsel %vm4709_vm12, %v9257_v30, %v9256_v22  ;;  %v9045_v34 = vsel %vm4721_vm2, %v4955_v10, %v4961_v32  ;;  %v9259_v2 = vrot.slane %v8710_v52, %v9245_v16  ;;  %v9260_v27 = vrot.slane %v8654_v23, %v9245_v16  ;;  %6835 = vmatprep.subr.bf16.mxu1 %v7201_v7  ;;  %v7215_v32 = vld [vmem:[#allocation5 + $0x100] sm:$0xff]   ;;  %v7218_v30 = vld [vmem:[#allocation5 + $0x2f8] sm:$0xff]  }
 0x358   : > { %v5077_v46 = vsel %vm4711_vm13, %v9258_v58, %v5076_v51  ;;  %v9261_v24 = vrot.slane %v8754_v49, %v9243_v9  ;;  %v9262_v15 = vrot.slane %v8752_v19, %v9245_v16  ;;  %v5019_v52 = vrot.slane %v8811_v1, %v9242_v57  ;;  %6856 = vmatpush3.bf16.msra.mxu0 %v7200_v39  ;;  %v7204_v19 = vld [vmem:[#allocation5 + $0x198] sm:$0xff]   ;;  %v7216_v22 = vld [vmem:[#allocation5 + $0x180] sm:$0xff]   ;;  %v7221_v39 = vld [vmem:[#allocation5 + $0x270] sm:$0xff]  }
 0x359   : > { %v5078_v59 = vsel %vm4713_vm14, %v5059_v54, %v5077_v46  ;;  %v5156_v60 = vsel %vm4709_vm12, %v9260_v27, %v9259_v2  ;;  %v5027_v23 = vrot.slane %v8831_v47, %v9242_v57  ;;  %v5035_v9 = vrot.slane %v8852_v33, %v9242_v57  ;;  %6857 = vmatprep.subr.bf16.mxu0 %v7202_v35  ;;  %v7208_v54 = vld [vmem:[#allocation5 + $0x190] sm:$0xff]   ;;  %v7219_v51 = vld [vmem:[#allocation5 + $0x238] sm:$0xff]   ;;  %v7227_v2 = vld [vmem:[#allocation5 + $0x228] sm:$0xff]  }
 0x35a   : > { %v5079_v14 = vsel %vm4715_vm15, %v9261_v24, %v5078_v59  ;;  %v5157_v3 = vsel %vm4711_vm13, %v9262_v15, %v5156_v60  ;;  %v5099_v56 = vrot.slane %v8811_v1, %v9244_v28  ;;  %v9263_v31 = vrot.slane %v8754_v49, %v9245_v16  ;;  %6836 = vmatpush3.bf16.msra.mxu1 %v7203_v25  ;;  %v7220_v46 = vld [vmem:[#allocation5 + $0x2b8] sm:$0xff]   ;;  %v7223_v35 = vld [vmem:[#allocation5 + $0x230] sm:$0xff]   ;;  %v7225_v59 = vld [vmem:[#allocation5 + $0x268] sm:$0xff]  }
 0x35b   : > { %v5080_v8 = vsel %vm4717_vm0, %v5067_v55, %v5079_v14  ;;  %v5158_v11 = vsel %vm4713_vm14, %v5139_v36, %v5157_v3  ;;  %v5038_v45 = vsel %vm4713_vm14, %v5019_v52, %v8780_v17  ;;  %v5107_v42 = vrot.slane %v8831_v47, %v9244_v28  ;;  %6837 = vmatprep.subr.bf16.mxu1 %v7205_v53  ;;  %v7209_v17 = vld [vmem:[#allocation5 + $0x148] sm:$0xff]   ;;  %v7229_v27 = vld [vmem:[#allocation5 + $0x260] sm:$0xff]   ;;  %v7233_v24 = vld [vmem:[#allocation5 + $0x258] sm:$0xff]  }
 0x35c   : > { %v5081_v48 = vsel %vm4719_vm1, %v5071_v6, %v5080_v8  ;;  %v5159_v12 = vsel %vm4715_vm15, %v9263_v31, %v5158_v11  ;;  %v9264_v40 = vrot.slane %v8754_v49, %v9242_v57  ;;  %v5103_v13 = vrot.slane %v8754_v49, %v9244_v28  ;;  %6858 = vmatpush3.bf16.msra.mxu0 %v7204_v19  ;;  %v7230_v60 = vld [vmem:[#allocation5 + $0x2e0] sm:$0xff]   ;;  %v7234_v15 = vld [vmem:[#allocation5 + $0x2d8] sm:$0xff]   ;;  %v7237_v52 = vld [vmem:[#allocation5 + $0x250] sm:$0xff]  }
 0x35d   : > { %v5082_v1 = vsel %vm4721_vm2, %v5075_v5, %v5081_v48  ;;  %v5160_v50 = vsel %vm4717_vm0, %v5147_v44, %v5159_v12  ;;  %v9265_v38 = vrot.slane %v8797_v62, %v9242_v57  ;;  %v5115_v20 = vrot.slane %v8852_v33, %v9244_v28  ;;  %6859 = vmatprep.subr.bf16.mxu0 %v7206_v26  ;;  %v7210_v57 = vld [vmem:[#allocation5 + $0x1c8] sm:$0xff]   ;;  %v7213_v33 = vld [vmem:[#allocation5 + $0x140] sm:$0xff]   ;;  %v7217_v5 = vld [vmem:[#allocation5 + $0x278] sm:$0xff]  }
 0x35e   : > { %v5039_v16 = vsel %vm4715_vm15, %v9264_v40, %v5038_v45  ;;  %v5161_v47 = vsel %vm4719_vm1, %v5151_v37, %v5160_v50  ;;  %v5118_v21 = vsel %vm4713_vm14, %v5099_v56, %v8783_v41  ;;  %v5111_v49 = vrot.slane %v8797_v62, %v9244_v28  ;;  %6838 = vmatpush3.bf16.msra.mxu1 %v7207_v29  ;;  %v7212_v28 = vld [vmem:[#allocation5 + $0x188] sm:$0xff]   ;;  %v7214_v62 = vld [vmem:[#allocation5 + $0x1c0] sm:$0xff]   ;;  %v7222_v37 = vld [vmem:[#allocation5 + $0x2f0] sm:$0xff]  }
 0x35f   : > { %v5040_v10 = vsel %vm4717_vm0, %v5027_v23, %v5039_v16  ;;  %v5162_v4 = vsel %vm4721_vm2, %v5155_v18, %v5161_v47  ;;  %v5119_v0 = vsel %vm4715_vm15, %v5103_v13, %v5118_v21  ;;  %6839 = vmatprep.subr.bf16.mxu1 %v7209_v17  ;;  %v5168_v36 = vpack.c.bf16 %v9019_v43, %v9019_v43  ;;  %v7224_v43 = vld [vmem:[#allocation5 + $0x2b0] sm:$0xff]   ;;  %v7226_v18 = vld [vmem:[#allocation5 + $0x2e8] sm:$0xff]   ;;  %v7231_v53 = vld [vmem:[#allocation5 + $0x220] sm:$0xff]  }
 0x360   : > { %v5041_v61 = vsel %vm4719_vm1, %v9265_v38, %v5040_v10  ;;  %v5120_v55 = vsel %vm4717_vm0, %v5107_v42, %v5119_v0  ;;  %6860 = vmatpush3.bf16.msra.mxu0 %v7208_v54  ;;  %v5173_v58 = vpack.c.bf16 %v5082_v1, %v5082_v1  ;;  %v5170_v44 = vpack.c.bf16 %v9045_v34, %v9045_v34  ;;  %v7228_v34 = vld [vmem:[#allocation5 + $0x2a8] sm:$0xff]   ;;  %v7232_v14 = vld [vmem:[#allocation5 + $0x2a0] sm:$0xff]   ;;  %v7235_v3 = vld [vmem:[#allocation5 + $0x218] sm:$0xff]  }
 0x361   : > { %v9114_v7 = vsel %vm4721_vm2, %v5035_v9, %v5041_v61  ;;  %v5121_v41 = vsel %vm4719_vm1, %v5111_v49, %v5120_v55  ;;  %6861 = vmatprep.subr.bf16.mxu0 %v7210_v57  ;;  %v5175_v25 = vpack.c.bf16 %v5162_v4, %v5162_v4  ;;  %v7236_v23 = vld [vmem:[#allocation5 + $0x298] sm:$0xff]   ;;  %v7238_v8 = vld [vmem:[#allocation5 + $0x2d0] sm:$0xff]   ;;  %v7241_v9 = vld [vmem:[#allocation5 + $0x248] sm:$0xff]  }
 0x362   : > { %v9120_v6 = vsel %vm4721_vm2, %v5115_v20, %v5121_v41  ;;  %6840 = vmatpush3.bf16.msra.mxu1 %v7211_v63  ;;  %v7239_v11 = vld [vmem:[#allocation5 + $0x210] sm:$0xff]   ;;  %v7242_v19 = vld [vmem:[#allocation5 + $0x2c8] sm:$0xff]   ;;  %v7245_v31 = vld [vmem:[#allocation5 + $0x240] sm:$0xff]   ;;  %v5172_v29 = vpack.c.bf16 %v9114_v7, %v9114_v7 }
 0x363   : > { %6841 = vmatprep.subr.bf16.mxu1 %v7213_v33  ;;  %v7240_v56 = vld [vmem:[#allocation5 + $0x290] sm:$0xff]   ;;  %v7243_v48 = vld [vmem:[#allocation5 + $0x208] sm:$0xff]   ;;  %v7246_v45 = vld [vmem:[#allocation5 + $0x2c0] sm:$0xff]   ;;  %v5174_v1 = vpack.c.bf16 %v9120_v6, %v9120_v6 }
 0x364   : > { %6862 = vmatpush3.bf16.msra.mxu0 %v7212_v28  ;;  %v7244_v12 = vld [vmem:[#allocation5 + $0x288] sm:$0xff]   ;;  %v7247_v42 = vld [vmem:[#allocation5 + $0x200] sm:$0xff]  }
 0x365   : > { %6863 = vmatprep.subr.bf16.mxu0 %v7214_v62  ;;  %v7248_v26 = vld [vmem:[#allocation5 + $0x280] sm:$0xff]  }
 0x366   : > { %6842 = vmatpush3.bf16.msra.mxu1 %v7215_v32  ;;  %v6449_v63 = vld [vmem:[%s9190_s6] ss:$0 sm:$0xff] }
 0x367   : > { %6871 = vmatprep.subr.bf16.mxu1 %v7217_v5 }
 0x368   : > { %6864 = vmatpush3.bf16.msra.mxu0 %v7216_v22 }
 0x369   : > { %6064 = vmatmul.mubr.bf16.vlgmr.msra.gmra.mxu1 %v5168_v36  ;;  %6893 = vmatprep.subr.bf16.mxu0 %v7218_v30 }
 0x36a   : > { %6872 = vmatpush3.bf16.msra.mxu1 %v7219_v51  ;;  %6143 = vmatprep.mubr.bf16.mxu1 %v5173_v58 }
 0x36b   : > { %6873 = vmatprep.subr.bf16.mxu1 %v7221_v39  ;;  %6104 = vmatmul.mubr.bf16.vlgmr.msra.gmra.mxu0 %v5170_v44 }
 0x36c   : > { %6894 = vmatpush3.bf16.msra.mxu0 %v7220_v46  ;;  %6183 = vmatprep.mubr.bf16.mxu0 %v5175_v25  ;;  %v6192_v25 = vld [vmem:[%s364_s21] sm:$0xff] }
 0x36d   : > { %6895 = vmatprep.subr.bf16.mxu0 %v7222_v37 }
 0x36e   : > { %6874 = vmatpush3.bf16.msra.mxu1 %v7223_v35 }
 0x36f   : > { %6875 = vmatprep.subr.bf16.mxu1 %v7225_v59 }
 0x370   : > { %6896 = vmatpush3.bf16.msra.mxu0 %v7224_v43 }
 0x371   : > { %6897 = vmatprep.subr.bf16.mxu0 %v7226_v18 }
 0x372   : > { %6876 = vmatpush3.bf16.msra.mxu1 %v7227_v2 }
 0x373   : > { %6877 = vmatprep.subr.bf16.mxu1 %v7229_v27 }
 0x374   : > { %6898 = vmatpush3.bf16.msra.mxu0 %v7228_v34 }
 0x375   : > { %6899 = vmatprep.subr.bf16.mxu0 %v7230_v60 }
 0x376   : > { %6878 = vmatpush3.bf16.msra.mxu1 %v7231_v53 }
 0x377   : > { %6879 = vmatprep.subr.bf16.mxu1 %v7233_v24 }
 0x378   : > { %6900 = vmatpush3.bf16.msra.mxu0 %v7232_v14 }
 0x379   : > { %6901 = vmatprep.subr.bf16.mxu0 %v7234_v15 }
 0x37a   : > { %6880 = vmatpush3.bf16.msra.mxu1 %v7235_v3 }
 0x37b   : > { %6881 = vmatprep.subr.bf16.mxu1 %v7237_v52 }
 0x37c   : > { %6902 = vmatpush3.bf16.msra.mxu0 %v7236_v23 }
 0x37d   : > { %6903 = vmatprep.subr.bf16.mxu0 %v7238_v8 }
 0x37e   : > { %6882 = vmatpush3.bf16.msra.mxu1 %v7239_v11 }
 0x37f   : > { %6883 = vmatprep.subr.bf16.mxu1 %v7241_v9 }
 0x380   : > { %6904 = vmatpush3.bf16.msra.mxu0 %v7240_v56 }
 0x381   : > { %6905 = vmatprep.subr.bf16.mxu0 %v7242_v19 }
 0x382   : > { %6884 = vmatpush3.bf16.msra.mxu1 %v7243_v48 }
 0x383   : > { %6885 = vmatprep.subr.bf16.mxu1 %v7245_v31 }
 0x384   : > { %6906 = vmatpush3.bf16.msra.mxu0 %v7244_v12 }
 0x385   : > { %6907 = vmatprep.subr.bf16.mxu0 %v7246_v45 }
 0x386   : > { %6886 = vmatpush3.bf16.msra.mxu1 %v7247_v42 }
 0x388   : > { %6908 = vmatpush3.bf16.msra.mxu0 %v7248_v26 }
 0x389   : > { %6144 = vmatmul.mubr.bf16.vlgmr.msra.gmra.mxu1 %v5172_v29 }
 0x38b   : > { %6184 = vmatmul.mubr.bf16.vlgmr.msra.gmra.mxu0 %v5174_v1 }
 0x408   : > { %v6799_v50 = vpop.f32.mrf.mxu1 }
 0x40a   : > { %v6800_v40 = vpop.f32.mrf.mxu1 }
 0x40b   : > { %v6821_v16 = vpop.f32.mrf.mxu0  ;;  %v6801_v57 = vadd.f32 %v6800_v40, %v6799_v50 }
 0x40c   : > { %v6802_v13 = vpop.f32.mrf.mxu1 }
 0x40d   : > { %v6822_v17 = vpop.f32.mrf.mxu0  ;;  %v5986_v55 = vadd.f32 %v6801_v57, %v6449_v63 }
 0x40e   : > { %v6803_v47 = vpop.f32.mrf.mxu1  ;;  %v6823_v33 = vadd.f32 %v6822_v17, %v6821_v16 }
 0x40f   : > { %v6824_v10 = vpop.f32.mrf.mxu0 }
 0x410   : > { %v6026_v6 = vadd.f32 %v6823_v33, %v5986_v55 }
 0x411   : > { %v6825_v4 = vpop.f32.mrf.mxu0 }
 0x429   : > { %v6843_v38 = vpop.f32.mrf.mxu1 }
 0x42b   : > { %v6844_v61 = vpop.f32.mrf.mxu1  ;;  %v6865_v20 = vpop.f32.mrf.mxu0 }
 0x42c   : > { %v6845_v41 = vadd.f32 %v6844_v61, %v6843_v38 }
 0x42d   : > { %v6846_v21 = vpop.f32.mrf.mxu1  ;;  %v6866_v49 = vpop.f32.mrf.mxu0 }
 0x42e   : > { %v6066_v28 = vadd.f32 %v6845_v41, %v6026_v6  ;;  %v6867_v32 = vadd.f32 %v6866_v49, %v6865_v20 }
 0x42f   : > { %v6847_v54 = vpop.f32.mrf.mxu1  ;;  %v6868_v7 = vpop.f32.mrf.mxu0 }
 0x430   : > { %v6106_v22 = vadd.f32 %v6867_v32, %v6066_v28 }
 0x431   : > { %v6869_v0 = vpop.f32.mrf.mxu0 }
 0x449   : > { %v6887_v62 = vpop.f32.mrf.mxu1 }
 0x44b   : > { %v6888_v5 = vpop.f32.mrf.mxu1  ;;  %v6909_v30 = vpop.f32.mrf.mxu0 }
 0x44c   : > { %v6889_v51 = vadd.f32 %v6888_v5, %v6887_v62 }
 0x44d   : > { %v6890_v36 = vpop.f32.mrf.mxu1  ;;  %v6910_v58 = vpop.f32.mrf.mxu0 }
 0x44e   : > { %v6146_v39 = vadd.f32 %v6889_v51, %v6106_v22  ;;  %v6911_v46 = vadd.f32 %v6910_v58, %v6909_v30 }
 0x44f   : > { %v6891_v44 = vpop.f32.mrf.mxu1  ;;  %v6912_v37 = vpop.f32.mrf.mxu0 }
 0x450   : > { %v6186_v35 = vadd.f32 %v6911_v46, %v6146_v39 }
 0x451   : > { %v6913_v59 = vpop.f32.mrf.mxu0 }
 0x452   : > { %v6191_v43 = vmul.f32 11.313708, %v6186_v35 }
 0x454   : > { %v6193_v18 = vadd.f32 %v6192_v25, %v6191_v43 }
 0x456   : > { %6194 = vst [vmem:[%s355_s26] sm:$0xff] %v6193_v18 }
 0x457   : > { %7314 = shalt.err (!%p7311_p5)
}
 0x458   : > { %s7315_s24 = scalar_lea.hbm %s6209_s15, 128  ;;  %s7319_s22 = scalar_lea.hbm %s9192_s8, 768 }
 0x459   : > { %p7316_p6 = scmp.ne.s32.totalorder %s6209_s15, %s7315_s24  ;;  %p7320_p1 = scmp.lt.s32.totalorder %s6209_s15, %s9192_s8 }
 0x45a   : > { %p7321_p10 = scmp.lt.s32.totalorder %s7319_s22, %s7315_s24 }
 0x45b   : > { %p7317_p7 = pnand %p7316_p6, %p7509_p3 }
 0x45c   : > { %p7322_p12 = por %p7321_p10, %p7320_p1 }
 0x45d   : > { %p7318_p9 = pneg %p7317_p7 }
 0x45f   : > { %p7323_p0 = pnand %p7322_p12, %p7318_p9 }
 0x461   : > { %7326 = shalt.err (!%p7323_p0)
}
 0x462   : > { %6990 = dma.vmem_to_hbm [thread:$0]  (%p7509_p3), %s6212_s13, 128, %s6209_s15, %s6196_s23  }
 0x463 PF: > { %p7007_p11 = scmp.ge.s32.totalorder %s7401_s12, 2  ;;  %s6223_s10 = sand.u32 1, %s7373_s27  }
 0x464   : > { %s6224_s11 = scalar_lea.sflag [#allocation4], %s6223_s10 }
 0x465   : > { %p7000_p13 = pnand %p7007_p11, %p7518_p8 }
 0x467   : > { %p7001_p2 = pneg %p7000_p13 }
 0x469   : > { %7368 = dma.done.wait (%p7001_p2), %s6224_s11, 128  }
 0x46a   : > { %7370 = vsyncadd (%p7001_p2), %s6224_s11, 4294967168  ;;  %s23_s12 = sadd.s32 1, %s7401_s12   ;;  %s9266_s30 = sld [smem:[#allocation11_spill]] }
 0x46b   : > { %p20_p4 = scmp.ge.s32.totalorder %s23_s12, 8   ;;  %s9267_s9 = sld [smem:[#allocation12_spill]] }
 0x46c   : > { %s9268_s10 = sld [smem:[#allocation13_spill]]  ;;  %s9270_s27 = smov %s7377_s28 }
 0x46d   : > { %s9269_s11 = sld [smem:[#allocation14_spill]]  ;;  %s9271_s28 = smov %s7381_s29 }
 0x46e   : > { %s9272_s29 = smov %s7536_s25  ;;  %22 = sbr.rel (!%p20_p4) target bundleno = 7 (0x7), region = 100 }
 0x473   :  { %6229 = vsyncpa [#allocation3], 1 }
 0x474   :  { %6231 = vsyncpa [#allocation3 + $0x1], 1 }
 0x475   :  { %6232 = vsyncpa [#allocation6], 1 }
 0x476   :  { %6233 = vsyncpa [#allocation4], 1 }
 0x477   :  { %6235 = vsyncpa [#allocation4 + $0x1], 1 }

</bundles_post_ra>
